<compile_context>
chip_gen: v7x
topology: tpu7x:2x2x1
jax: 0.10.0
libtpu: 0.0.40
codegen_flags: <defaults>
</compile_context>

<pallas_src>
import functools

import jax
import jax.numpy as jnp
from jax.experimental import pallas as pl
from jax.experimental.pallas import tpu as pltpu

LRELU_SLOPE = 0.2
NUM_SCALES = 3
N_LAYER = 4
BASE_DIM = 64
INPUT_CHANNEL = 2               # opt.input_channel
INPUT_DIM = INPUT_CHANNEL * 2   # discriminator input channels (= 4)


def _round_up(x, m):
    return (x + m - 1) // m * m


# ============================== Pallas kernels ===============================

def _conv_mm_kernel(x_ref, w_ref, b_ref, o_ref, *, slope):
    """One Conv2dBlock as a matmul: (TM, K) @ (K, N) + bias, LeakyReLU(slope)."""
    acc = jnp.dot(x_ref[...], w_ref[...], preferred_element_type=jnp.float32)
    acc = acc + b_ref[...]
    acc = jnp.maximum(acc, slope * acc)          # LeakyReLU(0.2)
    o_ref[...] = acc.astype(o_ref.dtype)


def _head_kernel(x_ref, w4_ref, b4_ref, w5_ref, b5_ref, o_ref, acc_ref, *, slope):
    """Fused last Conv2dBlock + final 1x1 conv; K-gridded with fp32 accumulator."""
    @pl.when(pl.program_id(0) == 0)
    def _():
        acc_ref[...] = jnp.zeros_like(acc_ref)

    acc_ref[...] += jnp.dot(x_ref[...], w4_ref[...],
                            preferred_element_type=jnp.float32)

    @pl.when(pl.program_id(0) == pl.num_programs(0) - 1)
    def _():
        h = acc_ref[...] + b4_ref[...]
        h = jnp.maximum(h, slope * h)            # LeakyReLU(0.2)
        w5 = w5_ref[...].astype(jnp.float32)     # (1, C) row of the 1x1 conv
        out = jnp.sum(h * w5, axis=-1, keepdims=True) + b5_ref[...]
        o_ref[...] = out.astype(o_ref.dtype)


# ============================ pallas_call wrappers ===========================

def conv_block_mm(patches, w, b):
    """patches: (B, Ho, Wo, K) bf16 -> (B, Ho, Wo, N) bf16. Batch folded into M."""
    B, Ho, Wo, K = patches.shape
    N = w.shape[1]
    M = B * Ho * Wo
    x2 = patches.reshape(M, K)
    TM = min(_round_up(M, 8), 256)
    Mp = _round_up(M, TM)
    if Mp != M:
        x2 = jnp.pad(x2, ((0, Mp - M), (0, 0)))
    out = pl.pallas_call(
        functools.partial(_conv_mm_kernel, slope=LRELU_SLOPE),
        out_shape=jax.ShapeDtypeStruct((Mp, N), jnp.bfloat16),
        grid=(Mp // TM,),
        in_specs=[pl.BlockSpec((TM, K), lambda i: (i, 0)),
                  pl.BlockSpec((K, N), lambda i: (0, 0)),
                  pl.BlockSpec((1, N), lambda i: (0, 0))],
        out_specs=pl.BlockSpec((TM, N), lambda i: (i, 0)),
        compiler_params=pltpu.CompilerParams(
            dimension_semantics=("parallel",)),
    )(x2, w, b)
    return out[:M].reshape(B, Ho, Wo, N)


def head_mm(patches, w4, b4, w5, b5):
    """Fused (last Conv2dBlock + final 1x1 conv): (B,Ho,Wo,K) -> NCHW (B,1,Ho,Wo)."""
    B, Ho, Wo, K = patches.shape
    N = w4.shape[1]
    M = B * Ho * Wo
    Mp = _round_up(M, 8)
    x2 = patches.reshape(M, K)
    if Mp != M:
        x2 = jnp.pad(x2, ((0, Mp - M), (0, 0)))
    kb = K
    for cand in (768, 384, 256, 128):            # K block: multiple of 128 dividing K
        if K % cand == 0:
            kb = cand
            break
    out = pl.pallas_call(
        functools.partial(_head_kernel, slope=LRELU_SLOPE),
        out_shape=jax.ShapeDtypeStruct((Mp, 1), jnp.float32),
        grid=(K // kb,),
        in_specs=[pl.BlockSpec((Mp, kb), lambda k: (0, k)),
                  pl.BlockSpec((kb, N), lambda k: (k, 0)),
                  pl.BlockSpec((1, N), lambda k: (0, 0)),
                  pl.BlockSpec((1, N), lambda k: (0, 0)),
                  pl.BlockSpec((1, 1), lambda k: (0, 0))],
        out_specs=pl.BlockSpec((Mp, 1), lambda k: (0, 0)),
        scratch_shapes=[pltpu.VMEM((Mp, N), jnp.float32)],
        compiler_params=pltpu.CompilerParams(
            dimension_semantics=("arbitrary",)),
    )(x2, w4, b4, w5, b5)
    return out[:M].reshape(B, 1, Ho, Wo)


# ================================ XLA glue ===================================

def _stride2_taps(xp, Ho, Wo):
    """The 9 stride-2 3x3 tap slices of a zero-padded NHWC tensor."""
    taps = []
    for i in range(3):
        rows = xp[:, i::2, :, :][:, :Ho]
        for j in range(3):
            taps.append(rows[:, :, j::2, :][:, :, :Wo])
    return taps


def im2col_s2(x):
    """Stride-2, 3x3, zero-pad-1 im2col: (B,H,W,C) -> (B,Ho,Wo,9C) bf16.

    Tap ordering matches the weight layout (i*3+j)*Cin + c used in init_params.
    """
    B, H, W, C = x.shape
    Ho = (H - 1) // 2 + 1
    Wo = (W - 1) // 2 + 1
    xp = jnp.pad(x, ((0, 0), (1, 1), (1, 1), (0, 0)))
    taps = _stride2_taps(xp, Ho, Wo)
    return jnp.concatenate(taps, axis=-1).astype(jnp.bfloat16)


def avgpool_s2(x):
    """AvgPool2d(3, stride=2, padding=1, count_include_pad=False) on NHWC."""
    B, H, W, C = x.shape
    Ho = (H - 1) // 2 + 1
    Wo = (W - 1) // 2 + 1
    xp = jnp.pad(x, ((0, 0), (1, 1), (1, 1), (0, 0)))
    taps = _stride2_taps(xp, Ho, Wo)
    s = taps[0]
    for t in taps[1:]:
        s = s + t

    def _valid(n, size):
        idx = jnp.arange(n)
        v = jnp.zeros((n,), x.dtype)
        for d in (-1, 0, 1):
            r = 2 * idx + d
            v = v + ((r >= 0) & (r < size)).astype(x.dtype)
        return v

    count = _valid(Ho, H)[:, None] * _valid(Wo, W)[None, :]
    return s / count[None, :, :, None]


# ============================== forward pass =================================

def scale_forward(p, x):
    """One discriminator scale on NHWC input x; returns NCHW logits (B,1,Ho,Wo)."""
    h = x
    for l in range(N_LAYER - 1):                       # Conv2dBlocks 0..2
        h = conv_block_mm(im2col_s2(h), p[f"w{l}"], p[f"b{l}"])
    patches = im2col_s2(h)                             # Conv2dBlock 3 (fused in head)
    return head_mm(patches, p[f"w{N_LAYER - 1}"], p[f"b{N_LAYER - 1}"],
                   p["w_out"], p["b_out"])


def ms_image_dis_forward(params, x_nchw):
    """MsImageDisV2.forward: returns the list of per-scale logit maps (NCHW)."""
    x = jnp.transpose(x_nchw, (0, 2, 3, 1))            # NCHW -> NHWC
    outputs = []
    for s in range(NUM_SCALES):
        outputs.append(scale_forward(params[s], x))
        if s + 1 < NUM_SCALES:
            x = avgpool_s2(x)
    return outputs


# ============================== parameter init ===============================

def init_params(key):
    """3 scales x (4 Conv2dBlocks + final 1x1 conv). Weights in im2col layout.

    A torch checkpoint's conv weight (Cout,Cin,3,3) would map via
    w.permute(2,3,1,0).reshape(9*Cin, Cout).
    """
    scales = []
    for sk in jax.random.split(key, NUM_SCALES):
        ks = jax.random.split(sk, N_LAYER + 1)
        p = {}
        cin, cout = INPUT_DIM, BASE_DIM
        for l in range(N_LAYER):
            k1, k2 = jax.random.split(ks[l])
            fan_in = 9 * cin
            w = jax.random.normal(k1, (fan_in, cout), jnp.float32) / (fan_in ** 0.5)
            b = jax.random.normal(k2, (1, cout), jnp.float32) * 0.01
            p[f"w{l}"] = w.astype(jnp.bfloat16)
            p[f"b{l}"] = b
            cin, cout = cout, cout * 2
        k1, k2 = jax.random.split(ks[N_LAYER])
        w = jax.random.normal(k1, (1, cin), jnp.float32) / (cin ** 0.5)
        b = jax.random.normal(k2, (1, 1), jnp.float32) * 0.01
        p["w_out"] = w.astype(jnp.bfloat16)            # final 1x1 conv: (1, 512)
        p["b_out"] = b
        scales.append(p)
    return scales


# ==================================== main ===================================

if __name__ == "__main__":
    key = jax.random.PRNGKey(0)
    pkey, xkey = jax.random.split(key)

    params = init_params(pkey)
    x = jax.random.normal(xkey, (2, INPUT_DIM, 32, 32), jnp.float32)

    fwd = jax.jit(ms_image_dis_forward)
    outs = fwd(params, x)
    jax.block_until_ready(outs)

    # 32x32 input: 4 stride-2 convs -> 2x2 logits at scale 0; downsampled
    # inputs give 1x1 logit maps at scales 1 and 2 (matches the PyTorch module).
    assert outs[0].shape == (2, 1, 2, 2)
    assert outs[1].shape == (2, 1, 1, 1)
    assert outs[2].shape == (2, 1, 1, 1)
    print("KERNEL_OK")
</pallas_src>

<mosaic_0001>
module attributes {stable_mosaic.version = 11 : i64} {
  func.func @_conv_mm_kernel(%arg0: i32, %arg1: memref<256x36xbf16, #tpu.memory_space<vmem>>, %arg2: memref<36x64xbf16, #tpu.memory_space<vmem>>, %arg3: memref<1x64xf32, #tpu.memory_space<vmem>>, %arg4: memref<256x64xbf16, #tpu.memory_space<vmem>>) attributes {dimension_semantics = [#tpu.dimension_semantics<parallel>], iteration_bounds = array<i64: 2>, scalar_prefetch = 0 : i64, scratch_operands = 0 : i64, tpu.core_type = #tpu.core_type<tc>, window_params = [{transform_indices = @transform_0, window_bounds = array<i64: 256, 36>}, {pipeline_mode = #tpu.pipeline_mode<synchronous>, transform_indices = @transform_1, window_bounds = array<i64: 36, 64>}, {pipeline_mode = #tpu.pipeline_mode<synchronous>, transform_indices = @transform_2, window_bounds = array<i64: 1, 64>}, {transform_indices = @transform_3, window_bounds = array<i64: 256, 64>}]} {
    %c0 = arith.constant 0 : index
    %c0_0 = arith.constant 0 : index
    %0 = vector.load %arg1[%c0, %c0_0] : memref<256x36xbf16, #tpu.memory_space<vmem>>, vector<256x36xbf16>
    %c0_1 = arith.constant 0 : index
    %c0_2 = arith.constant 0 : index
    %1 = vector.load %arg2[%c0_1, %c0_2] : memref<36x64xbf16, #tpu.memory_space<vmem>>, vector<36x64xbf16>
    %cst = arith.constant dense<0.000000e+00> : vector<256x64xf32>
    %2 = tpu.matmul %0, %1, %cst {dimension_numbers = #tpu.dot_dimension_numbers<[1], [0], [0], [1], [0, 0, 1, 1], [], []>} : vector<256x36xbf16>, vector<36x64xbf16>, vector<256x64xf32> -> vector<256x64xf32>
    %c0_3 = arith.constant 0 : index
    %c0_4 = arith.constant 0 : index
    %3 = vector.load %arg3[%c0_3, %c0_4] : memref<1x64xf32, #tpu.memory_space<vmem>>, vector<1x64xf32>
    %4 = vector.broadcast %3 : vector<1x64xf32> to vector<256x64xf32>
    %5 = arith.addf %2, %4 : vector<256x64xf32>
    %cst_5 = arith.constant 2.000000e-01 : f32
    %6 = vector.broadcast %cst_5 : f32 to vector<256x64xf32>
    %7 = arith.mulf %6, %5 : vector<256x64xf32>
    %8 = arith.maximumf %5, %7 : vector<256x64xf32>
    %9 = arith.truncf %8 : vector<256x64xf32> to vector<256x64xbf16>
    %c0_6 = arith.constant 0 : index
    %c0_7 = arith.constant 0 : index
    %10 = vector.load %arg4[%c0_6, %c0_7] : memref<256x64xbf16, #tpu.memory_space<vmem>>, vector<256x64xbf16>
    tpu.vector_store %arg4[%c0_6, %c0_7], %9 {strides = array<i32>} : memref<256x64xbf16, #tpu.memory_space<vmem>>, vector<256x64xbf16>,
    return
  }
  func.func @transform_0(%arg0: i32) -> (i32, i32) {
    %c0_i32 = arith.constant 0 : i32
    %c0_i32_0 = arith.constant 0 : i32
    return %arg0, %c0_i32 : i32, i32
  }
  func.func @transform_1(%arg0: i32) -> (i32, i32) {
    %c0_i32 = arith.constant 0 : i32
    %c0_i32_0 = arith.constant 0 : i32
    %c0_i32_1 = arith.constant 0 : i32
    return %c0_i32, %c0_i32_0 : i32, i32
  }
  func.func @transform_2(%arg0: i32) -> (i32, i32) {
    %c0_i32 = arith.constant 0 : i32
    %c0_i32_0 = arith.constant 0 : i32
    %c0_i32_1 = arith.constant 0 : i32
    return %c0_i32, %c0_i32_0 : i32, i32
  }
  func.func @transform_3(%arg0: i32) -> (i32, i32) {
    %c0_i32 = arith.constant 0 : i32
    %c0_i32_0 = arith.constant 0 : i32
    return %arg0, %c0_i32 : i32, i32
  }
}

module attributes {stable_mosaic.version = 11 : i64} {
  func.func @_conv_mm_kernel(%arg0: i32, %arg1: memref<128x576xbf16, #tpu.memory_space<vmem>>, %arg2: memref<576x128xbf16, #tpu.memory_space<vmem>>, %arg3: memref<1x128xf32, #tpu.memory_space<vmem>>, %arg4: memref<128x128xbf16, #tpu.memory_space<vmem>>) attributes {dimension_semantics = [#tpu.dimension_semantics<parallel>], iteration_bounds = array<i64: 1>, scalar_prefetch = 0 : i64, scratch_operands = 0 : i64, tpu.core_type = #tpu.core_type<tc>, window_params = [{transform_indices = @transform_0, window_bounds = array<i64: 128, 576>}, {pipeline_mode = #tpu.pipeline_mode<synchronous>, transform_indices = @transform_1, window_bounds = array<i64: 576, 128>}, {pipeline_mode = #tpu.pipeline_mode<synchronous>, transform_indices = @transform_2, window_bounds = array<i64: 1, 128>}, {transform_indices = @transform_3, window_bounds = array<i64: 128, 128>}]} {
    %c0 = arith.constant 0 : index
    %c0_0 = arith.constant 0 : index
    %0 = vector.load %arg1[%c0, %c0_0] : memref<128x576xbf16, #tpu.memory_space<vmem>>, vector<128x576xbf16>
    %c0_1 = arith.constant 0 : index
    %c0_2 = arith.constant 0 : index
    %1 = vector.load %arg2[%c0_1, %c0_2] : memref<576x128xbf16, #tpu.memory_space<vmem>>, vector<576x128xbf16>
    %cst = arith.constant dense<0.000000e+00> : vector<128x128xf32>
    %2 = tpu.matmul %0, %1, %cst {dimension_numbers = #tpu.dot_dimension_numbers<[1], [0], [0], [1], [0, 0, 1, 1], [], []>} : vector<128x576xbf16>, vector<576x128xbf16>, vector<128x128xf32> -> vector<128x128xf32>
    %c0_3 = arith.constant 0 : index
    %c0_4 = arith.constant 0 : index
    %3 = vector.load %arg3[%c0_3, %c0_4] : memref<1x128xf32, #tpu.memory_space<vmem>>, vector<1x128xf32>
    %4 = vector.broadcast %3 : vector<1x128xf32> to vector<128x128xf32>
    %5 = arith.addf %2, %4 : vector<128x128xf32>
    %cst_5 = arith.constant 2.000000e-01 : f32
    %6 = vector.broadcast %cst_5 : f32 to vector<128x128xf32>
    %7 = arith.mulf %6, %5 : vector<128x128xf32>
    %8 = arith.maximumf %5, %7 : vector<128x128xf32>
    %9 = arith.truncf %8 : vector<128x128xf32> to vector<128x128xbf16>
    %c0_6 = arith.constant 0 : index
    %c0_7 = arith.constant 0 : index
    %10 = vector.load %arg4[%c0_6, %c0_7] : memref<128x128xbf16, #tpu.memory_space<vmem>>, vector<128x128xbf16>
    tpu.vector_store %arg4[%c0_6, %c0_7], %9 {strides = array<i32>} : memref<128x128xbf16, #tpu.memory_space<vmem>>, vector<128x128xbf16>,
    return
  }
  func.func @transform_0(%arg0: i32) -> (i32, i32) {
    %c0_i32 = arith.constant 0 : i32
    %c0_i32_0 = arith.constant 0 : i32
    return %arg0, %c0_i32 : i32, i32
  }
  func.func @transform_1(%arg0: i32) -> (i32, i32) {
    %c0_i32 = arith.constant 0 : i32
    %c0_i32_0 = arith.constant 0 : i32
    %c0_i32_1 = arith.constant 0 : i32
    return %c0_i32, %c0_i32_0 : i32, i32
  }
  func.func @transform_2(%arg0: i32) -> (i32, i32) {
    %c0_i32 = arith.constant 0 : i32
    %c0_i32_0 = arith.constant 0 : i32
    %c0_i32_1 = arith.constant 0 : i32
    return %c0_i32, %c0_i32_0 : i32, i32
  }
  func.func @transform_3(%arg0: i32) -> (i32, i32) {
    %c0_i32 = arith.constant 0 : i32
    %c0_i32_0 = arith.constant 0 : i32
    return %arg0, %c0_i32 : i32, i32
  }
}

module attributes {stable_mosaic.version = 11 : i64} {
  func.func @_conv_mm_kernel(%arg0: i32, %arg1: memref<32x1152xbf16, #tpu.memory_space<vmem>>, %arg2: memref<1152x256xbf16, #tpu.memory_space<vmem>>, %arg3: memref<1x256xf32, #tpu.memory_space<vmem>>, %arg4: memref<32x256xbf16, #tpu.memory_space<vmem>>) attributes {dimension_semantics = [#tpu.dimension_semantics<parallel>], iteration_bounds = array<i64: 1>, scalar_prefetch = 0 : i64, scratch_operands = 0 : i64, tpu.core_type = #tpu.core_type<tc>, window_params = [{transform_indices = @transform_0, window_bounds = array<i64: 32, 1152>}, {pipeline_mode = #tpu.pipeline_mode<synchronous>, transform_indices = @transform_1, window_bounds = array<i64: 1152, 256>}, {pipeline_mode = #tpu.pipeline_mode<synchronous>, transform_indices = @transform_2, window_bounds = array<i64: 1, 256>}, {transform_indices = @transform_3, window_bounds = array<i64: 32, 256>}]} {
    %c0 = arith.constant 0 : index
    %c0_0 = arith.constant 0 : index
    %0 = vector.load %arg1[%c0, %c0_0] : memref<32x1152xbf16, #tpu.memory_space<vmem>>, vector<32x1152xbf16>
    %c0_1 = arith.constant 0 : index
    %c0_2 = arith.constant 0 : index
    %1 = vector.load %arg2[%c0_1, %c0_2] : memref<1152x256xbf16, #tpu.memory_space<vmem>>, vector<1152x256xbf16>
    %cst = arith.constant dense<0.000000e+00> : vector<32x256xf32>
    %2 = tpu.matmul %0, %1, %cst {dimension_numbers = #tpu.dot_dimension_numbers<[1], [0], [0], [1], [0, 0, 1, 1], [], []>} : vector<32x1152xbf16>, vector<1152x256xbf16>, vector<32x256xf32> -> vector<32x256xf32>
    %c0_3 = arith.constant 0 : index
    %c0_4 = arith.constant 0 : index
    %3 = vector.load %arg3[%c0_3, %c0_4] : memref<1x256xf32, #tpu.memory_space<vmem>>, vector<1x256xf32>
    %4 = vector.broadcast %3 : vector<1x256xf32> to vector<32x256xf32>
    %5 = arith.addf %2, %4 : vector<32x256xf32>
    %cst_5 = arith.constant 2.000000e-01 : f32
    %6 = vector.broadcast %cst_5 : f32 to vector<32x256xf32>
    %7 = arith.mulf %6, %5 : vector<32x256xf32>
    %8 = arith.maximumf %5, %7 : vector<32x256xf32>
    %9 = arith.truncf %8 : vector<32x256xf32> to vector<32x256xbf16>
    %c0_6 = arith.constant 0 : index
    %c0_7 = arith.constant 0 : index
    %10 = vector.load %arg4[%c0_6, %c0_7] : memref<32x256xbf16, #tpu.memory_space<vmem>>, vector<32x256xbf16>
    tpu.vector_store %arg4[%c0_6, %c0_7], %9 {strides = array<i32>} : memref<32x256xbf16, #tpu.memory_space<vmem>>, vector<32x256xbf16>,
    return
  }
  func.func @transform_0(%arg0: i32) -> (i32, i32) {
    %c0_i32 = arith.constant 0 : i32
    %c0_i32_0 = arith.constant 0 : i32
    return %arg0, %c0_i32 : i32, i32
  }
  func.func @transform_1(%arg0: i32) -> (i32, i32) {
    %c0_i32 = arith.constant 0 : i32
    %c0_i32_0 = arith.constant 0 : i32
    %c0_i32_1 = arith.constant 0 : i32
    return %c0_i32, %c0_i32_0 : i32, i32
  }
  func.func @transform_2(%arg0: i32) -> (i32, i32) {
    %c0_i32 = arith.constant 0 : i32
    %c0_i32_0 = arith.constant 0 : i32
    %c0_i32_1 = arith.constant 0 : i32
    return %c0_i32, %c0_i32_0 : i32, i32
  }
  func.func @transform_3(%arg0: i32) -> (i32, i32) {
    %c0_i32 = arith.constant 0 : i32
    %c0_i32_0 = arith.constant 0 : i32
    return %arg0, %c0_i32 : i32, i32
  }
}

module attributes {stable_mosaic.version = 11 : i64} {
  func.func @_head_kernel(%arg0: i32, %arg1: memref<8x768xbf16, #tpu.memory_space<vmem>>, %arg2: memref<768x512xbf16, #tpu.memory_space<vmem>>, %arg3: memref<1x512xf32, #tpu.memory_space<vmem>>, %arg4: memref<1x512xbf16, #tpu.memory_space<vmem>>, %arg5: memref<1x1xf32, #tpu.memory_space<vmem>>, %arg6: memref<8x1xf32, #tpu.memory_space<vmem>>, %arg7: memref<8x512xf32, #tpu.memory_space<vmem>>) attributes {dimension_semantics = [#tpu.dimension_semantics<arbitrary>], iteration_bounds = array<i64: 3>, scalar_prefetch = 0 : i64, scratch_operands = 1 : i64, tpu.core_type = #tpu.core_type<tc>, window_params = [{transform_indices = @transform_0, window_bounds = array<i64: 8, 768>}, {transform_indices = @transform_1, window_bounds = array<i64: 768, 512>}, {pipeline_mode = #tpu.pipeline_mode<synchronous>, transform_indices = @transform_2, window_bounds = array<i64: 1, 512>}, {pipeline_mode = #tpu.pipeline_mode<synchronous>, transform_indices = @transform_3, window_bounds = array<i64: 1, 512>}, {pipeline_mode = #tpu.pipeline_mode<synchronous>, transform_indices = @transform_4, window_bounds = array<i64: 1, 1>}, {pipeline_mode = #tpu.pipeline_mode<synchronous>, transform_indices = @transform_5, window_bounds = array<i64: 8, 1>}]} {
    %c0_i32 = arith.constant 0 : i32
    %0 = arith.cmpi eq, %arg0, %c0_i32 : i32
    %1 = arith.extui %0 : i1 to i32
    %c0_i32_0 = arith.constant 0 : i32
    %2 = arith.cmpi ne, %1, %c0_i32_0 : i32
    scf.if %2 {
      %cst_9 = arith.constant 0.000000e+00 : f32
      %12 = vector.broadcast %cst_9 : f32 to vector<8x512xf32>
      %c0_10 = arith.constant 0 : index
      %c0_11 = arith.constant 0 : index
      %13 = vector.load %arg7[%c0_10, %c0_11] : memref<8x512xf32, #tpu.memory_space<vmem>>, vector<8x512xf32>
      tpu.vector_store %arg7[%c0_10, %c0_11], %12 {strides = array<i32>} : memref<8x512xf32, #tpu.memory_space<vmem>>, vector<8x512xf32>,
    } else {
    }
    %c0 = arith.constant 0 : index
    %c0_1 = arith.constant 0 : index
    %3 = vector.load %arg7[%c0, %c0_1] : memref<8x512xf32, #tpu.memory_space<vmem>>, vector<8x512xf32>
    %c0_2 = arith.constant 0 : index
    %c0_3 = arith.constant 0 : index
    %4 = vector.load %arg1[%c0_2, %c0_3] : memref<8x768xbf16, #tpu.memory_space<vmem>>, vector<8x768xbf16>
    %c0_4 = arith.constant 0 : index
    %c0_5 = arith.constant 0 : index
    %5 = vector.load %arg2[%c0_4, %c0_5] : memref<768x512xbf16, #tpu.memory_space<vmem>>, vector<768x512xbf16>
    %cst = arith.constant dense<0.000000e+00> : vector<8x512xf32>
    %6 = tpu.matmul %4, %5, %cst {dimension_numbers = #tpu.dot_dimension_numbers<[1], [0], [0], [1], [0, 0, 1, 1], [], []>} : vector<8x768xbf16>, vector<768x512xbf16>, vector<8x512xf32> -> vector<8x512xf32>
    %7 = arith.addf %3, %6 : vector<8x512xf32>
    %c0_6 = arith.constant 0 : index
    %c0_7 = arith.constant 0 : index
    %8 = vector.load %arg7[%c0_6, %c0_7] : memref<8x512xf32, #tpu.memory_space<vmem>>, vector<8x512xf32>
    tpu.vector_store %arg7[%c0_6, %c0_7], %7 {strides = array<i32>} : memref<8x512xf32, #tpu.memory_space<vmem>>, vector<8x512xf32>,
    %c2_i32 = arith.constant 2 : i32
    %9 = arith.cmpi eq, %arg0, %c2_i32 : i32
    %10 = arith.extui %9 : i1 to i32
    %c0_i32_8 = arith.constant 0 : i32
    %11 = arith.cmpi ne, %10, %c0_i32_8 : i32
    scf.if %11 {
      %c0_9 = arith.constant 0 : index
      %c0_10 = arith.constant 0 : index
      %12 = vector.load %arg7[%c0_9, %c0_10] : memref<8x512xf32, #tpu.memory_space<vmem>>, vector<8x512xf32>
      %c0_11 = arith.constant 0 : index
      %c0_12 = arith.constant 0 : index
      %13 = vector.load %arg3[%c0_11, %c0_12] : memref<1x512xf32, #tpu.memory_space<vmem>>, vector<1x512xf32>
      %14 = vector.broadcast %13 : vector<1x512xf32> to vector<8x512xf32>
      %15 = arith.addf %12, %14 : vector<8x512xf32>
      %cst_13 = arith.constant 2.000000e-01 : f32
      %16 = vector.broadcast %cst_13 : f32 to vector<8x512xf32>
      %17 = arith.mulf %16, %15 : vector<8x512xf32>
      %18 = arith.maximumf %15, %17 : vector<8x512xf32>
      %c0_14 = arith.constant 0 : index
      %c0_15 = arith.constant 0 : index
      %19 = vector.load %arg4[%c0_14, %c0_15] : memref<1x512xbf16, #tpu.memory_space<vmem>>, vector<1x512xbf16>
      %20 = arith.extf %19 : vector<1x512xbf16> to vector<1x512xf32>
      %21 = vector.broadcast %20 : vector<1x512xf32> to vector<8x512xf32>
      %22 = arith.mulf %18, %21 : vector<8x512xf32>
      %cst_16 = arith.constant dense<0.000000e+00> : vector<8xf32>
      %23 = vector.multi_reduction <add>, %22, %cst_16 [1] : vector<8x512xf32> to vector<8xf32>
      %24 = vector.shape_cast %23 : vector<8xf32> to vector<8x1xf32>
      %c0_17 = arith.constant 0 : index
      %c0_18 = arith.constant 0 : index
      %25 = vector.load %arg5[%c0_17, %c0_18] : memref<1x1xf32, #tpu.memory_space<vmem>>, vector<1x1xf32>
      %26 = vector.broadcast %25 : vector<1x1xf32> to vector<8x1xf32>
      %27 = arith.addf %24, %26 : vector<8x1xf32>
      %c0_19 = arith.constant 0 : index
      %c0_20 = arith.constant 0 : index
      %28 = vector.load %arg6[%c0_19, %c0_20] : memref<8x1xf32, #tpu.memory_space<vmem>>, vector<8x1xf32>
      tpu.vector_store %arg6[%c0_19, %c0_20], %27 {strides = array<i32>} : memref<8x1xf32, #tpu.memory_space<vmem>>, vector<8x1xf32>,
    } else {
    }
    return
  }
  func.func @transform_0(%arg0: i32) -> (i32, i32) {
    %c0_i32 = arith.constant 0 : i32
    %c0_i32_0 = arith.constant 0 : i32
    return %c0_i32, %arg0 : i32, i32
  }
  func.func @transform_1(%arg0: i32) -> (i32, i32) {
    %c0_i32 = arith.constant 0 : i32
    %c0_i32_0 = arith.constant 0 : i32
    return %arg0, %c0_i32 : i32, i32
  }
  func.func @transform_2(%arg0: i32) -> (i32, i32) {
    %c0_i32 = arith.constant 0 : i32
    %c0_i32_0 = arith.constant 0 : i32
    %c0_i32_1 = arith.constant 0 : i32
    return %c0_i32, %c0_i32_0 : i32, i32
  }
  func.func @transform_3(%arg0: i32) -> (i32, i32) {
    %c0_i32 = arith.constant 0 : i32
    %c0_i32_0 = arith.constant 0 : i32
    %c0_i32_1 = arith.constant 0 : i32
    return %c0_i32, %c0_i32_0 : i32, i32
  }
  func.func @transform_4(%arg0: i32) -> (i32, i32) {
    %c0_i32 = arith.constant 0 : i32
    %c0_i32_0 = arith.constant 0 : i32
    %c0_i32_1 = arith.constant 0 : i32
    return %c0_i32, %c0_i32_0 : i32, i32
  }
  func.func @transform_5(%arg0: i32) -> (i32, i32) {
    %c0_i32 = arith.constant 0 : i32
    %c0_i32_0 = arith.constant 0 : i32
    %c0_i32_1 = arith.constant 0 : i32
    return %c0_i32, %c0_i32_0 : i32, i32
  }
}

module attributes {stable_mosaic.version = 11 : i64} {
  func.func @_conv_mm_kernel(%arg0: i32, %arg1: memref<128x36xbf16, #tpu.memory_space<vmem>>, %arg2: memref<36x64xbf16, #tpu.memory_space<vmem>>, %arg3: memref<1x64xf32, #tpu.memory_space<vmem>>, %arg4: memref<128x64xbf16, #tpu.memory_space<vmem>>) attributes {dimension_semantics = [#tpu.dimension_semantics<parallel>], iteration_bounds = array<i64: 1>, scalar_prefetch = 0 : i64, scratch_operands = 0 : i64, tpu.core_type = #tpu.core_type<tc>, window_params = [{transform_indices = @transform_0, window_bounds = array<i64: 128, 36>}, {pipeline_mode = #tpu.pipeline_mode<synchronous>, transform_indices = @transform_1, window_bounds = array<i64: 36, 64>}, {pipeline_mode = #tpu.pipeline_mode<synchronous>, transform_indices = @transform_2, window_bounds = array<i64: 1, 64>}, {transform_indices = @transform_3, window_bounds = array<i64: 128, 64>}]} {
    %c0 = arith.constant 0 : index
    %c0_0 = arith.constant 0 : index
    %0 = vector.load %arg1[%c0, %c0_0] : memref<128x36xbf16, #tpu.memory_space<vmem>>, vector<128x36xbf16>
    %c0_1 = arith.constant 0 : index
    %c0_2 = arith.constant 0 : index
    %1 = vector.load %arg2[%c0_1, %c0_2] : memref<36x64xbf16, #tpu.memory_space<vmem>>, vector<36x64xbf16>
    %cst = arith.constant dense<0.000000e+00> : vector<128x64xf32>
    %2 = tpu.matmul %0, %1, %cst {dimension_numbers = #tpu.dot_dimension_numbers<[1], [0], [0], [1], [0, 0, 1, 1], [], []>} : vector<128x36xbf16>, vector<36x64xbf16>, vector<128x64xf32> -> vector<128x64xf32>
    %c0_3 = arith.constant 0 : index
    %c0_4 = arith.constant 0 : index
    %3 = vector.load %arg3[%c0_3, %c0_4] : memref<1x64xf32, #tpu.memory_space<vmem>>, vector<1x64xf32>
    %4 = vector.broadcast %3 : vector<1x64xf32> to vector<128x64xf32>
    %5 = arith.addf %2, %4 : vector<128x64xf32>
    %cst_5 = arith.constant 2.000000e-01 : f32
    %6 = vector.broadcast %cst_5 : f32 to vector<128x64xf32>
    %7 = arith.mulf %6, %5 : vector<128x64xf32>
    %8 = arith.maximumf %5, %7 : vector<128x64xf32>
    %9 = arith.truncf %8 : vector<128x64xf32> to vector<128x64xbf16>
    %c0_6 = arith.constant 0 : index
    %c0_7 = arith.constant 0 : index
    %10 = vector.load %arg4[%c0_6, %c0_7] : memref<128x64xbf16, #tpu.memory_space<vmem>>, vector<128x64xbf16>
    tpu.vector_store %arg4[%c0_6, %c0_7], %9 {strides = array<i32>} : memref<128x64xbf16, #tpu.memory_space<vmem>>, vector<128x64xbf16>,
    return
  }
  func.func @transform_0(%arg0: i32) -> (i32, i32) {
    %c0_i32 = arith.constant 0 : i32
    %c0_i32_0 = arith.constant 0 : i32
    return %arg0, %c0_i32 : i32, i32
  }
  func.func @transform_1(%arg0: i32) -> (i32, i32) {
    %c0_i32 = arith.constant 0 : i32
    %c0_i32_0 = arith.constant 0 : i32
    %c0_i32_1 = arith.constant 0 : i32
    return %c0_i32, %c0_i32_0 : i32, i32
  }
  func.func @transform_2(%arg0: i32) -> (i32, i32) {
    %c0_i32 = arith.constant 0 : i32
    %c0_i32_0 = arith.constant 0 : i32
    %c0_i32_1 = arith.constant 0 : i32
    return %c0_i32, %c0_i32_0 : i32, i32
  }
  func.func @transform_3(%arg0: i32) -> (i32, i32) {
    %c0_i32 = arith.constant 0 : i32
    %c0_i32_0 = arith.constant 0 : i32
    return %arg0, %c0_i32 : i32, i32
  }
}

module attributes {stable_mosaic.version = 11 : i64} {
  func.func @_conv_mm_kernel(%arg0: i32, %arg1: memref<32x576xbf16, #tpu.memory_space<vmem>>, %arg2: memref<576x128xbf16, #tpu.memory_space<vmem>>, %arg3: memref<1x128xf32, #tpu.memory_space<vmem>>, %arg4: memref<32x128xbf16, #tpu.memory_space<vmem>>) attributes {dimension_semantics = [#tpu.dimension_semantics<parallel>], iteration_bounds = array<i64: 1>, scalar_prefetch = 0 : i64, scratch_operands = 0 : i64, tpu.core_type = #tpu.core_type<tc>, window_params = [{transform_indices = @transform_0, window_bounds = array<i64: 32, 576>}, {pipeline_mode = #tpu.pipeline_mode<synchronous>, transform_indices = @transform_1, window_bounds = array<i64: 576, 128>}, {pipeline_mode = #tpu.pipeline_mode<synchronous>, transform_indices = @transform_2, window_bounds = array<i64: 1, 128>}, {transform_indices = @transform_3, window_bounds = array<i64: 32, 128>}]} {
    %c0 = arith.constant 0 : index
    %c0_0 = arith.constant 0 : index
    %0 = vector.load %arg1[%c0, %c0_0] : memref<32x576xbf16, #tpu.memory_space<vmem>>, vector<32x576xbf16>
    %c0_1 = arith.constant 0 : index
    %c0_2 = arith.constant 0 : index
    %1 = vector.load %arg2[%c0_1, %c0_2] : memref<576x128xbf16, #tpu.memory_space<vmem>>, vector<576x128xbf16>
    %cst = arith.constant dense<0.000000e+00> : vector<32x128xf32>
    %2 = tpu.matmul %0, %1, %cst {dimension_numbers = #tpu.dot_dimension_numbers<[1], [0], [0], [1], [0, 0, 1, 1], [], []>} : vector<32x576xbf16>, vector<576x128xbf16>, vector<32x128xf32> -> vector<32x128xf32>
    %c0_3 = arith.constant 0 : index
    %c0_4 = arith.constant 0 : index
    %3 = vector.load %arg3[%c0_3, %c0_4] : memref<1x128xf32, #tpu.memory_space<vmem>>, vector<1x128xf32>
    %4 = vector.broadcast %3 : vector<1x128xf32> to vector<32x128xf32>
    %5 = arith.addf %2, %4 : vector<32x128xf32>
    %cst_5 = arith.constant 2.000000e-01 : f32
    %6 = vector.broadcast %cst_5 : f32 to vector<32x128xf32>
    %7 = arith.mulf %6, %5 : vector<32x128xf32>
    %8 = arith.maximumf %5, %7 : vector<32x128xf32>
    %9 = arith.truncf %8 : vector<32x128xf32> to vector<32x128xbf16>
    %c0_6 = arith.constant 0 : index
    %c0_7 = arith.constant 0 : index
    %10 = vector.load %arg4[%c0_6, %c0_7] : memref<32x128xbf16, #tpu.memory_space<vmem>>, vector<32x128xbf16>
    tpu.vector_store %arg4[%c0_6, %c0_7], %9 {strides = array<i32>} : memref<32x128xbf16, #tpu.memory_space<vmem>>, vector<32x128xbf16>,
    return
  }
  func.func @transform_0(%arg0: i32) -> (i32, i32) {
    %c0_i32 = arith.constant 0 : i32
    %c0_i32_0 = arith.constant 0 : i32
    return %arg0, %c0_i32 : i32, i32
  }
  func.func @transform_1(%arg0: i32) -> (i32, i32) {
    %c0_i32 = arith.constant 0 : i32
    %c0_i32_0 = arith.constant 0 : i32
    %c0_i32_1 = arith.constant 0 : i32
    return %c0_i32, %c0_i32_0 : i32, i32
  }
  func.func @transform_2(%arg0: i32) -> (i32, i32) {
    %c0_i32 = arith.constant 0 : i32
    %c0_i32_0 = arith.constant 0 : i32
    %c0_i32_1 = arith.constant 0 : i32
    return %c0_i32, %c0_i32_0 : i32, i32
  }
  func.func @transform_3(%arg0: i32) -> (i32, i32) {
    %c0_i32 = arith.constant 0 : i32
    %c0_i32_0 = arith.constant 0 : i32
    return %arg0, %c0_i32 : i32, i32
  }
}

module attributes {stable_mosaic.version = 11 : i64} {
  func.func @_conv_mm_kernel(%arg0: i32, %arg1: memref<8x1152xbf16, #tpu.memory_space<vmem>>, %arg2: memref<1152x256xbf16, #tpu.memory_space<vmem>>, %arg3: memref<1x256xf32, #tpu.memory_space<vmem>>, %arg4: memref<8x256xbf16, #tpu.memory_space<vmem>>) attributes {dimension_semantics = [#tpu.dimension_semantics<parallel>], iteration_bounds = array<i64: 1>, scalar_prefetch = 0 : i64, scratch_operands = 0 : i64, tpu.core_type = #tpu.core_type<tc>, window_params = [{transform_indices = @transform_0, window_bounds = array<i64: 8, 1152>}, {pipeline_mode = #tpu.pipeline_mode<synchronous>, transform_indices = @transform_1, window_bounds = array<i64: 1152, 256>}, {pipeline_mode = #tpu.pipeline_mode<synchronous>, transform_indices = @transform_2, window_bounds = array<i64: 1, 256>}, {transform_indices = @transform_3, window_bounds = array<i64: 8, 256>}]} {
    %c0 = arith.constant 0 : index
    %c0_0 = arith.constant 0 : index
    %0 = vector.load %arg1[%c0, %c0_0] : memref<8x1152xbf16, #tpu.memory_space<vmem>>, vector<8x1152xbf16>
    %c0_1 = arith.constant 0 : index
    %c0_2 = arith.constant 0 : index
    %1 = vector.load %arg2[%c0_1, %c0_2] : memref<1152x256xbf16, #tpu.memory_space<vmem>>, vector<1152x256xbf16>
    %cst = arith.constant dense<0.000000e+00> : vector<8x256xf32>
    %2 = tpu.matmul %0, %1, %cst {dimension_numbers = #tpu.dot_dimension_numbers<[1], [0], [0], [1], [0, 0, 1, 1], [], []>} : vector<8x1152xbf16>, vector<1152x256xbf16>, vector<8x256xf32> -> vector<8x256xf32>
    %c0_3 = arith.constant 0 : index
    %c0_4 = arith.constant 0 : index
    %3 = vector.load %arg3[%c0_3, %c0_4] : memref<1x256xf32, #tpu.memory_space<vmem>>, vector<1x256xf32>
    %4 = vector.broadcast %3 : vector<1x256xf32> to vector<8x256xf32>
    %5 = arith.addf %2, %4 : vector<8x256xf32>
    %cst_5 = arith.constant 2.000000e-01 : f32
    %6 = vector.broadcast %cst_5 : f32 to vector<8x256xf32>
    %7 = arith.mulf %6, %5 : vector<8x256xf32>
    %8 = arith.maximumf %5, %7 : vector<8x256xf32>
    %9 = arith.truncf %8 : vector<8x256xf32> to vector<8x256xbf16>
    %c0_6 = arith.constant 0 : index
    %c0_7 = arith.constant 0 : index
    %10 = vector.load %arg4[%c0_6, %c0_7] : memref<8x256xbf16, #tpu.memory_space<vmem>>, vector<8x256xbf16>
    tpu.vector_store %arg4[%c0_6, %c0_7], %9 {strides = array<i32>} : memref<8x256xbf16, #tpu.memory_space<vmem>>, vector<8x256xbf16>,
    return
  }
  func.func @transform_0(%arg0: i32) -> (i32, i32) {
    %c0_i32 = arith.constant 0 : i32
    %c0_i32_0 = arith.constant 0 : i32
    return %arg0, %c0_i32 : i32, i32
  }
  func.func @transform_1(%arg0: i32) -> (i32, i32) {
    %c0_i32 = arith.constant 0 : i32
    %c0_i32_0 = arith.constant 0 : i32
    %c0_i32_1 = arith.constant 0 : i32
    return %c0_i32, %c0_i32_0 : i32, i32
  }
  func.func @transform_2(%arg0: i32) -> (i32, i32) {
    %c0_i32 = arith.constant 0 : i32
    %c0_i32_0 = arith.constant 0 : i32
    %c0_i32_1 = arith.constant 0 : i32
    return %c0_i32, %c0_i32_0 : i32, i32
  }
  func.func @transform_3(%arg0: i32) -> (i32, i32) {
    %c0_i32 = arith.constant 0 : i32
    %c0_i32_0 = arith.constant 0 : i32
    return %arg0, %c0_i32 : i32, i32
  }
}

module attributes {stable_mosaic.version = 11 : i64} {
  func.func @_conv_mm_kernel(%arg0: i32, %arg1: memref<32x36xbf16, #tpu.memory_space<vmem>>, %arg2: memref<36x64xbf16, #tpu.memory_space<vmem>>, %arg3: memref<1x64xf32, #tpu.memory_space<vmem>>, %arg4: memref<32x64xbf16, #tpu.memory_space<vmem>>) attributes {dimension_semantics = [#tpu.dimension_semantics<parallel>], iteration_bounds = array<i64: 1>, scalar_prefetch = 0 : i64, scratch_operands = 0 : i64, tpu.core_type = #tpu.core_type<tc>, window_params = [{transform_indices = @transform_0, window_bounds = array<i64: 32, 36>}, {pipeline_mode = #tpu.pipeline_mode<synchronous>, transform_indices = @transform_1, window_bounds = array<i64: 36, 64>}, {pipeline_mode = #tpu.pipeline_mode<synchronous>, transform_indices = @transform_2, window_bounds = array<i64: 1, 64>}, {transform_indices = @transform_3, window_bounds = array<i64: 32, 64>}]} {
    %c0 = arith.constant 0 : index
    %c0_0 = arith.constant 0 : index
    %0 = vector.load %arg1[%c0, %c0_0] : memref<32x36xbf16, #tpu.memory_space<vmem>>, vector<32x36xbf16>
    %c0_1 = arith.constant 0 : index
    %c0_2 = arith.constant 0 : index
    %1 = vector.load %arg2[%c0_1, %c0_2] : memref<36x64xbf16, #tpu.memory_space<vmem>>, vector<36x64xbf16>
    %cst = arith.constant dense<0.000000e+00> : vector<32x64xf32>
    %2 = tpu.matmul %0, %1, %cst {dimension_numbers = #tpu.dot_dimension_numbers<[1], [0], [0], [1], [0, 0, 1, 1], [], []>} : vector<32x36xbf16>, vector<36x64xbf16>, vector<32x64xf32> -> vector<32x64xf32>
    %c0_3 = arith.constant 0 : index
    %c0_4 = arith.constant 0 : index
    %3 = vector.load %arg3[%c0_3, %c0_4] : memref<1x64xf32, #tpu.memory_space<vmem>>, vector<1x64xf32>
    %4 = vector.broadcast %3 : vector<1x64xf32> to vector<32x64xf32>
    %5 = arith.addf %2, %4 : vector<32x64xf32>
    %cst_5 = arith.constant 2.000000e-01 : f32
    %6 = vector.broadcast %cst_5 : f32 to vector<32x64xf32>
    %7 = arith.mulf %6, %5 : vector<32x64xf32>
    %8 = arith.maximumf %5, %7 : vector<32x64xf32>
    %9 = arith.truncf %8 : vector<32x64xf32> to vector<32x64xbf16>
    %c0_6 = arith.constant 0 : index
    %c0_7 = arith.constant 0 : index
    %10 = vector.load %arg4[%c0_6, %c0_7] : memref<32x64xbf16, #tpu.memory_space<vmem>>, vector<32x64xbf16>
    tpu.vector_store %arg4[%c0_6, %c0_7], %9 {strides = array<i32>} : memref<32x64xbf16, #tpu.memory_space<vmem>>, vector<32x64xbf16>,
    return
  }
  func.func @transform_0(%arg0: i32) -> (i32, i32) {
    %c0_i32 = arith.constant 0 : i32
    %c0_i32_0 = arith.constant 0 : i32
    return %arg0, %c0_i32 : i32, i32
  }
  func.func @transform_1(%arg0: i32) -> (i32, i32) {
    %c0_i32 = arith.constant 0 : i32
    %c0_i32_0 = arith.constant 0 : i32
    %c0_i32_1 = arith.constant 0 : i32
    return %c0_i32, %c0_i32_0 : i32, i32
  }
  func.func @transform_2(%arg0: i32) -> (i32, i32) {
    %c0_i32 = arith.constant 0 : i32
    %c0_i32_0 = arith.constant 0 : i32
    %c0_i32_1 = arith.constant 0 : i32
    return %c0_i32, %c0_i32_0 : i32, i32
  }
  func.func @transform_3(%arg0: i32) -> (i32, i32) {
    %c0_i32 = arith.constant 0 : i32
    %c0_i32_0 = arith.constant 0 : i32
    return %arg0, %c0_i32 : i32, i32
  }
}

module attributes {stable_mosaic.version = 11 : i64} {
  func.func @_conv_mm_kernel(%arg0: i32, %arg1: memref<8x576xbf16, #tpu.memory_space<vmem>>, %arg2: memref<576x128xbf16, #tpu.memory_space<vmem>>, %arg3: memref<1x128xf32, #tpu.memory_space<vmem>>, %arg4: memref<8x128xbf16, #tpu.memory_space<vmem>>) attributes {dimension_semantics = [#tpu.dimension_semantics<parallel>], iteration_bounds = array<i64: 1>, scalar_prefetch = 0 : i64, scratch_operands = 0 : i64, tpu.core_type = #tpu.core_type<tc>, window_params = [{transform_indices = @transform_0, window_bounds = array<i64: 8, 576>}, {pipeline_mode = #tpu.pipeline_mode<synchronous>, transform_indices = @transform_1, window_bounds = array<i64: 576, 128>}, {pipeline_mode = #tpu.pipeline_mode<synchronous>, transform_indices = @transform_2, window_bounds = array<i64: 1, 128>}, {transform_indices = @transform_3, window_bounds = array<i64: 8, 128>}]} {
    %c0 = arith.constant 0 : index
    %c0_0 = arith.constant 0 : index
    %0 = vector.load %arg1[%c0, %c0_0] : memref<8x576xbf16, #tpu.memory_space<vmem>>, vector<8x576xbf16>
    %c0_1 = arith.constant 0 : index
    %c0_2 = arith.constant 0 : index
    %1 = vector.load %arg2[%c0_1, %c0_2] : memref<576x128xbf16, #tpu.memory_space<vmem>>, vector<576x128xbf16>
    %cst = arith.constant dense<0.000000e+00> : vector<8x128xf32>
    %2 = tpu.matmul %0, %1, %cst {dimension_numbers = #tpu.dot_dimension_numbers<[1], [0], [0], [1], [0, 0, 1, 1], [], []>} : vector<8x576xbf16>, vector<576x128xbf16>, vector<8x128xf32> -> vector<8x128xf32>
    %c0_3 = arith.constant 0 : index
    %c0_4 = arith.constant 0 : index
    %3 = vector.load %arg3[%c0_3, %c0_4] : memref<1x128xf32, #tpu.memory_space<vmem>>, vector<1x128xf32>
    %4 = vector.broadcast %3 : vector<1x128xf32> to vector<8x128xf32>
    %5 = arith.addf %2, %4 : vector<8x128xf32>
    %cst_5 = arith.constant 2.000000e-01 : f32
    %6 = vector.broadcast %cst_5 : f32 to vector<8x128xf32>
    %7 = arith.mulf %6, %5 : vector<8x128xf32>
    %8 = arith.maximumf %5, %7 : vector<8x128xf32>
    %9 = arith.truncf %8 : vector<8x128xf32> to vector<8x128xbf16>
    %c0_6 = arith.constant 0 : index
    %c0_7 = arith.constant 0 : index
    %10 = vector.load %arg4[%c0_6, %c0_7] : memref<8x128xbf16, #tpu.memory_space<vmem>>, vector<8x128xbf16>
    tpu.vector_store %arg4[%c0_6, %c0_7], %9 {strides = array<i32>} : memref<8x128xbf16, #tpu.memory_space<vmem>>, vector<8x128xbf16>,
    return
  }
  func.func @transform_0(%arg0: i32) -> (i32, i32) {
    %c0_i32 = arith.constant 0 : i32
    %c0_i32_0 = arith.constant 0 : i32
    return %arg0, %c0_i32 : i32, i32
  }
  func.func @transform_1(%arg0: i32) -> (i32, i32) {
    %c0_i32 = arith.constant 0 : i32
    %c0_i32_0 = arith.constant 0 : i32
    %c0_i32_1 = arith.constant 0 : i32
    return %c0_i32, %c0_i32_0 : i32, i32
  }
  func.func @transform_2(%arg0: i32) -> (i32, i32) {
    %c0_i32 = arith.constant 0 : i32
    %c0_i32_0 = arith.constant 0 : i32
    %c0_i32_1 = arith.constant 0 : i32
    return %c0_i32, %c0_i32_0 : i32, i32
  }
  func.func @transform_3(%arg0: i32) -> (i32, i32) {
    %c0_i32 = arith.constant 0 : i32
    %c0_i32_0 = arith.constant 0 : i32
    return %arg0, %c0_i32 : i32, i32
  }
}

</mosaic_0001>

<bundles_post_ra>
// kernel: ms_image_dis_forward.12
= control target key start
LH: loop header
LB: loop body
LE: loop exit
PB: predicated region body
PF: predicated region fallthrough
CT: control target
= control target key end

     0   :  { %s1040_s12 = smov 0   ;;  %s1210_s0 = inlined_call_operand.vmem [shape: bf16[512,36], index: 0, kind: input, shape index: {}]   ;;  %s1211_s1 = inlined_call_operand.vmem [shape: bf16[36,64], index: 1, kind: input, shape index: {}]   ;;  %s1212_s2 = inlined_call_operand.vmem [shape: f32[1,64], index: 2, kind: input, shape index: {}]   ;;  %s1213_s3 = inlined_call_operand.vmem [shape: bf16[512,64], index: 3, kind: output, shape index: {}]  }
   0x1 LB: > { %s809_s13 = sadd.s32 4294967295, %s1018_s12   ;;  %p813_p0 = scmp.ge.s32.totalorder %s1018_s12, 1  ;;  %s1018_s12 = sphi %s1040_s12, %s13_s12  }
   0x2   : > { %p138_p1 = scmp.lt.s32.totalorder %s1018_s12, 3 }
   0x4   : > { %p139_p2 = pnand %p813_p0, %p138_p1 }
   0x5   : > { %v993_v0 = vld [vmem:[%s1211_s1] sm:$0xff] (!%p139_p2)   ;;  %v994_v1 = vld [vmem:[%s1211_s1 + $0x8] sm:$0xff] (!%p139_p2)   ;;  %s814_s18 = sshll.u32 (!%p139_p2), %s809_s13, 5  ;;  %v995_v2 = vld [vmem:[%s1211_s1 + $0x10] ss:$0 sps:$4 sm:$0x33] (!%p139_p2)  }
   0x6   : > { %142 = sbr.rel (%p139_p2) target bundleno = 270 (0x10e), region = 32  ;;  %939 = vmatprep.subr.bf16.mxu0 (!%p139_p2), %v993_v0  ;;  %977 = vmatprep.subr.bf16.mxu1 (!%p139_p2), %v993_v0  ;;  %p163_p3 = scmp.lt.s32.totalorder (!%p139_p2), %s814_s18, 63  ;;  %vm363_vm0 = vcmask (!%p139_p2), 1041408   ;;  %vm314_vm1 = vcmask (!%p139_p2), 293888   ;;  %v1102_v20 = vld [vmem:[%s1212_s2] ss:$0 sm:$0xff] (!%p139_p2) }
   0x7   : > { %940 = vmatpush3.bf16.msra.mxu0 (!%p139_p2), %v993_v0  ;;  %980 = vmatpush3.bf16.msra.mxu1 (!%p139_p2), %v993_v0  ;;  %v365_v3 = vsel (!%p139_p2), %vm363_vm0, %v995_v2, 0  ;;  %vm720_vm2 = vcmask (!%p139_p2), 519168  }
   0x8   : > { %941 = vmatprep.subr.bf16.mxu0 (!%p139_p2), %v994_v1  ;;  %978 = vmatprep.subr.bf16.mxu1 (!%p139_p2), %v994_v1 }
   0xb   : > { %942 = vmatpush3.bf16.msra.mxu0 (!%p139_p2), %v994_v1  ;;  %981 = vmatpush3.bf16.msra.mxu1 (!%p139_p2), %v994_v1 }
   0xc   : > { %983 = vmatprep.subr.msk.bf16.mxu0 (!%p139_p2), %vm363_vm0, %v995_v2  ;;  %984 = vmatprep.subr.msk.bf16.mxu1 (!%p139_p2), %vm363_vm0, %v995_v2 }
   0xd   : > { %s1215_s18 = smov (!%p163_p3, %s814_s18), 63 }
   0xe   : > { %s815_s21 = sshll.u32 %s1215_s18, 2 }
   0xf   : > { %s1065_s24 = scalar_lea.vmem %s1210_s0, %s815_s21  ;;  %944 = vmatpush3.bf16.msra.mxu0 %v365_v3  ;;  %982 = vmatpush3.bf16.msra.mxu1 %v365_v3  ;;  %s1117_s29 = scalar_lea.vmem %s1213_s3, %s815_s21 }
  0x10   : > { %v996_v4 = vld [vmem:[%s1065_s24] sm:$0xff]   ;;  %v998_v6 = vld [vmem:[%s1065_s24 + $0x8] sm:$0xff]   ;;  %v1000_v8 = vld [vmem:[%s1065_s24 + $0x10] sm:$0xff]  }
  0x11   : > { %v997_v5 = vld [vmem:[%s1065_s24 + $0x40] sm:$0xff]   ;;  %945 = vmatprep.mubr.msk.bf16.mxu0 %vm314_vm1, %v996_v4  ;;  %v999_v7 = vld [vmem:[%s1065_s24 + $0x48] sm:$0xff]   ;;  %v1001_v9 = vld [vmem:[%s1065_s24 + $0x50] sm:$0xff]  }
  0x12   : > { %961 = vmatprep.mubr.msk.bf16.mxu1 %vm314_vm1, %v997_v5  ;;  %946 = vmatmul.mubr.msk.bf16.vlgmr.msra.gmra.mrb[0].mxu0 %vm314_vm1, %v998_v6  ;;  %v1002_v10 = vld [vmem:[%s1065_s24 + $0x18] sm:$0xff]   ;;  %v1004_v12 = vld [vmem:[%s1065_s24 + $0x20] sm:$0xff]   ;;  %v1006_v14 = vld [vmem:[%s1065_s24 + $0x28] sm:$0xff]  }
  0x13   : > { %962 = vmatmul.mubr.msk.bf16.vlgmr.msra.gmra.mrb[0].mxu1 %vm314_vm1, %v999_v7  ;;  %949 = vmatprep.mubr.msk.bf16.mxu0 %vm314_vm1, %v1000_v8  ;;  %v1003_v11 = vld [vmem:[%s1065_s24 + $0x58] sm:$0xff]   ;;  %v1005_v13 = vld [vmem:[%s1065_s24 + $0x60] sm:$0xff]   ;;  %v1007_v15 = vld [vmem:[%s1065_s24 + $0x68] sm:$0xff]  }
  0x14   : > { %965 = vmatprep.mubr.msk.bf16.mxu1 %vm314_vm1, %v1001_v9  ;;  %v1008_v16 = vld [vmem:[%s1065_s24 + $0x30] sm:$0xff]   ;;  %v1010_v18 = vld [vmem:[%s1065_s24 + $0x38] sm:$0xff]  }
  0x15   : > { %v1009_v17 = vld [vmem:[%s1065_s24 + $0x70] sm:$0xff]   ;;  %v1011_v19 = vld [vmem:[%s1065_s24 + $0x78] sm:$0xff]  }
  0x1a   : > { %950 = vmatmul.mubr.msk.bf16.gmra.mrb[4].mxu0 %vm314_vm1, %v1002_v10 }
  0x1b   : > { %966 = vmatmul.mubr.msk.bf16.gmra.mrb[4].mxu1 %vm314_vm1, %v1003_v11  ;;  %953 = vmatprep.mubr.msk.bf16.mxu0 %vm314_vm1, %v1004_v12 }
  0x1c   : > { %969 = vmatprep.mubr.msk.bf16.mxu1 %vm314_vm1, %v1005_v13 }
  0x22   : > { %954 = vmatmul.mubr.msk.bf16.gmra.mrb[8].mxu0 %vm314_vm1, %v1006_v14 }
  0x23   : > { %970 = vmatmul.mubr.msk.bf16.gmra.mrb[8].mxu1 %vm314_vm1, %v1007_v15  ;;  %957 = vmatprep.mubr.msk.bf16.mxu0 %vm314_vm1, %v1008_v16 }
  0x24   : > { %973 = vmatprep.mubr.msk.bf16.mxu1 %vm314_vm1, %v1009_v17 }
  0x2a   : > { %958 = vmatmul.mubr.msk.bf16.gmra.mrb[12].mxu0 %vm314_vm1, %v1010_v18 }
  0x2b   : > { %974 = vmatmul.mubr.msk.bf16.gmra.mrb[12].mxu1 %vm314_vm1, %v1011_v19 }
  0xe5   : > { %v947_v21 = vpop.f32.mrb[0].mxu0 }
  0xe6   : > { %v963_v22 = vpop.f32.mrb[0].mxu1  ;;  %v410_v23 = vadd.f32 %v947_v21, %v1102_v20  ;;  %v401_v25 = vpop.f32.mrb[1].mxu0 }
  0xe7   : > { %v474_v24 = vadd.f32 %v963_v22, %v1102_v20  ;;  %v465_v26 = vpop.f32.mrb[1].mxu1  ;;  %v402_v27 = vadd.f32 %v1102_v20, %v401_v25  ;;  %v948_v29 = vpop.f32.mrb[2].mxu0 }
  0xe8   : > { %v466_v28 = vadd.f32 %v1102_v20, %v465_v26  ;;  %v964_v30 = vpop.f32.mrb[2].mxu1  ;;  %v530_v31 = vmul.f32 0.2, %v410_v23  ;;  %v413_v33 = vadd.f32 %v948_v29, %v1102_v20  ;;  %v404_v35 = vpop.f32.mrb[3].mxu0 }
  0xe9   : > { %v546_v32 = vmul.f32 0.2, %v474_v24  ;;  %v477_v34 = vadd.f32 %v964_v30, %v1102_v20  ;;  %v468_v36 = vpop.f32.mrb[3].mxu1  ;;  %v528_v37 = vmul.f32 0.2, %v402_v27  ;;  %v405_v39 = vadd.f32 %v1102_v20, %v404_v35 }
  0xea   : > { %v544_v38 = vmul.f32 0.2, %v466_v28  ;;  %v469_v40 = vadd.f32 %v1102_v20, %v468_v36  ;;  %v562_v41 = vmax.f32 %v410_v23, %v530_v31  ;;  %v531_v43 = vmul.f32 0.2, %v413_v33 }
  0xeb   : > { %v578_v42 = vmax.f32 %v474_v24, %v546_v32  ;;  %v547_v44 = vmul.f32 0.2, %v477_v34  ;;  %v560_v45 = vmax.f32 %v402_v27, %v528_v37  ;;  %v529_v47 = vmul.f32 0.2, %v405_v39 }
  0xec   : > { %v576_v46 = vmax.f32 %v466_v28, %v544_v38  ;;  %v545_v48 = vmul.f32 0.2, %v469_v40  ;;  %v890_v49 = vpack.c.bf16 %v562_v41, %v562_v41  ;;  %v563_v51 = vmax.f32 %v413_v33, %v531_v43 }
  0xed   : > { %v906_v50 = vpack.c.bf16 %v578_v42, %v578_v42  ;;  %v579_v52 = vmax.f32 %v477_v34, %v547_v44  ;;  %v888_v53 = vpack.c.bf16 %v560_v45, %v560_v45  ;;  %v561_v55 = vmax.f32 %v405_v39, %v529_v47  ;;  %v951_v57 = vpop.f32.mrb[4].mxu0 }
  0xee   : > { %v904_v54 = vpack.c.bf16 %v576_v46, %v576_v46  ;;  %v577_v56 = vmax.f32 %v469_v40, %v545_v48  ;;  %v967_v58 = vpop.f32.mrb[4].mxu1  ;;  %723 = vst.msk [vmem:[%s1117_s29 + $0x8] sm:$0xf] %vm720_vm2, %v890_v49  ;;  %v891_v59 = vpack.c.bf16 %v563_v51, %v563_v51  ;;  %v426_v61 = vadd.f32 %v951_v57, %v1102_v20  ;;  %v417_v63 = vpop.f32.mrb[5].mxu0 }
  0xef   : > { %739 = vst.msk [vmem:[%s1117_s29 + $0x48] sm:$0xf] %vm720_vm2, %v906_v50  ;;  %v907_v60 = vpack.c.bf16 %v579_v52, %v579_v52  ;;  %v490_v62 = vadd.f32 %v967_v58, %v1102_v20  ;;  %v481_v0 = vpop.f32.mrb[5].mxu1  ;;  %721 = vst.msk [vmem:[%s1117_s29] sm:$0xf] %vm720_vm2, %v888_v53  ;;  %v889_v1 = vpack.c.bf16 %v561_v55, %v561_v55  ;;  %v952_v5 = vpop.f32.mrb[6].mxu0 }
  0xf0   : > { %737 = vst.msk [vmem:[%s1117_s29 + $0x40] sm:$0xf] %vm720_vm2, %v904_v54  ;;  %v905_v2 = vpack.c.bf16 %v577_v56, %v577_v56  ;;  %v418_v3 = vadd.f32 %v1102_v20, %v417_v63  ;;  %v482_v4 = vadd.f32 %v1102_v20, %v481_v0  ;;  %v968_v6 = vpop.f32.mrb[6].mxu1  ;;  %724 = vst.msk [vmem:[%s1117_s29 + $0xc] sm:$0xf] %vm720_vm2, %v891_v59  ;;  %v420_v11 = vpop.f32.mrb[7].mxu0 }
  0xf1   : > { %740 = vst.msk [vmem:[%s1117_s29 + $0x4c] sm:$0xf] %vm720_vm2, %v907_v60  ;;  %v534_v7 = vmul.f32 0.2, %v426_v61  ;;  %v550_v8 = vmul.f32 0.2, %v490_v62  ;;  %v429_v9 = vadd.f32 %v952_v5, %v1102_v20  ;;  %v493_v10 = vadd.f32 %v968_v6, %v1102_v20 }
  0xf2   : > { %v484_v12 = vpop.f32.mrb[7].mxu1  ;;  %722 = vst.msk [vmem:[%s1117_s29 + $0x4] sm:$0xf] %vm720_vm2, %v889_v1  ;;  %738 = vst.msk [vmem:[%s1117_s29 + $0x44] sm:$0xf] %vm720_vm2, %v905_v2  ;;  %v421_v15 = vadd.f32 %v1102_v20, %v420_v11 }
  0xf3   : > { %v532_v13 = vmul.f32 0.2, %v418_v3  ;;  %v548_v14 = vmul.f32 0.2, %v482_v4  ;;  %v485_v16 = vadd.f32 %v1102_v20, %v484_v12  ;;  %v566_v17 = vmax.f32 %v426_v61, %v534_v7 }
  0xf4   : > { %v582_v18 = vmax.f32 %v490_v62, %v550_v8  ;;  %v535_v19 = vmul.f32 0.2, %v429_v9  ;;  %v551_v21 = vmul.f32 0.2, %v493_v10  ;;  %v533_v24 = vmul.f32 0.2, %v421_v15 }
  0xf5   : > { %v564_v22 = vmax.f32 %v418_v3, %v532_v13  ;;  %v580_v23 = vmax.f32 %v482_v4, %v548_v14  ;;  %v549_v25 = vmul.f32 0.2, %v485_v16  ;;  %v894_v26 = vpack.c.bf16 %v566_v17, %v566_v17  ;;  %v955_v34 = vpop.f32.mrb[8].mxu0 }
  0xf6   : > { %v910_v27 = vpack.c.bf16 %v582_v18, %v582_v18  ;;  %v567_v28 = vmax.f32 %v429_v9, %v535_v19  ;;  %v583_v29 = vmax.f32 %v493_v10, %v551_v21  ;;  %v565_v32 = vmax.f32 %v421_v15, %v533_v24  ;;  %v971_v35 = vpop.f32.mrb[8].mxu1  ;;  %v433_v40 = vpop.f32.mrb[9].mxu0 }
  0xf7   : > { %v892_v30 = vpack.c.bf16 %v564_v22, %v564_v22  ;;  %v908_v31 = vpack.c.bf16 %v580_v23, %v580_v23  ;;  %v581_v33 = vmax.f32 %v485_v16, %v549_v25  ;;  %727 = vst.msk [vmem:[%s1117_s29 + $0x18] sm:$0xf] %vm720_vm2, %v894_v26  ;;  %v442_v38 = vadd.f32 %v955_v34, %v1102_v20  ;;  %v497_v41 = vpop.f32.mrb[9].mxu1  ;;  %v956_v46 = vpop.f32.mrb[10].mxu0 }
  0xf8   : > { %743 = vst.msk [vmem:[%s1117_s29 + $0x58] sm:$0xf] %vm720_vm2, %v910_v27  ;;  %v895_v36 = vpack.c.bf16 %v567_v28, %v567_v28  ;;  %v911_v37 = vpack.c.bf16 %v583_v29, %v583_v29  ;;  %v506_v39 = vadd.f32 %v971_v35, %v1102_v20  ;;  %v893_v42 = vpack.c.bf16 %v565_v32, %v565_v32  ;;  %v972_v47 = vpop.f32.mrb[10].mxu1  ;;  %v436_v52 = vpop.f32.mrb[11].mxu0 }
  0xf9   : > { %725 = vst.msk [vmem:[%s1117_s29 + $0x10] sm:$0xf] %vm720_vm2, %v892_v30  ;;  %741 = vst.msk [vmem:[%s1117_s29 + $0x50] sm:$0xf] %vm720_vm2, %v908_v31  ;;  %v909_v43 = vpack.c.bf16 %v581_v33, %v581_v33  ;;  %v434_v44 = vadd.f32 %v1102_v20, %v433_v40  ;;  %v498_v45 = vadd.f32 %v1102_v20, %v497_v41  ;;  %v538_v48 = vmul.f32 0.2, %v442_v38 }
  0xfa   : > { %728 = vst.msk [vmem:[%s1117_s29 + $0x1c] sm:$0xf] %vm720_vm2, %v895_v36  ;;  %744 = vst.msk [vmem:[%s1117_s29 + $0x5c] sm:$0xf] %vm720_vm2, %v911_v37  ;;  %v554_v49 = vmul.f32 0.2, %v506_v39  ;;  %v445_v50 = vadd.f32 %v956_v46, %v1102_v20  ;;  %v509_v51 = vadd.f32 %v972_v47, %v1102_v20  ;;  %v437_v56 = vadd.f32 %v1102_v20, %v436_v52 }
  0xfb   : > { %v500_v53 = vpop.f32.mrb[11].mxu1  ;;  %726 = vst.msk [vmem:[%s1117_s29 + $0x14] sm:$0xf] %vm720_vm2, %v893_v42  ;;  %742 = vst.msk [vmem:[%s1117_s29 + $0x54] sm:$0xf] %vm720_vm2, %v909_v43  ;;  %v570_v58 = vmax.f32 %v442_v38, %v538_v48 }
  0xfc   : > { %v536_v54 = vmul.f32 0.2, %v434_v44  ;;  %v552_v55 = vmul.f32 0.2, %v498_v45  ;;  %v501_v57 = vadd.f32 %v1102_v20, %v500_v53  ;;  %v586_v59 = vmax.f32 %v506_v39, %v554_v49 }
  0xfd   : > { %v539_v60 = vmul.f32 0.2, %v445_v50  ;;  %v555_v61 = vmul.f32 0.2, %v509_v51  ;;  %v537_v0 = vmul.f32 0.2, %v437_v56  ;;  %v898_v2 = vpack.c.bf16 %v570_v58, %v570_v58 }
  0xfe   : > { %v568_v62 = vmax.f32 %v434_v44, %v536_v54  ;;  %v584_v63 = vmax.f32 %v498_v45, %v552_v55  ;;  %v553_v1 = vmul.f32 0.2, %v501_v57  ;;  %v914_v3 = vpack.c.bf16 %v586_v59, %v586_v59  ;;  %v959_v10 = vpop.f32.mrb[12].mxu0  ;;  %v975_v11 = vpop.f32.mrb[12].mxu1 }
  0xff   : > { %v571_v4 = vmax.f32 %v445_v50, %v539_v60  ;;  %v587_v5 = vmax.f32 %v509_v51, %v555_v61  ;;  %v569_v8 = vmax.f32 %v437_v56, %v537_v0  ;;  %731 = vst.msk [vmem:[%s1117_s29 + $0x28] sm:$0xf] %vm720_vm2, %v898_v2  ;;  %v458_v14 = vadd.f32 %v959_v10, %v1102_v20  ;;  %v449_v16 = vpop.f32.mrb[13].mxu0  ;;  %v513_v17 = vpop.f32.mrb[13].mxu1 }
 0x100   : > { %v896_v6 = vpack.c.bf16 %v568_v62, %v568_v62  ;;  %v912_v7 = vpack.c.bf16 %v584_v63, %v584_v63  ;;  %v585_v9 = vmax.f32 %v501_v57, %v553_v1  ;;  %747 = vst.msk [vmem:[%s1117_s29 + $0x68] sm:$0xf] %vm720_vm2, %v914_v3  ;;  %v522_v15 = vadd.f32 %v975_v11, %v1102_v20  ;;  %v960_v23 = vpop.f32.mrb[14].mxu0  ;;  %v976_v24 = vpop.f32.mrb[14].mxu1 }
 0x101   : > { %v899_v12 = vpack.c.bf16 %v571_v4, %v571_v4  ;;  %v915_v13 = vpack.c.bf16 %v587_v5, %v587_v5  ;;  %v897_v18 = vpack.c.bf16 %v569_v8, %v569_v8  ;;  %v450_v21 = vadd.f32 %v1102_v20, %v449_v16  ;;  %v452_v29 = vpop.f32.mrb[15].mxu0  ;;  %v516_v30 = vpop.f32.mrb[15].mxu1 }
 0x102   : > { %729 = vst.msk [vmem:[%s1117_s29 + $0x20] sm:$0xf] %vm720_vm2, %v896_v6  ;;  %745 = vst.msk [vmem:[%s1117_s29 + $0x60] sm:$0xf] %vm720_vm2, %v912_v7  ;;  %v913_v19 = vpack.c.bf16 %v585_v9, %v585_v9  ;;  %v514_v22 = vadd.f32 %v1102_v20, %v513_v17  ;;  %v542_v25 = vmul.f32 0.2, %v458_v14  ;;  %v461_v27 = vadd.f32 %v960_v23, %v1102_v20 }
 0x103   : > { %732 = vst.msk [vmem:[%s1117_s29 + $0x2c] sm:$0xf] %vm720_vm2, %v899_v12  ;;  %748 = vst.msk [vmem:[%s1117_s29 + $0x6c] sm:$0xf] %vm720_vm2, %v915_v13  ;;  %v558_v26 = vmul.f32 0.2, %v522_v15  ;;  %v525_v28 = vadd.f32 %v976_v24, %v1102_v20  ;;  %v453_v33 = vadd.f32 %v1102_v20, %v452_v29  ;;  %v517_v34 = vadd.f32 %v1102_v20, %v516_v30 }
 0x104   : > { %730 = vst.msk [vmem:[%s1117_s29 + $0x24] sm:$0xf] %vm720_vm2, %v897_v18  ;;  %746 = vst.msk [vmem:[%s1117_s29 + $0x64] sm:$0xf] %vm720_vm2, %v913_v19  ;;  %v540_v31 = vmul.f32 0.2, %v450_v21  ;;  %v574_v35 = vmax.f32 %v458_v14, %v542_v25 }
 0x105   : > { %v556_v32 = vmul.f32 0.2, %v514_v22  ;;  %v590_v36 = vmax.f32 %v522_v15, %v558_v26  ;;  %v543_v37 = vmul.f32 0.2, %v461_v27  ;;  %v559_v38 = vmul.f32 0.2, %v525_v28 }
 0x106   : > { %v572_v39 = vmax.f32 %v450_v21, %v540_v31  ;;  %v541_v41 = vmul.f32 0.2, %v453_v33  ;;  %v557_v42 = vmul.f32 0.2, %v517_v34  ;;  %v902_v43 = vpack.c.bf16 %v574_v35, %v574_v35 }
 0x107   : > { %v588_v40 = vmax.f32 %v514_v22, %v556_v32  ;;  %v918_v44 = vpack.c.bf16 %v590_v36, %v590_v36  ;;  %v575_v45 = vmax.f32 %v461_v27, %v543_v37  ;;  %v591_v46 = vmax.f32 %v525_v28, %v559_v38 }
 0x108   : > { %v900_v20 = vpack.c.bf16 %v572_v39, %v572_v39  ;;  %v573_v48 = vmax.f32 %v453_v33, %v541_v41  ;;  %v589_v49 = vmax.f32 %v517_v34, %v557_v42  ;;  %735 = vst.msk [vmem:[%s1117_s29 + $0x38] sm:$0xf] %vm720_vm2, %v902_v43 }
 0x109   : > { %v916_v47 = vpack.c.bf16 %v588_v40, %v588_v40  ;;  %751 = vst.msk [vmem:[%s1117_s29 + $0x78] sm:$0xf] %vm720_vm2, %v918_v44  ;;  %v903_v50 = vpack.c.bf16 %v575_v45, %v575_v45  ;;  %v919_v51 = vpack.c.bf16 %v591_v46, %v591_v46 }
 0x10a   : > { %733 = vst.msk [vmem:[%s1117_s29 + $0x30] sm:$0xf] %vm720_vm2, %v900_v20  ;;  %v901_v52 = vpack.c.bf16 %v573_v48, %v573_v48  ;;  %v917_v53 = vpack.c.bf16 %v589_v49, %v589_v49 }
 0x10b   : > { %749 = vst.msk [vmem:[%s1117_s29 + $0x70] sm:$0xf] %vm720_vm2, %v916_v47  ;;  %736 = vst.msk [vmem:[%s1117_s29 + $0x3c] sm:$0xf] %vm720_vm2, %v903_v50 }
 0x10c   : > { %752 = vst.msk [vmem:[%s1117_s29 + $0x7c] sm:$0xf] %vm720_vm2, %v919_v51  ;;  %734 = vst.msk [vmem:[%s1117_s29 + $0x34] sm:$0xf] %vm720_vm2, %v901_v52 }
 0x10d   : > { %750 = vst.msk [vmem:[%s1117_s29 + $0x74] sm:$0xf] %vm720_vm2, %v917_v53 }
 0x10e PF: > { %s13_s12 = sadd.s32 1, %s1018_s12  }
 0x10f   : > { %p10_p4 = scmp.ge.s32.totalorder %s13_s12, 4  }
 0x111   :  { %12 = sbr.rel (!%p10_p4) target bundleno = 1 (0x1), region = 62 }

// kernel: ms_image_dis_forward.13
= control target key start
LH: loop header
LB: loop body
LE: loop exit
PB: predicated region body
PF: predicated region fallthrough
CT: control target
= control target key end

     0   :  { %vm558_vm0 = vcmask 523264   ;;  %s1752_s1 = inlined_call_operand.vmem [shape: bf16[576,128], index: 1, kind: input, shape index: {}]   ;;  %s1753_s0 = inlined_call_operand.vmem [shape: bf16[128,576], index: 0, kind: input, shape index: {}]   ;;  %s1754_s2 = inlined_call_operand.vmem [shape: f32[1,128], index: 2, kind: input, shape index: {}]   ;;  %s1755_s3 = inlined_call_operand.vmem [shape: bf16[128,128], index: 3, kind: output, shape index: {}]  }
   0x1   :  { %v1326_v0 = vld [vmem:[%s1752_s1 + $0x40] sm:$0xff]   ;;  %v1330_v4 = vld [vmem:[%s1752_s1 + $0x48] sm:$0xff]   ;;  %v1334_v8 = vld [vmem:[%s1752_s1 + $0x50] sm:$0xff]  }
   0x2   :  { %v1327_v1 = vld [vmem:[%s1752_s1 + $0xc0] sm:$0xff]   ;;  %1154 = vmatprep.subr.bf16.mxu0 %v1326_v0  ;;  %v1331_v5 = vld [vmem:[%s1752_s1 + $0xc8] sm:$0xff]   ;;  %v1335_v9 = vld [vmem:[%s1752_s1 + $0xd0] sm:$0xff]  }
   0x3   :  { %v1328_v2 = vld [vmem:[%s1752_s1] sm:$0xff]   ;;  %1218 = vmatprep.subr.bf16.mxu1 %v1327_v1  ;;  %v1332_v6 = vld [vmem:[%s1752_s1 + $0x8] sm:$0xff]   ;;  %v1336_v10 = vld [vmem:[%s1752_s1 + $0x10] sm:$0xff]  }
   0x4   :  { %v1329_v3 = vld [vmem:[%s1752_s1 + $0x80] sm:$0xff]   ;;  %1155 = vmatpush3.bf16.msra.mxu0 %v1328_v2  ;;  %v1333_v7 = vld [vmem:[%s1752_s1 + $0x88] sm:$0xff]   ;;  %v1337_v11 = vld [vmem:[%s1752_s1 + $0x90] sm:$0xff]  }
   0x5   :  { %1219 = vmatpush3.bf16.msra.mxu1 %v1329_v3  ;;  %1156 = vmatprep.subr.bf16.mxu0 %v1330_v4  ;;  %v1338_v12 = vld [vmem:[%s1752_s1 + $0x58] sm:$0xff]   ;;  %v1342_v16 = vld [vmem:[%s1752_s1 + $0x60] sm:$0xff]   ;;  %v1346_v20 = vld [vmem:[%s1752_s1 + $0x68] sm:$0xff]  }
   0x6   :  { %1220 = vmatprep.subr.bf16.mxu1 %v1331_v5  ;;  %v1339_v13 = vld [vmem:[%s1752_s1 + $0xd8] sm:$0xff]   ;;  %v1343_v17 = vld [vmem:[%s1752_s1 + $0xe0] sm:$0xff]   ;;  %v1347_v21 = vld [vmem:[%s1752_s1 + $0xe8] sm:$0xff]  }
   0x7   :  { %v1340_v14 = vld [vmem:[%s1752_s1 + $0x18] sm:$0xff]   ;;  %v1344_v18 = vld [vmem:[%s1752_s1 + $0x20] sm:$0xff]   ;;  %v1348_v22 = vld [vmem:[%s1752_s1 + $0x28] sm:$0xff]  }
   0x8   :  { %1157 = vmatpush3.bf16.msra.mxu0 %v1332_v6  ;;  %v1341_v15 = vld [vmem:[%s1752_s1 + $0x98] sm:$0xff]   ;;  %v1345_v19 = vld [vmem:[%s1752_s1 + $0xa0] sm:$0xff]   ;;  %v1349_v23 = vld [vmem:[%s1752_s1 + $0xa8] sm:$0xff]  }
   0x9   :  { %1221 = vmatpush3.bf16.msra.mxu1 %v1333_v7  ;;  %1158 = vmatprep.subr.bf16.mxu0 %v1334_v8  ;;  %v1350_v24 = vld [vmem:[%s1752_s1 + $0x70] sm:$0xff]   ;;  %v1354_v28 = vld [vmem:[%s1752_s1 + $0x78] sm:$0xff]   ;;  %v1363_v35 = vld [vmem:[%s1753_s0 + $0xc] ss:$20 sps:$4 sm:$0xff]  }
   0xa   :  { %1222 = vmatprep.subr.bf16.mxu1 %v1335_v9  ;;  %v1351_v25 = vld [vmem:[%s1752_s1 + $0xf0] sm:$0xff]   ;;  %v1355_v29 = vld [vmem:[%s1752_s1 + $0xf8] sm:$0xff]   ;;  %v1364_v36 = vld [vmem:[%s1752_s1 + $0x100] sm:$0xff]   ;;  %712 = vmatprep.mubr.bf16.mxu1 %v1363_v35 }
   0xb   :  { %v1352_v26 = vld [vmem:[%s1752_s1 + $0x30] sm:$0xff]   ;;  %v1356_v30 = vld [vmem:[%s1752_s1 + $0x38] sm:$0xff]   ;;  %v1365_v37 = vld [vmem:[%s1753_s0 + $0x2c] ss:$20 sps:$4 sm:$0xff]  }
   0xc   :  { %1159 = vmatpush3.bf16.msra.mxu0 %v1336_v10  ;;  %v1353_v27 = vld [vmem:[%s1752_s1 + $0xb0] sm:$0xff]   ;;  %v1357_v31 = vld [vmem:[%s1752_s1 + $0xb8] sm:$0xff]   ;;  %v1377_v42 = vld [vmem:[%s1752_s1 + $0x108] sm:$0xff]  }
   0xd   :  { %1223 = vmatpush3.bf16.msra.mxu1 %v1337_v11  ;;  %1160 = vmatprep.subr.bf16.mxu0 %v1338_v12  ;;  %v1358_v32 = vld [vmem:[%s1753_s0] ss:$20 sps:$4 sm:$0xff]   ;;  %v1360_v33 = vld [vmem:[%s1753_s0 + $0x4] ss:$20 sps:$4 sm:$0xff]   ;;  %v1361_v34 = vld [vmem:[%s1753_s0 + $0x8] ss:$20 sps:$4 sm:$0xff]  }
   0xe   :  { %1224 = vmatprep.subr.bf16.mxu1 %v1339_v13  ;;  %615 = vmatprep.mubr.bf16.mxu0 %v1360_v33  ;;  %v1367_v38 = vld [vmem:[%s1753_s0 + $0x34] ss:$20 sps:$4 sm:$0xff]   ;;  %v1370_v40 = vld [vmem:[%s1753_s0 + $0x30] ss:$20 sps:$4 sm:$0xff]   ;;  %v1376_v45 = vld [vmem:[%s1753_s0 + $0x58] ss:$20 sps:$4 sm:$0xff]  }
   0xf   :  { %v1369_v39 = vld [vmem:[%s1753_s0 + $0x28] ss:$20 sps:$4 sm:$0xff]   ;;  %v1375_v44 = vld [vmem:[%s1753_s0 + $0x50] ss:$20 sps:$4 sm:$0xff]   ;;  %v1382_v50 = vld [vmem:[%s1753_s0 + $0x78] ss:$20 sps:$4 sm:$0xff]  }
  0x10   :  { %1161 = vmatpush3.bf16.msra.mxu0 %v1340_v14  ;;  %v1371_v41 = vld [vmem:[%s1753_s0 + $0x54] ss:$20 sps:$4 sm:$0xff]   ;;  %v1373_v43 = vld [vmem:[%s1753_s0 + $0x5c] ss:$20 sps:$4 sm:$0xff]   ;;  %v1380_v48 = vld [vmem:[%s1753_s0 + $0x84] ss:$20 sps:$4 sm:$0xff]  }
  0x11   :  { %1225 = vmatpush3.bf16.msra.mxu1 %v1341_v15  ;;  %1162 = vmatprep.subr.bf16.mxu0 %v1342_v16  ;;  %v1390_v46 = vld [vmem:[%s1752_s1 + $0x110] sm:$0xff]   ;;  %v1403_v49 = vld [vmem:[%s1752_s1 + $0x118] sm:$0xff]   ;;  %v1386_v53 = vld [vmem:[%s1753_s0 + $0xac] ss:$20 sps:$4 sm:$0xff]  }
  0x12   :  { %1226 = vmatprep.subr.bf16.mxu1 %v1343_v17  ;;  %v1378_v47 = vld [vmem:[%s1753_s0 + $0x7c] ss:$20 sps:$4 sm:$0xff]   ;;  %v1383_v51 = vld [vmem:[%s1753_s0 + $0x80] ss:$20 sps:$4 sm:$0xff]   ;;  %v1384_v52 = vld [vmem:[%s1753_s0 + $0xa4] ss:$20 sps:$4 sm:$0xff]  }
  0x13   :  { %v1388_v54 = vld [vmem:[%s1753_s0 + $0xa0] ss:$20 sps:$4 sm:$0xff]   ;;  %v1389_v55 = vld [vmem:[%s1753_s0 + $0xa8] ss:$20 sps:$4 sm:$0xff]   ;;  %v1396_v59 = vld [vmem:[%s1753_s0 + $0xd0] ss:$20 sps:$4 sm:$0xff]  }
  0x14   :  { %1163 = vmatpush3.bf16.msra.mxu0 %v1344_v18  ;;  %v1391_v56 = vld [vmem:[%s1753_s0 + $0xcc] ss:$20 sps:$4 sm:$0xff]   ;;  %v1393_v57 = vld [vmem:[%s1753_s0 + $0xd4] ss:$20 sps:$4 sm:$0xff]   ;;  %v1399_v61 = vld [vmem:[%s1753_s0 + $0xfc] ss:$20 sps:$4 sm:$0xff]  }
  0x15   :  { %1227 = vmatpush3.bf16.msra.mxu1 %v1345_v19  ;;  %1164 = vmatprep.subr.bf16.mxu0 %v1346_v20  ;;  %v1395_v58 = vld [vmem:[%s1753_s0 + $0xc8] ss:$20 sps:$4 sm:$0xff]   ;;  %v1401_v62 = vld [vmem:[%s1753_s0 + $0xf0] ss:$20 sps:$4 sm:$0xff]   ;;  %v1402_v63 = vld [vmem:[%s1753_s0 + $0xf8] ss:$20 sps:$4 sm:$0xff]  }
  0x16   :  { %1228 = vmatprep.subr.bf16.mxu1 %v1347_v21  ;;  %v1397_v60 = vld [vmem:[%s1753_s0 + $0xf4] ss:$20 sps:$4 sm:$0xff]   ;;  %v1404_v0 = vld [vmem:[%s1753_s0 + $0x11c] ss:$20 sps:$4 sm:$0xff]   ;;  %v1406_v1 = vld [vmem:[%s1753_s0 + $0x124] ss:$20 sps:$4 sm:$0xff]  }
  0x17   :  { %v1408_v2 = vld [vmem:[%s1753_s0 + $0x118] ss:$20 sps:$4 sm:$0xff]   ;;  %v1409_v3 = vld [vmem:[%s1753_s0 + $0x120] ss:$20 sps:$4 sm:$0xff]   ;;  %v1410_v4 = vld [vmem:[%s1753_s0 + $0x10] ss:$20 sps:$4 sm:$0xff]  }
  0x18   :  { %1165 = vmatpush3.bf16.msra.mxu0 %v1348_v22  ;;  %v1411_v5 = vld [vmem:[%s1753_s0 + $0xb0] ss:$20 sps:$4 sm:$0xff]   ;;  %v1412_v6 = vld [vmem:[%s1753_s0 + $0x38] ss:$20 sps:$4 sm:$0xff]   ;;  %v1414_v8 = vld [vmem:[%s1753_s0 + $0x60] ss:$20 sps:$4 sm:$0xff]  }
  0x19   :  { %1229 = vmatpush3.bf16.msra.mxu1 %v1349_v23  ;;  %1166 = vmatprep.subr.bf16.mxu0 %v1350_v24  ;;  %v1413_v7 = vld [vmem:[%s1753_s0 + $0xd8] ss:$20 sps:$4 sm:$0xff]   ;;  %v1415_v9 = vld [vmem:[%s1753_s0 + $0x100] ss:$20 sps:$4 sm:$0xff]   ;;  %v1416_v10 = vld [vmem:[%s1753_s0 + $0x88] ss:$20 sps:$4 sm:$0xff]  }
  0x1a   :  { %1230 = vmatprep.subr.bf16.mxu1 %v1351_v25  ;;  %v1417_v11 = vld [vmem:[%s1753_s0 + $0x128] ss:$20 sps:$4 sm:$0xff]   ;;  %v1677_v14 = vld [vmem:[%s1754_s2] ss:$0 sm:$0xff] }
  0x1c   :  { %1167 = vmatpush3.bf16.msra.mxu0 %v1352_v26 }
  0x1d   :  { %1231 = vmatpush3.bf16.msra.mxu1 %v1353_v27  ;;  %1168 = vmatprep.subr.bf16.mxu0 %v1354_v28 }
  0x1e   :  { %1232 = vmatprep.subr.bf16.mxu1 %v1355_v29 }
  0x20   :  { %1169 = vmatpush3.bf16.msra.mxu0 %v1356_v30 }
  0x21   :  { %1233 = vmatpush3.bf16.msra.mxu1 %v1357_v31  ;;  %1294 = vmatprep.subr.bf16.mxu0 %v1364_v36 }
  0x22   :  { %1318 = vmatprep.subr.bf16.mxu1 %v1364_v36 }
  0x23   :  { %616 = vmatmul.mubr.bf16.vlgmr.msra.gmra.mrb[0].mxu0 %v1358_v32 }
  0x24   :  { %713 = vmatmul.mubr.bf16.vlgmr.msra.gmra.mrb[0].mxu1 %v1361_v34  ;;  %1295 = vmatpush3.bf16.msra.mxu0 %v1364_v36 }
  0x25   :  { %1322 = vmatpush3.bf16.msra.mxu1 %v1364_v36  ;;  %623 = vmatprep.mubr.bf16.mxu0 %v1365_v37 }
  0x26   :  { %720 = vmatprep.mubr.bf16.mxu1 %v1367_v38  ;;  %1296 = vmatprep.subr.bf16.mxu0 %v1377_v42 }
  0x27   :  { %1319 = vmatprep.subr.bf16.mxu1 %v1377_v42 }
  0x28   :  { %1297 = vmatpush3.bf16.msra.mxu0 %v1377_v42 }
  0x29   :  { %1323 = vmatpush3.bf16.msra.mxu1 %v1377_v42  ;;  %1298 = vmatprep.subr.bf16.mxu0 %v1390_v46 }
  0x2a   :  { %1320 = vmatprep.subr.bf16.mxu1 %v1390_v46 }
  0x2b   :  { %624 = vmatmul.mubr.bf16.gmra.mrb[4].mxu0 %v1369_v39 }
  0x2c   :  { %721 = vmatmul.mubr.bf16.gmra.mrb[4].mxu1 %v1370_v40  ;;  %631 = vmatprep.mubr.bf16.mxu0 %v1371_v41 }
  0x2d   :  { %728 = vmatprep.mubr.bf16.mxu1 %v1373_v43  ;;  %1299 = vmatpush3.bf16.msra.mxu0 %v1390_v46 }
  0x2e   :  { %1324 = vmatpush3.bf16.msra.mxu1 %v1390_v46  ;;  %1300 = vmatprep.subr.bf16.mxu0 %v1403_v49 }
  0x2f   :  { %1321 = vmatprep.subr.bf16.mxu1 %v1403_v49 }
  0x31   :  { %1301 = vmatpush3.bf16.msra.mxu0 %v1403_v49 }
  0x32   :  { %1325 = vmatpush3.bf16.msra.mxu1 %v1403_v49 }
  0x33   :  { %632 = vmatmul.mubr.bf16.gmra.mrb[8].mxu0 %v1375_v44 }
  0x34   :  { %729 = vmatmul.mubr.bf16.gmra.mrb[8].mxu1 %v1376_v45  ;;  %639 = vmatprep.mubr.bf16.mxu0 %v1378_v47 }
  0x35   :  { %736 = vmatprep.mubr.bf16.mxu1 %v1380_v48 }
  0x3b   :  { %640 = vmatmul.mubr.bf16.gmra.mrb[12].mxu0 %v1382_v50 }
  0x3c   :  { %737 = vmatmul.mubr.bf16.gmra.mrb[12].mxu1 %v1383_v51  ;;  %647 = vmatprep.mubr.bf16.mxu0 %v1384_v52 }
  0x3d   :  { %744 = vmatprep.mubr.bf16.mxu1 %v1386_v53 }
  0x43   :  { %648 = vmatmul.mubr.bf16.gmra.mrb[16].mxu0 %v1388_v54 }
  0x44   :  { %745 = vmatmul.mubr.bf16.gmra.mrb[16].mxu1 %v1389_v55  ;;  %655 = vmatprep.mubr.bf16.mxu0 %v1391_v56 }
  0x45   :  { %752 = vmatprep.mubr.bf16.mxu1 %v1393_v57 }
  0x4b   :  { %656 = vmatmul.mubr.bf16.gmra.mrb[20].mxu0 %v1395_v58 }
  0x4c   :  { %753 = vmatmul.mubr.bf16.gmra.mrb[20].mxu1 %v1396_v59  ;;  %663 = vmatprep.mubr.bf16.mxu0 %v1397_v60 }
  0x4d   :  { %760 = vmatprep.mubr.bf16.mxu1 %v1399_v61 }
  0x53   :  { %664 = vmatmul.mubr.bf16.gmra.mrb[24].mxu0 %v1401_v62 }
  0x54   :  { %761 = vmatmul.mubr.bf16.gmra.mrb[24].mxu1 %v1402_v63  ;;  %671 = vmatprep.mubr.bf16.mxu0 %v1404_v0 }
  0x55   :  { %768 = vmatprep.mubr.bf16.mxu1 %v1406_v1 }
  0x5b   :  { %672 = vmatmul.mubr.bf16.gmra.mrb[28].mxu0 %v1408_v2 }
  0x5c   :  { %769 = vmatmul.mubr.bf16.gmra.mrb[28].mxu1 %v1409_v3  ;;  %1302 = vmatprep.mubr.msk.bf16.mxu0 %vm558_vm0, %v1410_v4 }
  0x5d   :  { %1310 = vmatprep.mubr.msk.bf16.mxu1 %vm558_vm0, %v1411_v5 }
  0x63   :  { %1303 = vmatmul.mubr.msk.bf16.vlgmr.msra.gmra.mrb[32].mxu0 %vm558_vm0, %v1412_v6 }
  0x64   :  { %1311 = vmatmul.mubr.msk.bf16.vlgmr.msra.gmra.mrb[32].mxu1 %vm558_vm0, %v1413_v7  ;;  %1306 = vmatprep.mubr.msk.bf16.mxu0 %vm558_vm0, %v1414_v8 }
  0x65   :  { %1314 = vmatprep.mubr.msk.bf16.mxu1 %vm558_vm0, %v1415_v9 }
  0x6b   :  { %1307 = vmatmul.mubr.msk.bf16.gmra.mrb[36].mxu0 %vm558_vm0, %v1416_v10 }
  0x6c   :  { %1315 = vmatmul.mubr.msk.bf16.gmra.mrb[36].mxu1 %vm558_vm0, %v1417_v11 }
  0xf6   :  { %v1170_v12 = vpop.f32.mrb[0].mxu0 }
  0xf7   :  { %v1234_v13 = vpop.f32.mrb[0].mxu1  ;;  %v1171_v15 = vpop.f32.mrb[1].mxu0 }
  0xf8   :  { %v1172_v16 = vadd.f32 %v1171_v15, %v1170_v12  ;;  %v1235_v17 = vpop.f32.mrb[1].mxu1  ;;  %v1173_v18 = vpop.f32.mrb[2].mxu0 }
  0xf9   :  { %v1236_v19 = vadd.f32 %v1235_v17, %v1234_v13  ;;  %v1237_v20 = vpop.f32.mrb[2].mxu1  ;;  %v1174_v21 = vpop.f32.mrb[3].mxu0 }
  0xfa   :  { %v618_v22 = vadd.f32 %v1172_v16, %v1677_v14  ;;  %v1175_v23 = vadd.f32 %v1174_v21, %v1173_v18  ;;  %v1238_v24 = vpop.f32.mrb[3].mxu1 }
  0xfb   :  { %v1239_v25 = vadd.f32 %v1238_v24, %v1237_v20 }
  0xfc   :  { %v621_v26 = vadd.f32 %v1175_v23, %v1677_v14  ;;  %v1681_v27 = vadd.f32 %v1236_v19, %v618_v22 }
  0xfe   :  { %v1176_v28 = vpop.f32.mrb[4].mxu0  ;;  %v1683_v29 = vadd.f32 %v1239_v25, %v621_v26 }
  0xff   :  { %v1240_v30 = vpop.f32.mrb[4].mxu1  ;;  %v1177_v31 = vpop.f32.mrb[5].mxu0 }
 0x100   :  { %v1178_v32 = vadd.f32 %v1177_v31, %v1176_v28  ;;  %v1241_v33 = vpop.f32.mrb[5].mxu1  ;;  %v1179_v34 = vpop.f32.mrb[6].mxu0 }
 0x101   :  { %v1242_v35 = vadd.f32 %v1241_v33, %v1240_v30  ;;  %v1243_v36 = vpop.f32.mrb[6].mxu1  ;;  %v1180_v37 = vpop.f32.mrb[7].mxu0 }
 0x102   :  { %v626_v38 = vadd.f32 %v1178_v32, %v1677_v14  ;;  %v1181_v39 = vadd.f32 %v1180_v37, %v1179_v34  ;;  %v1244_v40 = vpop.f32.mrb[7].mxu1 }
 0x103   :  { %v1245_v41 = vadd.f32 %v1244_v40, %v1243_v36 }
 0x104   :  { %v629_v42 = vadd.f32 %v1181_v39, %v1677_v14  ;;  %v1687_v43 = vadd.f32 %v1242_v35, %v626_v38 }
 0x106   :  { %v1182_v44 = vpop.f32.mrb[8].mxu0  ;;  %v1689_v45 = vadd.f32 %v1245_v41, %v629_v42 }
 0x107   :  { %v1246_v46 = vpop.f32.mrb[8].mxu1  ;;  %v1183_v47 = vpop.f32.mrb[9].mxu0 }
 0x108   :  { %v1184_v48 = vadd.f32 %v1183_v47, %v1182_v44  ;;  %v1247_v49 = vpop.f32.mrb[9].mxu1  ;;  %v1185_v50 = vpop.f32.mrb[10].mxu0 }
 0x109   :  { %v1248_v51 = vadd.f32 %v1247_v49, %v1246_v46  ;;  %v1249_v52 = vpop.f32.mrb[10].mxu1  ;;  %v1186_v53 = vpop.f32.mrb[11].mxu0 }
 0x10a   :  { %v634_v54 = vadd.f32 %v1184_v48, %v1677_v14  ;;  %v1187_v55 = vadd.f32 %v1186_v53, %v1185_v50  ;;  %v1250_v56 = vpop.f32.mrb[11].mxu1 }
 0x10b   :  { %v1251_v57 = vadd.f32 %v1250_v56, %v1249_v52 }
 0x10c   :  { %v637_v58 = vadd.f32 %v1187_v55, %v1677_v14  ;;  %v1693_v59 = vadd.f32 %v1248_v51, %v634_v54 }
 0x10e   :  { %v1188_v60 = vpop.f32.mrb[12].mxu0  ;;  %v1695_v61 = vadd.f32 %v1251_v57, %v637_v58 }
 0x10f   :  { %v1252_v62 = vpop.f32.mrb[12].mxu1  ;;  %v1189_v63 = vpop.f32.mrb[13].mxu0 }
 0x110   :  { %v1190_v0 = vadd.f32 %v1189_v63, %v1188_v60  ;;  %v1253_v1 = vpop.f32.mrb[13].mxu1  ;;  %v1191_v2 = vpop.f32.mrb[14].mxu0 }
 0x111   :  { %v1254_v3 = vadd.f32 %v1253_v1, %v1252_v62  ;;  %v1255_v4 = vpop.f32.mrb[14].mxu1  ;;  %v1192_v5 = vpop.f32.mrb[15].mxu0 }
 0x112   :  { %v642_v6 = vadd.f32 %v1190_v0, %v1677_v14  ;;  %v1193_v7 = vadd.f32 %v1192_v5, %v1191_v2  ;;  %v1256_v8 = vpop.f32.mrb[15].mxu1 }
 0x113   :  { %v1257_v9 = vadd.f32 %v1256_v8, %v1255_v4 }
 0x114   :  { %v645_v10 = vadd.f32 %v1193_v7, %v1677_v14  ;;  %v1699_v11 = vadd.f32 %v1254_v3, %v642_v6 }
 0x116   :  { %v1194_v12 = vpop.f32.mrb[16].mxu0  ;;  %v1701_v13 = vadd.f32 %v1257_v9, %v645_v10 }
 0x117   :  { %v1258_v15 = vpop.f32.mrb[16].mxu1  ;;  %v1195_v16 = vpop.f32.mrb[17].mxu0 }
 0x118   :  { %v1196_v17 = vadd.f32 %v1195_v16, %v1194_v12  ;;  %v1259_v18 = vpop.f32.mrb[17].mxu1  ;;  %v1197_v19 = vpop.f32.mrb[18].mxu0 }
 0x119   :  { %v1260_v20 = vadd.f32 %v1259_v18, %v1258_v15  ;;  %v1261_v21 = vpop.f32.mrb[18].mxu1  ;;  %v1198_v22 = vpop.f32.mrb[19].mxu0 }
 0x11a   :  { %v650_v23 = vadd.f32 %v1196_v17, %v1677_v14  ;;  %v1199_v24 = vadd.f32 %v1198_v22, %v1197_v19  ;;  %v1262_v25 = vpop.f32.mrb[19].mxu1 }
 0x11b   :  { %v1263_v26 = vadd.f32 %v1262_v25, %v1261_v21 }
 0x11c   :  { %v653_v28 = vadd.f32 %v1199_v24, %v1677_v14  ;;  %v747_v30 = vadd.f32 %v1260_v20, %v650_v23 }
 0x11e   :  { %v1200_v31 = vpop.f32.mrb[20].mxu0  ;;  %v1705_v32 = vadd.f32 %v1263_v26, %v653_v28 }
 0x11f   :  { %v1264_v33 = vpop.f32.mrb[20].mxu1  ;;  %v1201_v34 = vpop.f32.mrb[21].mxu0 }
 0x120   :  { %v1202_v35 = vadd.f32 %v1201_v34, %v1200_v31  ;;  %v1265_v36 = vpop.f32.mrb[21].mxu1  ;;  %v1203_v37 = vpop.f32.mrb[22].mxu0 }
 0x121   :  { %v1266_v38 = vadd.f32 %v1265_v36, %v1264_v33  ;;  %v1267_v39 = vpop.f32.mrb[22].mxu1  ;;  %v1204_v40 = vpop.f32.mrb[23].mxu0 }
 0x122   :  { %v658_v41 = vadd.f32 %v1202_v35, %v1677_v14  ;;  %v1205_v42 = vadd.f32 %v1204_v40, %v1203_v37  ;;  %v1268_v44 = vpop.f32.mrb[23].mxu1 }
 0x123   :  { %v1269_v46 = vadd.f32 %v1268_v44, %v1267_v39 }
 0x124   :  { %v661_v47 = vadd.f32 %v1205_v42, %v1677_v14  ;;  %v755_v48 = vadd.f32 %v1266_v38, %v658_v41 }
 0x126   :  { %v1206_v49 = vpop.f32.mrb[24].mxu0  ;;  %v758_v50 = vadd.f32 %v1269_v46, %v661_v47 }
 0x127   :  { %v1270_v51 = vpop.f32.mrb[24].mxu1  ;;  %v1207_v52 = vpop.f32.mrb[25].mxu0 }
 0x128   :  { %v1208_v53 = vadd.f32 %v1207_v52, %v1206_v49  ;;  %v1271_v54 = vpop.f32.mrb[25].mxu1  ;;  %v1209_v55 = vpop.f32.mrb[26].mxu0 }
 0x129   :  { %v1272_v56 = vadd.f32 %v1271_v54, %v1270_v51  ;;  %v1273_v57 = vpop.f32.mrb[26].mxu1  ;;  %v1210_v58 = vpop.f32.mrb[27].mxu0 }
 0x12a   :  { %v666_v60 = vadd.f32 %v1208_v53, %v1677_v14  ;;  %v1211_v62 = vadd.f32 %v1210_v58, %v1209_v55  ;;  %v1274_v63 = vpop.f32.mrb[27].mxu1 }
 0x12b   :  { %v1275_v0 = vadd.f32 %v1274_v63, %v1273_v57 }
 0x12c   :  { %v669_v1 = vadd.f32 %v1211_v62, %v1677_v14  ;;  %v1711_v2 = vadd.f32 %v1272_v56, %v666_v60 }
 0x12e   :  { %v1212_v3 = vpop.f32.mrb[28].mxu0  ;;  %v1713_v4 = vadd.f32 %v1275_v0, %v669_v1 }
 0x12f   :  { %v1276_v5 = vpop.f32.mrb[28].mxu1  ;;  %v1213_v6 = vpop.f32.mrb[29].mxu0 }
 0x130   :  { %v1214_v7 = vadd.f32 %v1213_v6, %v1212_v3  ;;  %v1277_v8 = vpop.f32.mrb[29].mxu1  ;;  %v1215_v9 = vpop.f32.mrb[30].mxu0 }
 0x131   :  { %v1278_v10 = vadd.f32 %v1277_v8, %v1276_v5  ;;  %v1279_v12 = vpop.f32.mrb[30].mxu1  ;;  %v1216_v15 = vpop.f32.mrb[31].mxu0 }
 0x132   :  { %v674_v16 = vadd.f32 %v1214_v7, %v1677_v14  ;;  %v1217_v17 = vadd.f32 %v1216_v15, %v1215_v9  ;;  %v1280_v18 = vpop.f32.mrb[31].mxu1 }
 0x133   :  { %v1281_v19 = vadd.f32 %v1280_v18, %v1279_v12 }
 0x134   :  { %v677_v20 = vadd.f32 %v1217_v17, %v1677_v14  ;;  %v771_v21 = vadd.f32 %v1278_v10, %v674_v16 }
 0x136   :  { %v1304_v22 = vpop.f32.mrb[32].mxu0  ;;  %v774_v23 = vadd.f32 %v1281_v19, %v677_v20 }
 0x137   :  { %v820_v24 = vadd.f32 %v1304_v22, %v1687_v43  ;;  %v1312_v25 = vpop.f32.mrb[32].mxu1  ;;  %v811_v26 = vpop.f32.mrb[33].mxu0 }
 0x138   :  { %v852_v28 = vadd.f32 %v1312_v25, %v755_v48  ;;  %v812_v31 = vadd.f32 %v811_v26, %v1681_v27  ;;  %v843_v33 = vpop.f32.mrb[33].mxu1  ;;  %v1305_v34 = vpop.f32.mrb[34].mxu0 }
 0x139   :  { %v876_v35 = vmul.f32 0.2, %v820_v24  ;;  %v844_v36 = vadd.f32 %v843_v33, %v747_v30  ;;  %v823_v37 = vadd.f32 %v1305_v34, %v1689_v45  ;;  %v1313_v38 = vpop.f32.mrb[34].mxu1  ;;  %v814_v39 = vpop.f32.mrb[35].mxu0 }
 0x13a   :  { %v884_v40 = vmul.f32 0.2, %v852_v28  ;;  %v874_v14 = vmul.f32 0.2, %v812_v31  ;;  %v855_v41 = vadd.f32 %v1313_v38, %v758_v50  ;;  %v815_v42 = vadd.f32 %v814_v39, %v1683_v29  ;;  %v846_v44 = vpop.f32.mrb[35].mxu1 }
 0x13b   :  { %v882_v43 = vmul.f32 0.2, %v844_v36  ;;  %v877_v46 = vmul.f32 0.2, %v823_v37  ;;  %v847_v47 = vadd.f32 %v846_v44, %v1705_v32  ;;  %v892_v49 = vmax.f32 %v820_v24, %v876_v35 }
 0x13c   :  { %v885_v48 = vmul.f32 0.2, %v855_v41  ;;  %v875_v27 = vmul.f32 0.2, %v815_v42  ;;  %v900_v30 = vmax.f32 %v852_v28, %v884_v40  ;;  %v890_v53 = vmax.f32 %v812_v31, %v874_v14 }
 0x13d   :  { %v893_v51 = vmax.f32 %v823_v37, %v877_v46  ;;  %v883_v52 = vmul.f32 0.2, %v847_v47  ;;  %v898_v56 = vmax.f32 %v844_v36, %v882_v43 }
 0x13e   :  { %v901_v45 = vmax.f32 %v855_v41, %v885_v48  ;;  %v891_v54 = vmax.f32 %v815_v42, %v875_v27  ;;  %v1308_v55 = vpop.f32.mrb[36].mxu0 }
 0x13f   :  { %v1115_v57 = vpack.c.bf16 %v893_v51, %v892_v49  ;;  %v899_v50 = vmax.f32 %v847_v47, %v883_v52  ;;  %v836_v29 = vadd.f32 %v1308_v55, %v1699_v11  ;;  %v1316_v58 = vpop.f32.mrb[36].mxu1  ;;  %v827_v60 = vpop.f32.mrb[37].mxu0 }
 0x140   :  { %v1135_v62 = vpack.c.bf16 %v901_v45, %v900_v30  ;;  %v1110_v63 = vpack.c.bf16 %v891_v54, %v890_v53  ;;  %v868_v32 = vadd.f32 %v1316_v58, %v771_v21  ;;  %v828_v0 = vadd.f32 %v827_v60, %v1693_v59  ;;  %v859_v1 = vpop.f32.mrb[37].mxu1  ;;  %v1309_v3 = vpop.f32.mrb[38].mxu0 }
 0x141   :  { %1147 = vst [vmem:[%s1755_s3 + $0x8] sm:$0xff] %v1115_v57   ;;  %v1130_v5 = vpack.c.bf16 %v899_v50, %v898_v56  ;;  %v880_v6 = vmul.f32 0.2, %v836_v29  ;;  %v860_v7 = vadd.f32 %v859_v1, %v1711_v2  ;;  %v839_v8 = vadd.f32 %v1309_v3, %v1701_v13  ;;  %v1317_v11 = vpop.f32.mrb[38].mxu1  ;;  %v830_v9 = vpop.f32.mrb[39].mxu0 }
 0x142   :  { %1151 = vst [vmem:[%s1755_s3 + $0x28] sm:$0xff] %v1135_v62   ;;  %1111 = vst [vmem:[%s1755_s3] sm:$0xff] %v1110_v63   ;;  %v888_v59 = vmul.f32 0.2, %v868_v32  ;;  %v878_v10 = vmul.f32 0.2, %v828_v0  ;;  %v871_v12 = vadd.f32 %v1317_v11, %v774_v23  ;;  %v831_v15 = vadd.f32 %v830_v9, %v1695_v61  ;;  %v862_v16 = vpop.f32.mrb[39].mxu1 }
 0x143   :  { %1150 = vst [vmem:[%s1755_s3 + $0x20] sm:$0xff] %v1130_v5   ;;  %v886_v13 = vmul.f32 0.2, %v860_v7  ;;  %v881_v2 = vmul.f32 0.2, %v839_v8  ;;  %v863_v17 = vadd.f32 %v862_v16, %v1713_v4  ;;  %v896_v20 = vmax.f32 %v836_v29, %v880_v6 }
 0x144   :  { %v889_v18 = vmul.f32 0.2, %v871_v12  ;;  %v879_v19 = vmul.f32 0.2, %v831_v15  ;;  %v904_v24 = vmax.f32 %v868_v32, %v888_v59  ;;  %v894_v25 = vmax.f32 %v828_v0, %v878_v10 }
 0x145   :  { %v897_v21 = vmax.f32 %v839_v8, %v881_v2  ;;  %v887_v22 = vmul.f32 0.2, %v863_v17  ;;  %v902_v28 = vmax.f32 %v860_v7, %v886_v13 }
 0x146   :  { %v905_v26 = vmax.f32 %v871_v12, %v889_v18  ;;  %v895_v23 = vmax.f32 %v831_v15, %v879_v19 }
 0x147   :  { %v1125_v61 = vpack.c.bf16 %v897_v21, %v896_v20  ;;  %v903_v31 = vmax.f32 %v863_v17, %v887_v22 }
 0x148   :  { %v1145_v33 = vpack.c.bf16 %v905_v26, %v904_v24  ;;  %v1120_v34 = vpack.c.bf16 %v895_v23, %v894_v25 }
 0x149   :  { %1149 = vst [vmem:[%s1755_s3 + $0x18] sm:$0xff] %v1125_v61   ;;  %v1140_v35 = vpack.c.bf16 %v903_v31, %v902_v28 }
 0x14a   :  { %1153 = vst [vmem:[%s1755_s3 + $0x38] sm:$0xff] %v1145_v33   ;;  %1148 = vst [vmem:[%s1755_s3 + $0x10] sm:$0xff] %v1120_v34  }
 0x14b   :  { %1152 = vst [vmem:[%s1755_s3 + $0x30] sm:$0xff] %v1140_v35  }

// kernel: ms_image_dis_forward.14
= control target key start
LH: loop header
LB: loop body
LE: loop exit
PB: predicated region body
PF: predicated region fallthrough
CT: control target
= control target key end

     0   :  { %s2307_s1 = inlined_call_operand.vmem [shape: bf16[1152,256], index: 1, kind: input, shape index: {}]   ;;  %s2308_s0 = inlined_call_operand.vmem [shape: bf16[32,1152], index: 0, kind: input, shape index: {}]   ;;  %s2309_s2 = inlined_call_operand.vmem [shape: f32[1,256], index: 2, kind: input, shape index: {}]   ;;  %s2310_s3 = inlined_call_operand.vmem [shape: bf16[32,256], index: 3, kind: output, shape index: {}]  }
   0x1   :  { %v1543_v0 = vld [vmem:[%s2307_s1 + $0x4] ss:$8 sps:$4 sm:$0xff]   ;;  %v1547_v2 = vld [vmem:[%s2307_s1] ss:$8 sps:$4 sm:$0xff]   ;;  %v1549_v4 = vld [vmem:[%s2307_s1 + $0x14] ss:$8 sps:$4 sm:$0xff]  }
   0x2   :  { %v1545_v1 = vld [vmem:[%s2307_s1 + $0x204] ss:$8 sps:$4 sm:$0xff]   ;;  %1003 = vmatprep.subr.bf16.mxu1 %v1543_v0  ;;  %v1548_v3 = vld [vmem:[%s2307_s1 + $0x200] ss:$8 sps:$4 sm:$0xff]   ;;  %v1551_v5 = vld [vmem:[%s2307_s1 + $0x214] ss:$8 sps:$4 sm:$0xff]  }
   0x3   :  { %1109 = vmatprep.subr.bf16.mxu0 %v1545_v1  ;;  %1004 = vmatpush1.bf16.msra.mxu1 %v1547_v2  ;;  %v1553_v6 = vld [vmem:[%s2307_s1 + $0x10] ss:$8 sps:$4 sm:$0xff]   ;;  %v1555_v8 = vld [vmem:[%s2307_s1 + $0x24] ss:$8 sps:$4 sm:$0xff]   ;;  %v1559_v10 = vld [vmem:[%s2307_s1 + $0x20] ss:$8 sps:$4 sm:$0xff]  }
   0x4   :  { %1110 = vmatpush1.bf16.msra.mxu0 %v1548_v3  ;;  %1005 = vmatprep.subr.bf16.mxu1 %v1549_v4  ;;  %v1554_v7 = vld [vmem:[%s2307_s1 + $0x210] ss:$8 sps:$4 sm:$0xff]   ;;  %v1557_v9 = vld [vmem:[%s2307_s1 + $0x224] ss:$8 sps:$4 sm:$0xff]   ;;  %v1560_v11 = vld [vmem:[%s2307_s1 + $0x220] ss:$8 sps:$4 sm:$0xff]  }
   0x5   :  { %1111 = vmatprep.subr.bf16.mxu0 %v1551_v5  ;;  %v1561_v12 = vld [vmem:[%s2307_s1 + $0x34] ss:$8 sps:$4 sm:$0xff]   ;;  %v1565_v14 = vld [vmem:[%s2307_s1 + $0x30] ss:$8 sps:$4 sm:$0xff]   ;;  %v1567_v16 = vld [vmem:[%s2307_s1 + $0x44] ss:$8 sps:$4 sm:$0xff]  }
   0x6   :  { %v1563_v13 = vld [vmem:[%s2307_s1 + $0x234] ss:$8 sps:$4 sm:$0xff]   ;;  %v1566_v15 = vld [vmem:[%s2307_s1 + $0x230] ss:$8 sps:$4 sm:$0xff]   ;;  %v1569_v17 = vld [vmem:[%s2307_s1 + $0x244] ss:$8 sps:$4 sm:$0xff]  }
   0x7   :  { %1006 = vmatpush1.bf16.msra.mxu1 %v1553_v6  ;;  %v1571_v18 = vld [vmem:[%s2307_s1 + $0x40] ss:$8 sps:$4 sm:$0xff]   ;;  %v1573_v20 = vld [vmem:[%s2307_s1 + $0x54] ss:$8 sps:$4 sm:$0xff]   ;;  %v1577_v22 = vld [vmem:[%s2307_s1 + $0x50] ss:$8 sps:$4 sm:$0xff]  }
   0x8   :  { %1112 = vmatpush1.bf16.msra.mxu0 %v1554_v7  ;;  %1007 = vmatprep.subr.bf16.mxu1 %v1555_v8  ;;  %v1572_v19 = vld [vmem:[%s2307_s1 + $0x240] ss:$8 sps:$4 sm:$0xff]   ;;  %v1575_v21 = vld [vmem:[%s2307_s1 + $0x254] ss:$8 sps:$4 sm:$0xff]   ;;  %v1578_v23 = vld [vmem:[%s2307_s1 + $0x250] ss:$8 sps:$4 sm:$0xff]  }
   0x9   :  { %1113 = vmatprep.subr.bf16.mxu0 %v1557_v9  ;;  %v1579_v24 = vld [vmem:[%s2307_s1 + $0x64] ss:$8 sps:$4 sm:$0xff]   ;;  %v1583_v26 = vld [vmem:[%s2307_s1 + $0x60] ss:$8 sps:$4 sm:$0xff]   ;;  %v1585_v28 = vld [vmem:[%s2307_s1 + $0x74] ss:$8 sps:$4 sm:$0xff]  }
   0xa   :  { %v1581_v25 = vld [vmem:[%s2307_s1 + $0x264] ss:$8 sps:$4 sm:$0xff]   ;;  %v1584_v27 = vld [vmem:[%s2307_s1 + $0x260] ss:$8 sps:$4 sm:$0xff]   ;;  %v1587_v29 = vld [vmem:[%s2307_s1 + $0x274] ss:$8 sps:$4 sm:$0xff]  }
   0xb   :  { %1008 = vmatpush1.bf16.msra.mxu1 %v1559_v10  ;;  %v1589_v30 = vld [vmem:[%s2307_s1 + $0x70] ss:$8 sps:$4 sm:$0xff]   ;;  %v1591_v32 = vld [vmem:[%s2307_s1 + $0x84] ss:$8 sps:$4 sm:$0xff]   ;;  %v1595_v34 = vld [vmem:[%s2307_s1 + $0x80] ss:$8 sps:$4 sm:$0xff]  }
   0xc   :  { %1114 = vmatpush1.bf16.msra.mxu0 %v1560_v11  ;;  %1009 = vmatprep.subr.bf16.mxu1 %v1561_v12  ;;  %v1590_v31 = vld [vmem:[%s2307_s1 + $0x270] ss:$8 sps:$4 sm:$0xff]   ;;  %v1593_v33 = vld [vmem:[%s2307_s1 + $0x284] ss:$8 sps:$4 sm:$0xff]   ;;  %v1596_v35 = vld [vmem:[%s2307_s1 + $0x280] ss:$8 sps:$4 sm:$0xff]  }
   0xd   :  { %1115 = vmatprep.subr.bf16.mxu0 %v1563_v13  ;;  %v1597_v36 = vld [vmem:[%s2307_s1 + $0x94] ss:$8 sps:$4 sm:$0xff]   ;;  %v1601_v38 = vld [vmem:[%s2307_s1 + $0x90] ss:$8 sps:$4 sm:$0xff]   ;;  %v1603_v40 = vld [vmem:[%s2307_s1 + $0xa4] ss:$8 sps:$4 sm:$0xff]  }
   0xe   :  { %v1599_v37 = vld [vmem:[%s2307_s1 + $0x294] ss:$8 sps:$4 sm:$0xff]   ;;  %v1602_v39 = vld [vmem:[%s2307_s1 + $0x290] ss:$8 sps:$4 sm:$0xff]   ;;  %v1605_v41 = vld [vmem:[%s2307_s1 + $0x2a4] ss:$8 sps:$4 sm:$0xff]  }
   0xf   :  { %1010 = vmatpush1.bf16.msra.mxu1 %v1565_v14  ;;  %v1607_v42 = vld [vmem:[%s2307_s1 + $0xa0] ss:$8 sps:$4 sm:$0xff]   ;;  %v1609_v44 = vld [vmem:[%s2307_s1 + $0xb4] ss:$8 sps:$4 sm:$0xff]   ;;  %v1613_v46 = vld [vmem:[%s2307_s1 + $0xb0] ss:$8 sps:$4 sm:$0xff]  }
  0x10   :  { %1116 = vmatpush1.bf16.msra.mxu0 %v1566_v15  ;;  %1011 = vmatprep.subr.bf16.mxu1 %v1567_v16  ;;  %v1608_v43 = vld [vmem:[%s2307_s1 + $0x2a0] ss:$8 sps:$4 sm:$0xff]   ;;  %v1611_v45 = vld [vmem:[%s2307_s1 + $0x2b4] ss:$8 sps:$4 sm:$0xff]   ;;  %v1614_v47 = vld [vmem:[%s2307_s1 + $0x2b0] ss:$8 sps:$4 sm:$0xff]  }
  0x11   :  { %1117 = vmatprep.subr.bf16.mxu0 %v1569_v17  ;;  %v1641_v48 = vld [vmem:[%s2308_s0 + $0x4] ss:$36 sps:$4 sm:$0xff]   ;;  %v1647_v51 = vld [vmem:[%s2308_s0 + $0x14] ss:$36 sps:$4 sm:$0xff]  }
  0x12   :  { %v1615_v49 = vld [vmem:[%s2307_s1 + $0xc4] ss:$8 sps:$4 sm:$0xff]   ;;  %1035 = vmatprep.mubr.bf16.mxu1 %v1641_v48  ;;  %v1619_v52 = vld [vmem:[%s2307_s1 + $0xc0] ss:$8 sps:$4 sm:$0xff]   ;;  %v1621_v54 = vld [vmem:[%s2307_s1 + $0xd4] ss:$8 sps:$4 sm:$0xff]   ;;  %1141 = vmatprep.mubr.bf16.mxu0 %v1647_v51 }
  0x13   :  { %1012 = vmatpush1.bf16.msra.mxu1 %v1571_v18  ;;  %v1617_v50 = vld [vmem:[%s2307_s1 + $0x2c4] ss:$8 sps:$4 sm:$0xff]   ;;  %v1620_v53 = vld [vmem:[%s2307_s1 + $0x2c0] ss:$8 sps:$4 sm:$0xff]   ;;  %v1623_v55 = vld [vmem:[%s2307_s1 + $0x2d4] ss:$8 sps:$4 sm:$0xff]  }
  0x14   :  { %1118 = vmatpush1.bf16.msra.mxu0 %v1572_v19  ;;  %1013 = vmatprep.subr.bf16.mxu1 %v1573_v20  ;;  %v1625_v56 = vld [vmem:[%s2307_s1 + $0xd0] ss:$8 sps:$4 sm:$0xff]   ;;  %v1627_v58 = vld [vmem:[%s2307_s1 + $0xe4] ss:$8 sps:$4 sm:$0xff]   ;;  %v1631_v60 = vld [vmem:[%s2307_s1 + $0xe0] ss:$8 sps:$4 sm:$0xff]  }
  0x15   :  { %1119 = vmatprep.subr.bf16.mxu0 %v1575_v21  ;;  %v1626_v57 = vld [vmem:[%s2307_s1 + $0x2d0] ss:$8 sps:$4 sm:$0xff]   ;;  %v1629_v59 = vld [vmem:[%s2307_s1 + $0x2e4] ss:$8 sps:$4 sm:$0xff]   ;;  %v1632_v61 = vld [vmem:[%s2307_s1 + $0x2e0] ss:$8 sps:$4 sm:$0xff]  }
  0x16   :  { %v1633_v62 = vld [vmem:[%s2307_s1 + $0xf4] ss:$8 sps:$4 sm:$0xff]   ;;  %v1637_v0 = vld [vmem:[%s2307_s1 + $0xf0] ss:$8 sps:$4 sm:$0xff]   ;;  %v1644_v2 = vld [vmem:[%s2307_s1 + $0x104] ss:$8 sps:$4 sm:$0xff]  }
  0x17   :  { %1014 = vmatpush1.bf16.msra.mxu1 %v1577_v22  ;;  %v1635_v63 = vld [vmem:[%s2307_s1 + $0x2f4] ss:$8 sps:$4 sm:$0xff]   ;;  %v1638_v1 = vld [vmem:[%s2307_s1 + $0x2f0] ss:$8 sps:$4 sm:$0xff]   ;;  %v1650_v3 = vld [vmem:[%s2307_s1 + $0x304] ss:$8 sps:$4 sm:$0xff]  }
  0x18   :  { %1120 = vmatpush1.bf16.msra.mxu0 %v1578_v23  ;;  %1015 = vmatprep.subr.bf16.mxu1 %v1579_v24  ;;  %v1639_v4 = vld [vmem:[%s2308_s0] ss:$36 sps:$4 sm:$0xff]   ;;  %v1645_v6 = vld [vmem:[%s2308_s0 + $0x10] ss:$36 sps:$4 sm:$0xff]  }
  0x19   :  { %1121 = vmatprep.subr.bf16.mxu0 %v1581_v25  ;;  %v1642_v5 = vld [vmem:[%s2307_s1 + $0x100] ss:$8 sps:$4 sm:$0xff]   ;;  %v1653_v8 = vld [vmem:[%s2307_s1 + $0x114] ss:$8 sps:$4 sm:$0xff]   ;;  %v1651_v10 = vld [vmem:[%s2307_s1 + $0x110] ss:$8 sps:$4 sm:$0xff]  }
  0x1a   :  { %v1648_v7 = vld [vmem:[%s2307_s1 + $0x300] ss:$8 sps:$4 sm:$0xff]   ;;  %v1656_v9 = vld [vmem:[%s2307_s1 + $0x314] ss:$8 sps:$4 sm:$0xff]   ;;  %v1654_v11 = vld [vmem:[%s2307_s1 + $0x310] ss:$8 sps:$4 sm:$0xff]  }
  0x1b   :  { %1016 = vmatpush1.bf16.msra.mxu1 %v1583_v26  ;;  %v1659_v12 = vld [vmem:[%s2307_s1 + $0x124] ss:$8 sps:$4 sm:$0xff]   ;;  %v1657_v14 = vld [vmem:[%s2307_s1 + $0x120] ss:$8 sps:$4 sm:$0xff]   ;;  %v1665_v16 = vld [vmem:[%s2307_s1 + $0x134] ss:$8 sps:$4 sm:$0xff]  }
  0x1c   :  { %1122 = vmatpush1.bf16.msra.mxu0 %v1584_v27  ;;  %1017 = vmatprep.subr.bf16.mxu1 %v1585_v28  ;;  %v1662_v13 = vld [vmem:[%s2307_s1 + $0x324] ss:$8 sps:$4 sm:$0xff]   ;;  %v1660_v15 = vld [vmem:[%s2307_s1 + $0x320] ss:$8 sps:$4 sm:$0xff]   ;;  %v1668_v17 = vld [vmem:[%s2307_s1 + $0x334] ss:$8 sps:$4 sm:$0xff]  }
  0x1d   :  { %1123 = vmatprep.subr.bf16.mxu0 %v1587_v29  ;;  %v1663_v18 = vld [vmem:[%s2307_s1 + $0x130] ss:$8 sps:$4 sm:$0xff]   ;;  %v1671_v20 = vld [vmem:[%s2307_s1 + $0x144] ss:$8 sps:$4 sm:$0xff]   ;;  %v1669_v22 = vld [vmem:[%s2307_s1 + $0x140] ss:$8 sps:$4 sm:$0xff]  }
  0x1e   :  { %v1666_v19 = vld [vmem:[%s2307_s1 + $0x330] ss:$8 sps:$4 sm:$0xff]   ;;  %v1674_v21 = vld [vmem:[%s2307_s1 + $0x344] ss:$8 sps:$4 sm:$0xff]   ;;  %v1672_v23 = vld [vmem:[%s2307_s1 + $0x340] ss:$8 sps:$4 sm:$0xff]  }
  0x1f   :  { %1018 = vmatpush1.bf16.msra.mxu1 %v1589_v30  ;;  %v1677_v24 = vld [vmem:[%s2307_s1 + $0x154] ss:$8 sps:$4 sm:$0xff]   ;;  %v1675_v26 = vld [vmem:[%s2307_s1 + $0x150] ss:$8 sps:$4 sm:$0xff]   ;;  %v1683_v28 = vld [vmem:[%s2307_s1 + $0x164] ss:$8 sps:$4 sm:$0xff]  }
  0x20   :  { %1124 = vmatpush1.bf16.msra.mxu0 %v1590_v31  ;;  %1019 = vmatprep.subr.bf16.mxu1 %v1591_v32  ;;  %v1680_v25 = vld [vmem:[%s2307_s1 + $0x354] ss:$8 sps:$4 sm:$0xff]   ;;  %v1678_v27 = vld [vmem:[%s2307_s1 + $0x350] ss:$8 sps:$4 sm:$0xff]   ;;  %v1733_v31 = vld [vmem:[%s2308_s0 + $0x48] ss:$36 sps:$4 sm:$0xff]  }
  0x21   :  { %1125 = vmatprep.subr.bf16.mxu0 %v1593_v33  ;;  %v1729_v29 = vld [vmem:[%s2308_s0 + $0x4c] ss:$36 sps:$4 sm:$0xff]   ;;  %v1731_v30 = vld [vmem:[%s2308_s0 + $0x5c] ss:$36 sps:$4 sm:$0xff]  }
  0x22   :  { %v1686_v32 = vld [vmem:[%s2307_s1 + $0x364] ss:$8 sps:$4 sm:$0xff]   ;;  %v1737_v33 = vld [vmem:[%s2308_s0 + $0x58] ss:$36 sps:$4 sm:$0xff]  }
  0x23   :  { %1020 = vmatpush1.bf16.msra.mxu1 %v1595_v34  ;;  %v1681_v34 = vld [vmem:[%s2307_s1 + $0x160] ss:$8 sps:$4 sm:$0xff]   ;;  %v1699_v48 = vld [vmem:[%s2307_s1 + $0x190] ss:$8 sps:$4 sm:$0xff]   ;;  %v1710_v51 = vld [vmem:[%s2307_s1 + $0x3a4] ss:$8 sps:$4 sm:$0xff]  }
  0x24   :  { %1126 = vmatpush1.bf16.msra.mxu0 %v1596_v35  ;;  %1021 = vmatprep.subr.bf16.mxu1 %v1597_v36  ;;  %v1684_v35 = vld [vmem:[%s2307_s1 + $0x360] ss:$8 sps:$4 sm:$0xff]   ;;  %v1689_v36 = vld [vmem:[%s2307_s1 + $0x174] ss:$8 sps:$4 sm:$0xff]  }
  0x25   :  { %1127 = vmatprep.subr.bf16.mxu0 %v1599_v37  ;;  %v1692_v37 = vld [vmem:[%s2307_s1 + $0x374] ss:$8 sps:$4 sm:$0xff]  }
  0x27   :  { %1022 = vmatpush1.bf16.msra.mxu1 %v1601_v38  ;;  %v1687_v38 = vld [vmem:[%s2307_s1 + $0x170] ss:$8 sps:$4 sm:$0xff]  }
  0x28   :  { %1128 = vmatpush1.bf16.msra.mxu0 %v1602_v39  ;;  %1023 = vmatprep.subr.bf16.mxu1 %v1603_v40  ;;  %v1690_v39 = vld [vmem:[%s2307_s1 + $0x370] ss:$8 sps:$4 sm:$0xff]   ;;  %v1695_v40 = vld [vmem:[%s2307_s1 + $0x184] ss:$8 sps:$4 sm:$0xff]  }
  0x29   :  { %1129 = vmatprep.subr.bf16.mxu0 %v1605_v41  ;;  %v1749_v41 = vld [vmem:[%s2308_s0 + $0xc] ss:$36 sps:$4 sm:$0xff]  }
  0x2b   :  { %1024 = vmatpush1.bf16.msra.mxu1 %v1607_v42  ;;  %v1698_v42 = vld [vmem:[%s2307_s1 + $0x384] ss:$8 sps:$4 sm:$0xff]  }
  0x2c   :  { %1130 = vmatpush1.bf16.msra.mxu0 %v1608_v43  ;;  %1025 = vmatprep.subr.bf16.mxu1 %v1609_v44  ;;  %v1752_v43 = vld [vmem:[%s2308_s0 + $0x1c] ss:$36 sps:$4 sm:$0xff]  }
  0x2d   :  { %1131 = vmatprep.subr.bf16.mxu0 %v1611_v45  ;;  %v1693_v44 = vld [vmem:[%s2307_s1 + $0x180] ss:$8 sps:$4 sm:$0xff]  }
  0x2e   :  { %v1696_v45 = vld [vmem:[%s2307_s1 + $0x380] ss:$8 sps:$4 sm:$0xff]  }
  0x2f   :  { %1026 = vmatpush1.bf16.msra.mxu1 %v1613_v46  ;;  %v1701_v46 = vld [vmem:[%s2307_s1 + $0x194] ss:$8 sps:$4 sm:$0xff]  }
  0x30   :  { %1132 = vmatpush1.bf16.msra.mxu0 %v1614_v47  ;;  %1027 = vmatprep.subr.bf16.mxu1 %v1615_v49  ;;  %v1704_v47 = vld [vmem:[%s2307_s1 + $0x394] ss:$8 sps:$4 sm:$0xff]   ;;  %v1702_v49 = vld [vmem:[%s2307_s1 + $0x390] ss:$8 sps:$4 sm:$0xff]  }
  0x31   :  { %1133 = vmatprep.subr.bf16.mxu0 %v1617_v50  ;;  %v1707_v50 = vld [vmem:[%s2307_s1 + $0x1a4] ss:$8 sps:$4 sm:$0xff]  }
  0x33   :  { %1028 = vmatpush1.bf16.msra.mxu1 %v1619_v52  ;;  %v1705_v52 = vld [vmem:[%s2307_s1 + $0x1a0] ss:$8 sps:$4 sm:$0xff]  }
  0x34   :  { %1134 = vmatpush1.bf16.msra.mxu0 %v1620_v53  ;;  %1029 = vmatprep.subr.bf16.mxu1 %v1621_v54  ;;  %v1708_v53 = vld [vmem:[%s2307_s1 + $0x3a0] ss:$8 sps:$4 sm:$0xff]   ;;  %v1713_v54 = vld [vmem:[%s2307_s1 + $0x1b4] ss:$8 sps:$4 sm:$0xff]  }
  0x35   :  { %1135 = vmatprep.subr.bf16.mxu0 %v1623_v55  ;;  %v1716_v55 = vld [vmem:[%s2307_s1 + $0x3b4] ss:$8 sps:$4 sm:$0xff]  }
  0x37   :  { %1030 = vmatpush1.bf16.msra.mxu1 %v1625_v56  ;;  %v1711_v56 = vld [vmem:[%s2307_s1 + $0x1b0] ss:$8 sps:$4 sm:$0xff]  }
  0x38   :  { %1136 = vmatpush1.bf16.msra.mxu0 %v1626_v57  ;;  %1031 = vmatprep.subr.bf16.mxu1 %v1627_v58  ;;  %v1714_v57 = vld [vmem:[%s2307_s1 + $0x3b0] ss:$8 sps:$4 sm:$0xff]   ;;  %v1719_v58 = vld [vmem:[%s2307_s1 + $0x1c4] ss:$8 sps:$4 sm:$0xff]  }
  0x39   :  { %1137 = vmatprep.subr.bf16.mxu0 %v1629_v59  ;;  %v1722_v59 = vld [vmem:[%s2307_s1 + $0x3c4] ss:$8 sps:$4 sm:$0xff]  }
  0x3b   :  { %1032 = vmatpush1.bf16.msra.mxu1 %v1631_v60  ;;  %v1717_v60 = vld [vmem:[%s2307_s1 + $0x1c0] ss:$8 sps:$4 sm:$0xff]  }
  0x3c   :  { %1138 = vmatpush1.bf16.msra.mxu0 %v1632_v61  ;;  %1033 = vmatprep.subr.bf16.mxu1 %v1633_v62  ;;  %v1720_v61 = vld [vmem:[%s2307_s1 + $0x3c0] ss:$8 sps:$4 sm:$0xff]   ;;  %v1725_v62 = vld [vmem:[%s2307_s1 + $0x1d4] ss:$8 sps:$4 sm:$0xff]  }
  0x3d   :  { %1139 = vmatprep.subr.bf16.mxu0 %v1635_v63  ;;  %v1728_v63 = vld [vmem:[%s2307_s1 + $0x3d4] ss:$8 sps:$4 sm:$0xff]  }
  0x3f   :  { %1034 = vmatpush1.bf16.msra.mxu1 %v1637_v0  ;;  %v1723_v0 = vld [vmem:[%s2307_s1 + $0x1d0] ss:$8 sps:$4 sm:$0xff]  }
  0x40   :  { %1140 = vmatpush1.bf16.msra.mxu0 %v1638_v1  ;;  %1056 = vmatprep.subr.bf16.mxu1 %v1644_v2  ;;  %v1726_v1 = vld [vmem:[%s2307_s1 + $0x3d0] ss:$8 sps:$4 sm:$0xff]   ;;  %v1736_v2 = vld [vmem:[%s2307_s1 + $0x1e4] ss:$8 sps:$4 sm:$0xff]  }
  0x41   :  { %1162 = vmatprep.subr.bf16.mxu0 %v1650_v3  ;;  %v1740_v3 = vld [vmem:[%s2307_s1 + $0x3e4] ss:$8 sps:$4 sm:$0xff]  }
  0x42   :  { %1036 = vmatmul.mubr.bf16.vlgmr.msra.gmra.mrb[0].mxu1 %v1639_v4  ;;  %v1734_v4 = vld [vmem:[%s2307_s1 + $0x1e0] ss:$8 sps:$4 sm:$0xff]  }
  0x43   :  { %1142 = vmatmul.mubr.bf16.vlgmr.msra.gmra.mrb[0].mxu0 %v1645_v6  ;;  %1057 = vmatpush1.bf16.msra.mxu1 %v1642_v5  ;;  %v1738_v5 = vld [vmem:[%s2307_s1 + $0x3e0] ss:$8 sps:$4 sm:$0xff]   ;;  %v1743_v6 = vld [vmem:[%s2307_s1 + $0x1f4] ss:$8 sps:$4 sm:$0xff]  }
  0x44   :  { %1163 = vmatpush1.bf16.msra.mxu0 %v1648_v7  ;;  %1058 = vmatprep.subr.bf16.mxu1 %v1653_v8  ;;  %v1746_v7 = vld [vmem:[%s2307_s1 + $0x3f4] ss:$8 sps:$4 sm:$0xff]   ;;  %v1741_v8 = vld [vmem:[%s2307_s1 + $0x1f0] ss:$8 sps:$4 sm:$0xff]  }
  0x45   :  { %1164 = vmatprep.subr.bf16.mxu0 %v1656_v9  ;;  %1045 = vmatprep.mubr.bf16.mxu1 %v1729_v29  ;;  %v1744_v9 = vld [vmem:[%s2307_s1 + $0x3f0] ss:$8 sps:$4 sm:$0xff]   ;;  %v1779_v29 = vld [vmem:[%s2307_s1 + $0x464] ss:$8 sps:$4 sm:$0xff]  }
  0x46   :  { %1151 = vmatprep.mubr.bf16.mxu0 %v1731_v30  ;;  %v1777_v30 = vld [vmem:[%s2307_s1 + $0x460] ss:$8 sps:$4 sm:$0xff]  }
  0x47   :  { %1059 = vmatpush1.bf16.msra.mxu1 %v1651_v10  ;;  %v1755_v10 = vld [vmem:[%s2307_s1 + $0x404] ss:$8 sps:$4 sm:$0xff]  }
  0x48   :  { %1165 = vmatpush1.bf16.msra.mxu0 %v1654_v11  ;;  %1060 = vmatprep.subr.bf16.mxu1 %v1659_v12  ;;  %v1747_v11 = vld [vmem:[%s2308_s0 + $0x8] ss:$36 sps:$4 sm:$0xff]   ;;  %v1750_v12 = vld [vmem:[%s2308_s0 + $0x18] ss:$36 sps:$4 sm:$0xff]  }
  0x49   :  { %1166 = vmatprep.subr.bf16.mxu0 %v1662_v13  ;;  %v1753_v13 = vld [vmem:[%s2307_s1 + $0x400] ss:$8 sps:$4 sm:$0xff]  }
  0x4a   :  { %1046 = vmatmul.mubr.bf16.gmra.mrb[4].mxu1 %v1733_v31  ;;  %v1782_v31 = vld [vmem:[%s2307_s1 + $0x474] ss:$8 sps:$4 sm:$0xff]  }
  0x4b   :  { %1061 = vmatpush1.bf16.msra.mxu1 %v1657_v14  ;;  %1152 = vmatmul.mubr.bf16.gmra.mrb[4].mxu0 %v1737_v33  ;;  %v1758_v14 = vld [vmem:[%s2307_s1 + $0x414] ss:$8 sps:$4 sm:$0xff]   ;;  %v1783_v33 = vld [vmem:[%s2308_s0 + $0x20] ss:$36 sps:$4 sm:$0xff]  }
  0x4c   :  { %1167 = vmatpush1.bf16.msra.mxu0 %v1660_v15  ;;  %1062 = vmatprep.subr.bf16.mxu1 %v1665_v16  ;;  %v1759_v15 = vld [vmem:[%s2308_s0 + $0x54] ss:$36 sps:$4 sm:$0xff]   ;;  %v1761_v16 = vld [vmem:[%s2308_s0 + $0x64] ss:$36 sps:$4 sm:$0xff]  }
  0x4d   :  { %1168 = vmatprep.subr.bf16.mxu0 %v1668_v17  ;;  %1088 = vmatprep.mubr.bf16.mxu1 %v1749_v41  ;;  %v1756_v17 = vld [vmem:[%s2307_s1 + $0x410] ss:$8 sps:$4 sm:$0xff]  }
  0x4e   :  { %1194 = vmatprep.mubr.bf16.mxu0 %v1752_v43 }
  0x4f   :  { %1063 = vmatpush1.bf16.msra.mxu1 %v1663_v18  ;;  %v1767_v18 = vld [vmem:[%s2307_s1 + $0x424] ss:$8 sps:$4 sm:$0xff]  }
  0x50   :  { %1169 = vmatpush1.bf16.msra.mxu0 %v1666_v19  ;;  %1064 = vmatprep.subr.bf16.mxu1 %v1671_v20  ;;  %v1763_v19 = vld [vmem:[%s2308_s0 + $0x50] ss:$36 sps:$4 sm:$0xff]   ;;  %v1764_v20 = vld [vmem:[%s2308_s0 + $0x60] ss:$36 sps:$4 sm:$0xff]  }
  0x51   :  { %1170 = vmatprep.subr.bf16.mxu0 %v1674_v21  ;;  %v1765_v21 = vld [vmem:[%s2307_s1 + $0x420] ss:$8 sps:$4 sm:$0xff]  }
  0x53   :  { %1065 = vmatpush1.bf16.msra.mxu1 %v1669_v22  ;;  %v1770_v22 = vld [vmem:[%s2307_s1 + $0x434] ss:$8 sps:$4 sm:$0xff]  }
  0x54   :  { %1171 = vmatpush1.bf16.msra.mxu0 %v1672_v23  ;;  %1066 = vmatprep.subr.bf16.mxu1 %v1677_v24  ;;  %v1768_v23 = vld [vmem:[%s2307_s1 + $0x430] ss:$8 sps:$4 sm:$0xff]   ;;  %v1773_v24 = vld [vmem:[%s2307_s1 + $0x444] ss:$8 sps:$4 sm:$0xff]  }
  0x55   :  { %1172 = vmatprep.subr.bf16.mxu0 %v1680_v25  ;;  %v1785_v25 = vmov 0  }
  0x57   :  { %1067 = vmatpush1.bf16.msra.mxu1 %v1675_v26  ;;  %v1771_v26 = vld [vmem:[%s2307_s1 + $0x440] ss:$8 sps:$4 sm:$0xff]  }
  0x58   :  { %1173 = vmatpush1.bf16.msra.mxu0 %v1678_v27  ;;  %1068 = vmatprep.subr.bf16.mxu1 %v1683_v28  ;;  %v1776_v27 = vld [vmem:[%s2307_s1 + $0x454] ss:$8 sps:$4 sm:$0xff]   ;;  %v1774_v28 = vld [vmem:[%s2307_s1 + $0x450] ss:$8 sps:$4 sm:$0xff]  }
  0x59   :  { %1174 = vmatprep.subr.bf16.mxu0 %v1686_v32  ;;  %v1780_v32 = vld [vmem:[%s2307_s1 + $0x470] ss:$8 sps:$4 sm:$0xff]  }
  0x5b   :  { %1069 = vmatpush1.bf16.msra.mxu1 %v1681_v34  ;;  %v1784_v34 = vld [vmem:[%s2308_s0 + $0x68] ss:$36 sps:$4 sm:$0xff]  }
  0x5c   :  { %1175 = vmatpush1.bf16.msra.mxu0 %v1684_v35  ;;  %1070 = vmatprep.subr.bf16.mxu1 %v1689_v36  ;;  %v181_v35 = vlaneseq }
  0x5d   :  { %1176 = vmatprep.subr.bf16.mxu0 %v1692_v37 }
  0x5e   :  { %v182_v36 = vshrl.u32 %v181_v35, 7 }
  0x5f   :  { %1071 = vmatpush1.bf16.msra.mxu1 %v1687_v38 }
  0x60   :  { %1177 = vmatpush1.bf16.msra.mxu0 %v1690_v39  ;;  %1072 = vmatprep.subr.bf16.mxu1 %v1695_v40  ;;  %v183_v40 = vsub.s32 0, %v182_v36  ;;  %v187_v43 = vsub.s32 1, %v182_v36 }
  0x61   :  { %1178 = vmatprep.subr.bf16.mxu0 %v1698_v42  ;;  %v179_v42 = vld [vmem:[%s2309_s2] sm:$0x3] }
  0x63   :  { %1073 = vmatpush1.bf16.msra.mxu1 %v1693_v44  ;;  %v184_v44 = vrot.slane %v179_v42, %v183_v40 }
  0x64   :  { %1179 = vmatpush1.bf16.msra.mxu0 %v1696_v45  ;;  %1074 = vmatprep.subr.bf16.mxu1 %v1701_v46  ;;  %v188_v45 = vrot.slane %v179_v42, %v187_v43 }
  0x65   :  { %1180 = vmatprep.subr.bf16.mxu0 %v1704_v47 }
  0x67   :  { %1075 = vmatpush1.bf16.msra.mxu1 %v1699_v48 }
  0x68   :  { %1181 = vmatpush1.bf16.msra.mxu0 %v1702_v49  ;;  %1076 = vmatprep.subr.bf16.mxu1 %v1707_v50 }
  0x69   :  { %1182 = vmatprep.subr.bf16.mxu0 %v1710_v51 }
  0x6b   :  { %1077 = vmatpush1.bf16.msra.mxu1 %v1705_v52 }
  0x6c   :  { %1183 = vmatpush1.bf16.msra.mxu0 %v1708_v53  ;;  %1078 = vmatprep.subr.bf16.mxu1 %v1713_v54 }
  0x6d   :  { %1184 = vmatprep.subr.bf16.mxu0 %v1716_v55 }
  0x6f   :  { %1079 = vmatpush1.bf16.msra.mxu1 %v1711_v56 }
  0x70   :  { %1185 = vmatpush1.bf16.msra.mxu0 %v1714_v57  ;;  %1080 = vmatprep.subr.bf16.mxu1 %v1719_v58 }
  0x71   :  { %1186 = vmatprep.subr.bf16.mxu0 %v1722_v59 }
  0x73   :  { %1081 = vmatpush1.bf16.msra.mxu1 %v1717_v60 }
  0x74   :  { %1187 = vmatpush1.bf16.msra.mxu0 %v1720_v61  ;;  %1082 = vmatprep.subr.bf16.mxu1 %v1725_v62 }
  0x75   :  { %1188 = vmatprep.subr.bf16.mxu0 %v1728_v63 }
  0x77   :  { %1083 = vmatpush1.bf16.msra.mxu1 %v1723_v0 }
  0x78   :  { %1189 = vmatpush1.bf16.msra.mxu0 %v1726_v1  ;;  %1084 = vmatprep.subr.bf16.mxu1 %v1736_v2 }
  0x79   :  { %1190 = vmatprep.subr.bf16.mxu0 %v1740_v3 }
  0x7b   :  { %1085 = vmatpush1.bf16.msra.mxu1 %v1734_v4 }
  0x7c   :  { %1191 = vmatpush1.bf16.msra.mxu0 %v1738_v5  ;;  %1086 = vmatprep.subr.bf16.mxu1 %v1743_v6 }
  0x7d   :  { %1192 = vmatprep.subr.bf16.mxu0 %v1746_v7 }
  0x7f   :  { %1087 = vmatpush1.bf16.msra.mxu1 %v1741_v8 }
  0x80   :  { %1193 = vmatpush1.bf16.msra.mxu0 %v1744_v9  ;;  %1486 = vmatprep.subr.bf16.mxu1 %v1755_v10 }
  0x81   :  { %1215 = vmatprep.subr.bf16.mxu0 %v1755_v10 }
  0x82   :  { %1089 = vmatmul.mubr.bf16.vlgmr.msra.gmra.mrb[0].mxu1 %v1747_v11 }
  0x83   :  { %1195 = vmatmul.mubr.bf16.vlgmr.msra.gmra.mrb[0].mxu0 %v1750_v12  ;;  %1494 = vmatpush1.bf16.msra.mxu1 %v1753_v13 }
  0x84   :  { %1216 = vmatpush1.bf16.msra.mxu0 %v1753_v13  ;;  %1487 = vmatprep.subr.bf16.mxu1 %v1758_v14 }
  0x85   :  { %1217 = vmatprep.subr.bf16.mxu0 %v1758_v14  ;;  %1098 = vmatprep.mubr.bf16.mxu1 %v1759_v15 }
  0x86   :  { %1204 = vmatprep.mubr.bf16.mxu0 %v1761_v16 }
  0x87   :  { %1495 = vmatpush1.bf16.msra.mxu1 %v1756_v17 }
  0x88   :  { %1218 = vmatpush1.bf16.msra.mxu0 %v1756_v17  ;;  %1488 = vmatprep.subr.bf16.mxu1 %v1767_v18 }
  0x89   :  { %1219 = vmatprep.subr.bf16.mxu0 %v1767_v18 }
  0x8a   :  { %1099 = vmatmul.mubr.bf16.gmra.mrb[4].mxu1 %v1763_v19 }
  0x8b   :  { %1205 = vmatmul.mubr.bf16.gmra.mrb[4].mxu0 %v1764_v20  ;;  %1496 = vmatpush1.bf16.msra.mxu1 %v1765_v21 }
  0x8c   :  { %1220 = vmatpush1.bf16.msra.mxu0 %v1765_v21  ;;  %1489 = vmatprep.subr.bf16.mxu1 %v1770_v22 }
  0x8d   :  { %1221 = vmatprep.subr.bf16.mxu0 %v1770_v22  ;;  %1247 = vmatprep.mubr.bf16.mxu0 %v1785_v25 }
  0x8e   :  { %1257 = vmatprep.mubr.bf16.mxu1 %v1785_v25 }
  0x8f   :  { %1497 = vmatpush1.bf16.msra.mxu1 %v1768_v23 }
  0x90   :  { %1222 = vmatpush1.bf16.msra.mxu0 %v1768_v23  ;;  %1490 = vmatprep.subr.bf16.mxu1 %v1773_v24 }
  0x91   :  { %1223 = vmatprep.subr.bf16.mxu0 %v1773_v24 }
  0x93   :  { %1498 = vmatpush1.bf16.msra.mxu1 %v1771_v26 }
  0x94   :  { %1224 = vmatpush1.bf16.msra.mxu0 %v1771_v26  ;;  %1491 = vmatprep.subr.bf16.mxu1 %v1776_v27 }
  0x95   :  { %1225 = vmatprep.subr.bf16.mxu0 %v1776_v27 }
  0x97   :  { %1499 = vmatpush1.bf16.msra.mxu1 %v1774_v28 }
  0x98   :  { %1226 = vmatpush1.bf16.msra.mxu0 %v1774_v28  ;;  %1492 = vmatprep.subr.bf16.mxu1 %v1779_v29 }
  0x99   :  { %1227 = vmatprep.subr.bf16.mxu0 %v1779_v29 }
  0x9b   :  { %1500 = vmatpush1.bf16.msra.mxu1 %v1777_v30 }
  0x9c   :  { %1228 = vmatpush1.bf16.msra.mxu0 %v1777_v30  ;;  %1493 = vmatprep.subr.bf16.mxu1 %v1782_v31 }
  0x9d   :  { %1229 = vmatprep.subr.bf16.mxu0 %v1782_v31 }
  0x9f   :  { %1501 = vmatpush1.bf16.msra.mxu1 %v1780_v32 }
  0xa0   :  { %1230 = vmatpush1.bf16.msra.mxu0 %v1780_v32 }
  0xa2   :  { %1258 = vmatmul.mubr.bf16.vlgmr.msra.gmra.mrb[8].mxu1 %v1784_v34 }
  0xa3   :  { %1248 = vmatmul.mubr.bf16.vlgmr.msra.gmra.mrb[0].mxu0 %v1783_v33 }
 0x155   :  { %v1090_v37 = vpop.f32.mrb[0].mxu1 }
 0x156   :  { %v1092_v38 = vpop.f32.mrb[1].mxu1  ;;  %v1502_v62 = vadd.f32 %v1090_v37, %v184_v44 }
 0x157   :  { %v1094_v39 = vpop.f32.mrb[2].mxu1  ;;  %v1504_v63 = vadd.f32 %v1092_v38, %v188_v45 }
 0x158   :  { %v1096_v41 = vpop.f32.mrb[3].mxu1  ;;  %v1506_v2 = vadd.f32 %v1094_v39, %v184_v44 }
 0x159   :  { %v1508_v7 = vadd.f32 %v1096_v41, %v188_v45 }
 0x15d   :  { %v1100_v46 = vpop.f32.mrb[4].mxu1 }
 0x15e   :  { %v1206_v47 = vpop.f32.mrb[4].mxu0  ;;  %v1510_v48 = vadd.f32 %v1100_v46, %v184_v44  ;;  %v1102_v49 = vpop.f32.mrb[5].mxu1 }
 0x15f   :  { %v1208_v50 = vpop.f32.mrb[5].mxu0  ;;  %v1513_v51 = vadd.f32 %v1102_v49, %v188_v45  ;;  %v1104_v52 = vpop.f32.mrb[6].mxu1 }
 0x160   :  { %v1210_v53 = vpop.f32.mrb[6].mxu0  ;;  %v1511_v54 = vadd.f32 %v1510_v48, %v1206_v47  ;;  %v1516_v55 = vadd.f32 %v1104_v52, %v184_v44  ;;  %v1106_v56 = vpop.f32.mrb[7].mxu1 }
 0x161   :  { %v1212_v57 = vpop.f32.mrb[7].mxu0  ;;  %v1514_v58 = vadd.f32 %v1513_v51, %v1208_v50  ;;  %v1519_v59 = vadd.f32 %v1106_v56, %v188_v45 }
 0x162   :  { %v1517_v60 = vadd.f32 %v1516_v55, %v1210_v53 }
 0x163   :  { %v1520_v61 = vadd.f32 %v1519_v59, %v1212_v57 }
 0x175   :  { %v1259_v1 = vpop.f32.mrb[8].mxu1 }
 0x176   :  { %v1249_v0 = vpop.f32.mrb[0].mxu0  ;;  %v1512_v4 = vadd.f32 %v1511_v54, %v1259_v1  ;;  %v1261_v6 = vpop.f32.mrb[9].mxu1 }
 0x177   :  { %v1503_v3 = vadd.f32 %v1502_v62, %v1249_v0  ;;  %v1251_v5 = vpop.f32.mrb[1].mxu0  ;;  %v1515_v9 = vadd.f32 %v1514_v58, %v1261_v6  ;;  %v1263_v11 = vpop.f32.mrb[10].mxu1 }
 0x178   :  { %v1505_v8 = vadd.f32 %v1504_v63, %v1251_v5  ;;  %v1253_v10 = vpop.f32.mrb[2].mxu0  ;;  %v1272_v13 = vmul.f32 0.2, %v1512_v4  ;;  %v1518_v15 = vadd.f32 %v1517_v60, %v1263_v11  ;;  %v1265_v17 = vpop.f32.mrb[11].mxu1 }
 0x179   :  { %v1268_v12 = vmul.f32 0.2, %v1503_v3  ;;  %v1507_v14 = vadd.f32 %v1506_v2, %v1253_v10  ;;  %v1255_v16 = vpop.f32.mrb[3].mxu0  ;;  %v1273_v19 = vmul.f32 0.2, %v1515_v9  ;;  %v1521_v21 = vadd.f32 %v1520_v61, %v1265_v17 }
 0x17a   :  { %v1269_v18 = vmul.f32 0.2, %v1505_v8  ;;  %v1509_v20 = vadd.f32 %v1508_v7, %v1255_v16  ;;  %v1280_v23 = vmax.f32 %v1512_v4, %v1272_v13  ;;  %v1274_v25 = vmul.f32 0.2, %v1518_v15 }
 0x17b   :  { %v1276_v22 = vmax.f32 %v1503_v3, %v1268_v12  ;;  %v1270_v24 = vmul.f32 0.2, %v1507_v14  ;;  %v1281_v27 = vmax.f32 %v1515_v9, %v1273_v19  ;;  %v1275_v29 = vmul.f32 0.2, %v1521_v21 }
 0x17c   :  { %v1277_v26 = vmax.f32 %v1505_v8, %v1269_v18  ;;  %v1271_v28 = vmul.f32 0.2, %v1509_v20  ;;  %v1282_v31 = vmax.f32 %v1518_v15, %v1274_v25 }
 0x17d   :  { %v1278_v30 = vmax.f32 %v1507_v14, %v1270_v24  ;;  %v1484_v33 = vpack.c.bf16 %v1281_v27, %v1280_v23  ;;  %v1283_v35 = vmax.f32 %v1521_v21, %v1275_v29 }
 0x17e   :  { %v1482_v32 = vpack.c.bf16 %v1277_v26, %v1276_v22  ;;  %v1279_v34 = vmax.f32 %v1509_v20, %v1271_v28 }
 0x17f   :  { %1310 = vst [vmem:[%s2310_s3 + $0x10] sm:$0xff] %v1484_v33  ;;  %v1485_v37 = vpack.c.bf16 %v1283_v35, %v1282_v31 }
 0x180   :  { %1308 = vst [vmem:[%s2310_s3] sm:$0xff] %v1482_v32  ;;  %v1483_v36 = vpack.c.bf16 %v1279_v34, %v1278_v30 }
 0x181   :  { %1311 = vst [vmem:[%s2310_s3 + $0x18] sm:$0xff] %v1485_v37 }
 0x182   :  { %1309 = vst [vmem:[%s2310_s3 + $0x8] sm:$0xff] %v1483_v36 }

// kernel: ms_image_dis_forward.15
= control target key start
LH: loop header
LB: loop body
LE: loop exit
PB: predicated region body
PF: predicated region fallthrough
CT: control target
= control target key end

     0   :  { %s2377_s20 = smov 0   ;;  %s2638_s0 = inlined_call_operand.vmem [shape: bf16[8,2304], index: 0, kind: input, shape index: {}]   ;;  %s2639_s1 = inlined_call_operand.vmem [shape: bf16[2304,512], index: 1, kind: input, shape index: {}]   ;;  %s2640_s2 = inlined_call_operand.vmem [shape: f32[1,512], index: 2, kind: input, shape index: {}]   ;;  %s2641_s3 = inlined_call_operand.vmem [shape: bf16[1,512], index: 3, kind: input, shape index: {}]   ;;  %s2642_s4 = inlined_call_operand.<no memory space> [shape: f32[1,1], index: 4, kind: input, shape index: {}]   ;;  %s2643_s5 = inlined_call_operand.vmem [shape: f32[8,1], index: 5, kind: output, shape index: {}]  }
   0x1   :  { %v10_v0 = vstv %s2642_s4 }
   0x2   :  { %11 = vst [vmem:[#allocation3] sm:$0x1] %v10_v0 }
   0x3 LB: > { %s2383_s21 = sadd.s32 4294967295, %s2341_s20   ;;  %p1824_p0 = scmp.ge.s32.totalorder %s2341_s20, 1  ;;  %s2341_s20 = sphi %s2377_s20, %s17_s20  }
   0x4   : > { %p197_p1 = scmp.lt.s32.totalorder %s2341_s20, 4 }
   0x6   : > { %p198_p2 = pnand %p1824_p0, %p197_p1 }
   0x7   : > { %s226_s4 = smul.u32 (!%p198_p2), 6, %s2383_s21  ;;  %p1828_p5 = scmp.ne.s32.totalorder (!%p198_p2), %s2383_s21, 0 }
   0x8   : > { %201 = sbr.rel (%p198_p2) target bundleno = 601 (0x259), region = 40 }
   0x9   : > { %s232_s22 = smul.u32 (!%p198_p2), 96, %s2383_s21  ;;  %p227_p3 = scmp.lt.s32.totalorder (!%p198_p2), %s226_s4, 17 }
   0xb   : > { %p233_p4 = scmp.lt.s32.totalorder (!%p198_p2), %s232_s22, 287 }
   0xf   : > { %s2645_s4 = smov (!%p227_p3, %s226_s4), 17  ;;  %s2647_s22 = smov (!%p233_p4, %s232_s22), 287 }
  0x10   : > { %s1825_s23 = sshll.u32 %s2645_s4, 2  ;;  %s2031_s27 = sshll.u32 %s2647_s22, 4  ;;  %v2343_v1 = vmov (!%p1828_p5), 0.0  }
  0x11   : > { %s2392_s26 = scalar_lea.vmem %s2638_s0, %s1825_s23  ;;  %s2397_s30 = scalar_lea.vmem %s2639_s1, %s2031_s27  ;;  %243 = vst [vmem:[#allocation2] sm:$0xff] (!%p1828_p5), %v2343_v1  ;;  %244 = vst [vmem:[#allocation2 + $0x8] sm:$0xff] (!%p1828_p5), %v2343_v1 }
  0x12   : > { %242 = sbr.rel (%p1828_p5) target bundleno = 25 (0x19), region = 44  ;;  %245 = vst [vmem:[#allocation2 + $0x10] sm:$0xff] (!%p1828_p5), %v2343_v1  ;;  %246 = vst [vmem:[#allocation2 + $0x18] sm:$0xff] (!%p1828_p5), %v2343_v1 }
  0x19 PF: > { %v2041_v2 = vld [vmem:[%s2397_s30 + $0x4] ss:$16 sps:$4 sm:$0xff]   ;;  %v2045_v4 = vld [vmem:[%s2397_s30] ss:$16 sps:$4 sm:$0xff]   ;;  %v252_v50 = vld [vmem:[%s2392_s26 + $0x8] sm:$0xff]  ;;  %p2027_p6 = scmp.ne.s32.totalorder %s2383_s21, 2 }
  0x1a   : > { %v2043_v3 = vld [vmem:[%s2397_s30 + $0x204] ss:$16 sps:$4 sm:$0xff]   ;;  %1427 = vmatprep.subr.bf16.mxu0 %v2041_v2  ;;  %v2046_v5 = vld [vmem:[%s2397_s30 + $0x200] ss:$16 sps:$4 sm:$0xff]   ;;  %v2452_v53 = vcombine.high %v252_v50, %v252_v50  ;;  %vm1779_vm0 = vcmask (!%p2027_p6), 7168  }
  0x1b   : > { %1468 = vmatprep.subr.bf16.mxu1 %v2043_v3  ;;  %v2047_v6 = vld [vmem:[%s2397_s30 + $0x24] ss:$16 sps:$4 sm:$0xff]   ;;  %1428 = vmatpush1.bf16.msra.mxu0 %v2045_v4  ;;  %v2051_v8 = vld [vmem:[%s2397_s30 + $0x20] ss:$16 sps:$4 sm:$0xff]  }
  0x1c   : > { %1469 = vmatpush1.bf16.msra.mxu1 %v2046_v5  ;;  %v2049_v7 = vld [vmem:[%s2397_s30 + $0x224] ss:$16 sps:$4 sm:$0xff]   ;;  %1429 = vmatprep.subr.bf16.mxu0 %v2047_v6  ;;  %v2052_v9 = vld [vmem:[%s2397_s30 + $0x220] ss:$16 sps:$4 sm:$0xff]  }
  0x1d   : > { %1470 = vmatprep.subr.bf16.mxu1 %v2049_v7  ;;  %v2053_v10 = vld [vmem:[%s2397_s30 + $0x44] ss:$16 sps:$4 sm:$0xff]   ;;  %v2057_v12 = vld [vmem:[%s2397_s30 + $0x40] ss:$16 sps:$4 sm:$0xff]   ;;  %1500 = vmatprep.mubr.bf16.mxu1 %v2452_v53  ;;  %v2146_v7 = vld [vmem:[%s2397_s30 + $0xc] ss:$16 sps:$4 sm:$0xff]  }
  0x1e   : > { %v2055_v11 = vld [vmem:[%s2397_s30 + $0x244] ss:$16 sps:$4 sm:$0xff]   ;;  %v2058_v13 = vld [vmem:[%s2397_s30 + $0x240] ss:$16 sps:$4 sm:$0xff]  }
  0x1f   : > { %1430 = vmatpush1.bf16.msra.mxu0 %v2051_v8  ;;  %v2059_v14 = vld [vmem:[%s2397_s30 + $0x64] ss:$16 sps:$4 sm:$0xff]   ;;  %v2063_v16 = vld [vmem:[%s2397_s30 + $0x60] ss:$16 sps:$4 sm:$0xff]  }
  0x20   : > { %1471 = vmatpush1.bf16.msra.mxu1 %v2052_v9  ;;  %1431 = vmatprep.subr.bf16.mxu0 %v2053_v10  ;;  %v2061_v15 = vld [vmem:[%s2397_s30 + $0x264] ss:$16 sps:$4 sm:$0xff]   ;;  %v2064_v17 = vld [vmem:[%s2397_s30 + $0x260] ss:$16 sps:$4 sm:$0xff]   ;;  %v2476_v9 = vcombine.low %v252_v50, %v252_v50 }
  0x21   : > { %1472 = vmatprep.subr.bf16.mxu1 %v2055_v11  ;;  %v2065_v18 = vld [vmem:[%s2397_s30 + $0x84] ss:$16 sps:$4 sm:$0xff]   ;;  %v2069_v20 = vld [vmem:[%s2397_s30 + $0x80] ss:$16 sps:$4 sm:$0xff]   ;;  %v2144_v11 = vld [vmem:[%s2397_s30 + $0x8] ss:$16 sps:$4 sm:$0xff]  }
  0x22   : > { %v2067_v19 = vld [vmem:[%s2397_s30 + $0x284] ss:$16 sps:$4 sm:$0xff]   ;;  %v2070_v21 = vld [vmem:[%s2397_s30 + $0x280] ss:$16 sps:$4 sm:$0xff]  }
  0x23   : > { %1432 = vmatpush1.bf16.msra.mxu0 %v2057_v12  ;;  %v2071_v22 = vld [vmem:[%s2397_s30 + $0xa4] ss:$16 sps:$4 sm:$0xff]   ;;  %v2075_v24 = vld [vmem:[%s2397_s30 + $0xa0] ss:$16 sps:$4 sm:$0xff]  }
  0x24   : > { %1473 = vmatpush1.bf16.msra.mxu1 %v2058_v13  ;;  %1433 = vmatprep.subr.bf16.mxu0 %v2059_v14  ;;  %v2073_v23 = vld [vmem:[%s2397_s30 + $0x2a4] ss:$16 sps:$4 sm:$0xff]   ;;  %v2076_v25 = vld [vmem:[%s2397_s30 + $0x2a0] ss:$16 sps:$4 sm:$0xff]   ;;  %v2152_v13 = vld [vmem:[%s2397_s30 + $0x2c] ss:$16 sps:$4 sm:$0xff]  }
  0x25   : > { %1474 = vmatprep.subr.bf16.mxu1 %v2061_v15  ;;  %v2077_v26 = vld [vmem:[%s2397_s30 + $0xc4] ss:$16 sps:$4 sm:$0xff]   ;;  %v2081_v28 = vld [vmem:[%s2397_s30 + $0xc0] ss:$16 sps:$4 sm:$0xff]   ;;  %v2150_v15 = vld [vmem:[%s2397_s30 + $0x28] ss:$16 sps:$4 sm:$0xff]  }
  0x26   : > { %v2079_v27 = vld [vmem:[%s2397_s30 + $0x2c4] ss:$16 sps:$4 sm:$0xff]   ;;  %v2082_v29 = vld [vmem:[%s2397_s30 + $0x2c0] ss:$16 sps:$4 sm:$0xff]  }
  0x27   : > { %1434 = vmatpush1.bf16.msra.mxu0 %v2063_v16  ;;  %v2083_v30 = vld [vmem:[%s2397_s30 + $0xe4] ss:$16 sps:$4 sm:$0xff]   ;;  %v2087_v32 = vld [vmem:[%s2397_s30 + $0xe0] ss:$16 sps:$4 sm:$0xff]  }
  0x28   : > { %1475 = vmatpush1.bf16.msra.mxu1 %v2064_v17  ;;  %1435 = vmatprep.subr.bf16.mxu0 %v2065_v18  ;;  %v2085_v31 = vld [vmem:[%s2397_s30 + $0x2e4] ss:$16 sps:$4 sm:$0xff]   ;;  %v2088_v33 = vld [vmem:[%s2397_s30 + $0x2e0] ss:$16 sps:$4 sm:$0xff]   ;;  %v2158_v17 = vld [vmem:[%s2397_s30 + $0x4c] ss:$16 sps:$4 sm:$0xff]  }
  0x29   : > { %1476 = vmatprep.subr.bf16.mxu1 %v2067_v19  ;;  %v2089_v34 = vld [vmem:[%s2397_s30 + $0x104] ss:$16 sps:$4 sm:$0xff]   ;;  %v2093_v36 = vld [vmem:[%s2397_s30 + $0x100] ss:$16 sps:$4 sm:$0xff]   ;;  %v2156_v19 = vld [vmem:[%s2397_s30 + $0x48] ss:$16 sps:$4 sm:$0xff]  }
  0x2a   : > { %v2091_v35 = vld [vmem:[%s2397_s30 + $0x304] ss:$16 sps:$4 sm:$0xff]   ;;  %v2094_v37 = vld [vmem:[%s2397_s30 + $0x300] ss:$16 sps:$4 sm:$0xff]  }
  0x2b   : > { %1436 = vmatpush1.bf16.msra.mxu0 %v2069_v20  ;;  %v2095_v38 = vld [vmem:[%s2397_s30 + $0x124] ss:$16 sps:$4 sm:$0xff]   ;;  %v2099_v40 = vld [vmem:[%s2397_s30 + $0x120] ss:$16 sps:$4 sm:$0xff]  }
  0x2c   : > { %1477 = vmatpush1.bf16.msra.mxu1 %v2070_v21  ;;  %1437 = vmatprep.subr.bf16.mxu0 %v2071_v22  ;;  %v2097_v39 = vld [vmem:[%s2397_s30 + $0x324] ss:$16 sps:$4 sm:$0xff]   ;;  %v2100_v41 = vld [vmem:[%s2397_s30 + $0x320] ss:$16 sps:$4 sm:$0xff]   ;;  %v2164_v21 = vld [vmem:[%s2397_s30 + $0x6c] ss:$16 sps:$4 sm:$0xff]  }
  0x2d   : > { %1478 = vmatprep.subr.bf16.mxu1 %v2073_v23  ;;  %v2101_v42 = vld [vmem:[%s2397_s30 + $0x144] ss:$16 sps:$4 sm:$0xff]   ;;  %v2105_v44 = vld [vmem:[%s2397_s30 + $0x140] ss:$16 sps:$4 sm:$0xff]   ;;  %v2162_v23 = vld [vmem:[%s2397_s30 + $0x68] ss:$16 sps:$4 sm:$0xff]  }
  0x2e   : > { %v2103_v43 = vld [vmem:[%s2397_s30 + $0x344] ss:$16 sps:$4 sm:$0xff]   ;;  %v2106_v45 = vld [vmem:[%s2397_s30 + $0x340] ss:$16 sps:$4 sm:$0xff]  }
  0x2f   : > { %1438 = vmatpush1.bf16.msra.mxu0 %v2075_v24  ;;  %v2107_v46 = vld [vmem:[%s2397_s30 + $0x164] ss:$16 sps:$4 sm:$0xff]   ;;  %v2111_v51 = vld [vmem:[%s2397_s30 + $0x160] ss:$16 sps:$4 sm:$0xff]  }
  0x30   : > { %1479 = vmatpush1.bf16.msra.mxu1 %v2076_v25  ;;  %1439 = vmatprep.subr.bf16.mxu0 %v2077_v26  ;;  %v2109_v47 = vld [vmem:[%s2397_s30 + $0x364] ss:$16 sps:$4 sm:$0xff]   ;;  %v2112_v52 = vld [vmem:[%s2397_s30 + $0x360] ss:$16 sps:$4 sm:$0xff]   ;;  %v2170_v25 = vld [vmem:[%s2397_s30 + $0x8c] ss:$16 sps:$4 sm:$0xff]  }
  0x31   : > { %1480 = vmatprep.subr.bf16.mxu1 %v2079_v27  ;;  %v251_v48 = vld [vmem:[%s2392_s26] sm:$0xff]  ;;  %v2168_v27 = vld [vmem:[%s2397_s30 + $0x88] ss:$16 sps:$4 sm:$0xff]  }
  0x32   : > { %v2447_v49 = vcombine.high %v251_v48, %v251_v48  ;;  %v2113_v54 = vld [vmem:[%s2397_s30 + $0x184] ss:$16 sps:$4 sm:$0xff]   ;;  %v2117_v56 = vld [vmem:[%s2397_s30 + $0x180] ss:$16 sps:$4 sm:$0xff]   ;;  %v2474_v8 = vcombine.low %v251_v48, %v251_v48 }
  0x33   : > { %1440 = vmatpush1.bf16.msra.mxu0 %v2081_v28  ;;  %v2115_v55 = vld [vmem:[%s2397_s30 + $0x384] ss:$16 sps:$4 sm:$0xff]   ;;  %v2118_v57 = vld [vmem:[%s2397_s30 + $0x380] ss:$16 sps:$4 sm:$0xff]  }
  0x34   : > { %1481 = vmatpush1.bf16.msra.mxu1 %v2082_v29  ;;  %1441 = vmatprep.subr.bf16.mxu0 %v2083_v30  ;;  %v2119_v58 = vld [vmem:[%s2397_s30 + $0x1a4] ss:$16 sps:$4 sm:$0xff]   ;;  %v2123_v60 = vld [vmem:[%s2397_s30 + $0x1a0] ss:$16 sps:$4 sm:$0xff]   ;;  %v2176_v29 = vld [vmem:[%s2397_s30 + $0xac] ss:$16 sps:$4 sm:$0xff]  }
  0x35   : > { %1482 = vmatprep.subr.bf16.mxu1 %v2085_v31  ;;  %1459 = vmatprep.mubr.bf16.mxu0 %v2447_v49  ;;  %v2121_v59 = vld [vmem:[%s2397_s30 + $0x3a4] ss:$16 sps:$4 sm:$0xff]   ;;  %v2124_v61 = vld [vmem:[%s2397_s30 + $0x3a0] ss:$16 sps:$4 sm:$0xff]   ;;  %v2174_v31 = vld [vmem:[%s2397_s30 + $0xa8] ss:$16 sps:$4 sm:$0xff]  }
  0x36   : > { %v2125_v62 = vld [vmem:[%s2397_s30 + $0x1c4] ss:$16 sps:$4 sm:$0xff]   ;;  %v2129_v0 = vld [vmem:[%s2397_s30 + $0x1c0] ss:$16 sps:$4 sm:$0xff]  }
  0x37   : > { %1442 = vmatpush1.bf16.msra.mxu0 %v2087_v32  ;;  %v2127_v63 = vld [vmem:[%s2397_s30 + $0x3c4] ss:$16 sps:$4 sm:$0xff]   ;;  %v2130_v1 = vld [vmem:[%s2397_s30 + $0x3c0] ss:$16 sps:$4 sm:$0xff]  }
  0x38   : > { %1483 = vmatpush1.bf16.msra.mxu1 %v2088_v33  ;;  %1443 = vmatprep.subr.bf16.mxu0 %v2089_v34  ;;  %v2131_v2 = vld [vmem:[%s2397_s30 + $0x1e4] ss:$16 sps:$4 sm:$0xff]   ;;  %v2135_v4 = vld [vmem:[%s2397_s30 + $0x1e0] ss:$16 sps:$4 sm:$0xff]   ;;  %v2182_v33 = vld [vmem:[%s2397_s30 + $0xcc] ss:$16 sps:$4 sm:$0xff]  }
  0x39   : > { %1484 = vmatprep.subr.bf16.mxu1 %v2091_v35  ;;  %v2133_v3 = vld [vmem:[%s2397_s30 + $0x3e4] ss:$16 sps:$4 sm:$0xff]   ;;  %v2136_v5 = vld [vmem:[%s2397_s30 + $0x3e0] ss:$16 sps:$4 sm:$0xff]  }
  0x3a   : > { %v2143_v6 = vld [vmem:[%s2397_s30 + $0x404] ss:$16 sps:$4 sm:$0xff]   ;;  %v2141_v10 = vld [vmem:[%s2397_s30 + $0x400] ss:$16 sps:$4 sm:$0xff]  }
  0x3b   : > { %1444 = vmatpush1.bf16.msra.mxu0 %v2093_v36  ;;  %v2149_v12 = vld [vmem:[%s2397_s30 + $0x424] ss:$16 sps:$4 sm:$0xff]   ;;  %v2147_v14 = vld [vmem:[%s2397_s30 + $0x420] ss:$16 sps:$4 sm:$0xff]  }
  0x3c   : > { %1485 = vmatpush1.bf16.msra.mxu1 %v2094_v37  ;;  %1445 = vmatprep.subr.bf16.mxu0 %v2095_v38  ;;  %v2155_v16 = vld [vmem:[%s2397_s30 + $0x444] ss:$16 sps:$4 sm:$0xff]   ;;  %v2153_v18 = vld [vmem:[%s2397_s30 + $0x440] ss:$16 sps:$4 sm:$0xff]   ;;  %v2180_v37 = vld [vmem:[%s2397_s30 + $0xc8] ss:$16 sps:$4 sm:$0xff]  }
  0x3d   : > { %1486 = vmatprep.subr.bf16.mxu1 %v2097_v39  ;;  %v2161_v20 = vld [vmem:[%s2397_s30 + $0x464] ss:$16 sps:$4 sm:$0xff]   ;;  %v2159_v22 = vld [vmem:[%s2397_s30 + $0x460] ss:$16 sps:$4 sm:$0xff]   ;;  %v2188_v39 = vld [vmem:[%s2397_s30 + $0xec] ss:$16 sps:$4 sm:$0xff]  }
  0x3e   : > { %v2167_v24 = vld [vmem:[%s2397_s30 + $0x484] ss:$16 sps:$4 sm:$0xff]   ;;  %v2165_v26 = vld [vmem:[%s2397_s30 + $0x480] ss:$16 sps:$4 sm:$0xff]  }
  0x3f   : > { %1446 = vmatpush1.bf16.msra.mxu0 %v2099_v40  ;;  %v2173_v28 = vld [vmem:[%s2397_s30 + $0x4a4] ss:$16 sps:$4 sm:$0xff]   ;;  %v2171_v30 = vld [vmem:[%s2397_s30 + $0x4a0] ss:$16 sps:$4 sm:$0xff]  }
  0x40   : > { %1487 = vmatpush1.bf16.msra.mxu1 %v2100_v41  ;;  %1447 = vmatprep.subr.bf16.mxu0 %v2101_v42  ;;  %v2179_v32 = vld [vmem:[%s2397_s30 + $0x4c4] ss:$16 sps:$4 sm:$0xff]   ;;  %v2177_v35 = vld [vmem:[%s2397_s30 + $0x4c0] ss:$16 sps:$4 sm:$0xff]   ;;  %v2186_v41 = vld [vmem:[%s2397_s30 + $0xe8] ss:$16 sps:$4 sm:$0xff]  }
  0x41   : > { %1488 = vmatprep.subr.bf16.mxu1 %v2103_v43  ;;  %v2506_v34 = vld [vmem:[%s2392_s26 + $0x10] sm:$0xff]  ;;  %v2194_v43 = vld [vmem:[%s2397_s30 + $0x10c] ss:$16 sps:$4 sm:$0xff]  }
  0x42   : > { %v2511_v36 = vcombine.high %v2506_v34, %v2506_v34  ;;  %v2185_v38 = vld [vmem:[%s2397_s30 + $0x4e4] ss:$16 sps:$4 sm:$0xff]   ;;  %v2183_v40 = vld [vmem:[%s2397_s30 + $0x4e0] ss:$16 sps:$4 sm:$0xff]  }
  0x43   : > { %1448 = vmatpush1.bf16.msra.mxu0 %v2105_v44  ;;  %v2191_v42 = vld [vmem:[%s2397_s30 + $0x504] ss:$16 sps:$4 sm:$0xff]   ;;  %v2189_v44 = vld [vmem:[%s2397_s30 + $0x500] ss:$16 sps:$4 sm:$0xff]  }
  0x44   : > { %1489 = vmatpush1.bf16.msra.mxu1 %v2106_v45  ;;  %1449 = vmatprep.subr.bf16.mxu0 %v2107_v46  ;;  %v2192_v45 = vld [vmem:[%s2397_s30 + $0x108] ss:$16 sps:$4 sm:$0xff]   ;;  %v2197_v46 = vld [vmem:[%s2397_s30 + $0x524] ss:$16 sps:$4 sm:$0xff]   ;;  %v2195_v48 = vld [vmem:[%s2397_s30 + $0x520] ss:$16 sps:$4 sm:$0xff]  }
  0x45   : > { %1490 = vmatprep.subr.bf16.mxu1 %v2109_v47  ;;  %v2200_v47 = vld [vmem:[%s2397_s30 + $0x12c] ss:$16 sps:$4 sm:$0xff]   ;;  %v2203_v50 = vld [vmem:[%s2397_s30 + $0x544] ss:$16 sps:$4 sm:$0xff]  }
  0x47   : > { %1450 = vmatpush1.bf16.msra.mxu0 %v2111_v51  ;;  %v2206_v51 = vld [vmem:[%s2397_s30 + $0x14c] ss:$16 sps:$4 sm:$0xff]  }
  0x48   : > { %1491 = vmatpush1.bf16.msra.mxu1 %v2112_v52  ;;  %1451 = vmatprep.subr.bf16.mxu0 %v2113_v54  ;;  %v2201_v52 = vld [vmem:[%s2397_s30 + $0x540] ss:$16 sps:$4 sm:$0xff]   ;;  %v2204_v54 = vld [vmem:[%s2397_s30 + $0x148] ss:$16 sps:$4 sm:$0xff]  }
  0x49   : > { %1492 = vmatprep.subr.bf16.mxu1 %v2115_v55  ;;  %v2209_v55 = vld [vmem:[%s2397_s30 + $0x564] ss:$16 sps:$4 sm:$0xff]  }
  0x4b   : > { %1452 = vmatpush1.bf16.msra.mxu0 %v2117_v56  ;;  %v2212_v56 = vld [vmem:[%s2397_s30 + $0x16c] ss:$16 sps:$4 sm:$0xff]  }
  0x4c   : > { %1493 = vmatpush1.bf16.msra.mxu1 %v2118_v57  ;;  %1453 = vmatprep.subr.bf16.mxu0 %v2119_v58  ;;  %v2207_v57 = vld [vmem:[%s2397_s30 + $0x560] ss:$16 sps:$4 sm:$0xff]   ;;  %v2210_v58 = vld [vmem:[%s2397_s30 + $0x168] ss:$16 sps:$4 sm:$0xff]  }
  0x4d   : > { %1494 = vmatprep.subr.bf16.mxu1 %v2121_v59  ;;  %v2215_v59 = vld [vmem:[%s2397_s30 + $0x584] ss:$16 sps:$4 sm:$0xff]  }
  0x4f   : > { %1454 = vmatpush1.bf16.msra.mxu0 %v2123_v60  ;;  %v2218_v60 = vld [vmem:[%s2397_s30 + $0x18c] ss:$16 sps:$4 sm:$0xff]  }
  0x50   : > { %1495 = vmatpush1.bf16.msra.mxu1 %v2124_v61  ;;  %1455 = vmatprep.subr.bf16.mxu0 %v2125_v62  ;;  %v2213_v61 = vld [vmem:[%s2397_s30 + $0x580] ss:$16 sps:$4 sm:$0xff]   ;;  %v2216_v62 = vld [vmem:[%s2397_s30 + $0x188] ss:$16 sps:$4 sm:$0xff]  }
  0x51   : > { %1496 = vmatprep.subr.bf16.mxu1 %v2127_v63  ;;  %v2221_v63 = vld [vmem:[%s2397_s30 + $0x5a4] ss:$16 sps:$4 sm:$0xff]  }
  0x53   : > { %1456 = vmatpush1.bf16.msra.mxu0 %v2129_v0  ;;  %v2224_v0 = vld [vmem:[%s2397_s30 + $0x1ac] ss:$16 sps:$4 sm:$0xff]  }
  0x54   : > { %1497 = vmatpush1.bf16.msra.mxu1 %v2130_v1  ;;  %1457 = vmatprep.subr.bf16.mxu0 %v2131_v2  ;;  %v2219_v1 = vld [vmem:[%s2397_s30 + $0x5a0] ss:$16 sps:$4 sm:$0xff]   ;;  %v2222_v2 = vld [vmem:[%s2397_s30 + $0x1a8] ss:$16 sps:$4 sm:$0xff]  }
  0x55   : > { %1498 = vmatprep.subr.bf16.mxu1 %v2133_v3  ;;  %v2227_v3 = vld [vmem:[%s2397_s30 + $0x5c4] ss:$16 sps:$4 sm:$0xff]  }
  0x57   : > { %1458 = vmatpush1.bf16.msra.mxu0 %v2135_v4  ;;  %v2230_v4 = vld [vmem:[%s2397_s30 + $0x1cc] ss:$16 sps:$4 sm:$0xff]  }
  0x58   : > { %1499 = vmatpush1.bf16.msra.mxu1 %v2136_v5  ;;  %1509 = vmatprep.subr.bf16.mxu0 %v2143_v6  ;;  %v2225_v5 = vld [vmem:[%s2397_s30 + $0x5c0] ss:$16 sps:$4 sm:$0xff]   ;;  %v2228_v6 = vld [vmem:[%s2397_s30 + $0x1c8] ss:$16 sps:$4 sm:$0xff]  }
  0x59   : > { %1550 = vmatprep.subr.bf16.mxu1 %v2146_v7  ;;  %v2233_v7 = vld [vmem:[%s2397_s30 + $0x5e4] ss:$16 sps:$4 sm:$0xff]  }
  0x5a   : > { %1460 = vmatmul.mubr.bf16.vlgmr.msra.gmra.mrb[0].mxu0 %v2474_v8 }
  0x5b   : > { %1501 = vmatmul.mubr.bf16.vlgmr.msra.gmra.mrb[0].mxu1 %v2476_v9  ;;  %1510 = vmatpush1.bf16.msra.mxu0 %v2141_v10  ;;  %v2236_v10 = vld [vmem:[%s2397_s30 + $0x1ec] ss:$16 sps:$4 sm:$0xff]  }
  0x5c   : > { %1551 = vmatpush1.bf16.msra.mxu1 %v2144_v11  ;;  %1511 = vmatprep.subr.bf16.mxu0 %v2149_v12  ;;  %v2231_v11 = vld [vmem:[%s2397_s30 + $0x5e0] ss:$16 sps:$4 sm:$0xff]   ;;  %v2234_v12 = vld [vmem:[%s2397_s30 + $0x1e8] ss:$16 sps:$4 sm:$0xff]  }
  0x5d   : > { %1552 = vmatprep.subr.bf16.mxu1 %v2152_v13  ;;  %1582 = vmatprep.mubr.bf16.mxu1 %v2447_v49  ;;  %v2198_v49 = vld [vmem:[%s2397_s30 + $0x128] ss:$16 sps:$4 sm:$0xff]   ;;  %v2241_v13 = vld [vmem:[%s2397_s30 + $0x20c] ss:$16 sps:$4 sm:$0xff]  }
  0x5e   : > { %1541 = vmatprep.mubr.bf16.mxu0 %v2511_v36 }
  0x5f   : > { %1512 = vmatpush1.bf16.msra.mxu0 %v2147_v14  ;;  %v2244_v14 = vld [vmem:[%s2397_s30 + $0x40c] ss:$16 sps:$4 sm:$0xff]  }
  0x60   : > { %1553 = vmatpush1.bf16.msra.mxu1 %v2150_v15  ;;  %1513 = vmatprep.subr.bf16.mxu0 %v2155_v16  ;;  %v2555_v15 = vcombine.low %v2506_v34, %v2506_v34  ;;  %v2239_v16 = vld [vmem:[%s2397_s30 + $0x208] ss:$16 sps:$4 sm:$0xff]  }
  0x61   : > { %1554 = vmatprep.subr.bf16.mxu1 %v2158_v17  ;;  %v2242_v17 = vld [vmem:[%s2397_s30 + $0x408] ss:$16 sps:$4 sm:$0xff]  }
  0x62   : > { %v2269_v34 = vld [vmem:[%s2397_s30 + $0x2a8] ss:$16 sps:$4 sm:$0xff]  }
  0x63   : > { %1514 = vmatpush1.bf16.msra.mxu0 %v2153_v18  ;;  %v2247_v18 = vld [vmem:[%s2397_s30 + $0x22c] ss:$16 sps:$4 sm:$0xff]  }
  0x64   : > { %1555 = vmatpush1.bf16.msra.mxu1 %v2156_v19  ;;  %1515 = vmatprep.subr.bf16.mxu0 %v2161_v20  ;;  %v2250_v19 = vld [vmem:[%s2397_s30 + $0x42c] ss:$16 sps:$4 sm:$0xff]   ;;  %v2245_v20 = vld [vmem:[%s2397_s30 + $0x228] ss:$16 sps:$4 sm:$0xff]  }
  0x65   : > { %1556 = vmatprep.subr.bf16.mxu1 %v2164_v21  ;;  %v2248_v21 = vld [vmem:[%s2397_s30 + $0x428] ss:$16 sps:$4 sm:$0xff]  }
  0x67   : > { %1516 = vmatpush1.bf16.msra.mxu0 %v2159_v22  ;;  %v2253_v22 = vld [vmem:[%s2397_s30 + $0x24c] ss:$16 sps:$4 sm:$0xff]  }
  0x68   : > { %1557 = vmatpush1.bf16.msra.mxu1 %v2162_v23  ;;  %1517 = vmatprep.subr.bf16.mxu0 %v2167_v24  ;;  %v2256_v23 = vld [vmem:[%s2397_s30 + $0x44c] ss:$16 sps:$4 sm:$0xff]   ;;  %v2254_v24 = vld [vmem:[%s2397_s30 + $0x448] ss:$16 sps:$4 sm:$0xff]  }
  0x69   : > { %1558 = vmatprep.subr.bf16.mxu1 %v2170_v25  ;;  %v2259_v25 = vld [vmem:[%s2397_s30 + $0x26c] ss:$16 sps:$4 sm:$0xff]  }
  0x6b   : > { %1518 = vmatpush1.bf16.msra.mxu0 %v2165_v26  ;;  %v2262_v26 = vld [vmem:[%s2397_s30 + $0x46c] ss:$16 sps:$4 sm:$0xff]  }
  0x6c   : > { %1559 = vmatpush1.bf16.msra.mxu1 %v2168_v27  ;;  %1519 = vmatprep.subr.bf16.mxu0 %v2173_v28  ;;  %v2257_v27 = vld [vmem:[%s2397_s30 + $0x268] ss:$16 sps:$4 sm:$0xff]   ;;  %v2265_v28 = vld [vmem:[%s2397_s30 + $0x28c] ss:$16 sps:$4 sm:$0xff]  }
  0x6d   : > { %1560 = vmatprep.subr.bf16.mxu1 %v2176_v29  ;;  %v2268_v29 = vld [vmem:[%s2397_s30 + $0x48c] ss:$16 sps:$4 sm:$0xff]  }
  0x6f   : > { %1520 = vmatpush1.bf16.msra.mxu0 %v2171_v30  ;;  %v2263_v30 = vld [vmem:[%s2397_s30 + $0x288] ss:$16 sps:$4 sm:$0xff]  }
  0x70   : > { %1561 = vmatpush1.bf16.msra.mxu1 %v2174_v31  ;;  %1521 = vmatprep.subr.bf16.mxu0 %v2179_v32  ;;  %v2266_v31 = vld [vmem:[%s2397_s30 + $0x488] ss:$16 sps:$4 sm:$0xff]   ;;  %v2271_v32 = vld [vmem:[%s2397_s30 + $0x2ac] ss:$16 sps:$4 sm:$0xff]  }
  0x71   : > { %1562 = vmatprep.subr.bf16.mxu1 %v2182_v33  ;;  %v2274_v33 = vld [vmem:[%s2397_s30 + $0x4ac] ss:$16 sps:$4 sm:$0xff]  }
  0x73   : > { %1522 = vmatpush1.bf16.msra.mxu0 %v2177_v35  ;;  %v2272_v35 = vld [vmem:[%s2397_s30 + $0x4a8] ss:$16 sps:$4 sm:$0xff]  }
  0x74   : > { %1563 = vmatpush1.bf16.msra.mxu1 %v2180_v37  ;;  %1523 = vmatprep.subr.bf16.mxu0 %v2185_v38  ;;  %v2280_v37 = vld [vmem:[%s2397_s30 + $0x4cc] ss:$16 sps:$4 sm:$0xff]   ;;  %v2275_v38 = vld [vmem:[%s2397_s30 + $0x2c8] ss:$16 sps:$4 sm:$0xff]  }
  0x75   : > { %1564 = vmatprep.subr.bf16.mxu1 %v2188_v39  ;;  %v2278_v39 = vld [vmem:[%s2397_s30 + $0x4c8] ss:$16 sps:$4 sm:$0xff]  }
  0x77   : > { %1524 = vmatpush1.bf16.msra.mxu0 %v2183_v40  ;;  %v2283_v40 = vld [vmem:[%s2397_s30 + $0x2ec] ss:$16 sps:$4 sm:$0xff]  }
  0x78   : > { %1565 = vmatpush1.bf16.msra.mxu1 %v2186_v41  ;;  %1525 = vmatprep.subr.bf16.mxu0 %v2191_v42  ;;  %v2286_v41 = vld [vmem:[%s2397_s30 + $0x4ec] ss:$16 sps:$4 sm:$0xff]   ;;  %v2281_v42 = vld [vmem:[%s2397_s30 + $0x2e8] ss:$16 sps:$4 sm:$0xff]  }
  0x79   : > { %1566 = vmatprep.subr.bf16.mxu1 %v2194_v43  ;;  %v2284_v43 = vld [vmem:[%s2397_s30 + $0x4e8] ss:$16 sps:$4 sm:$0xff]  }
  0x7b   : > { %1526 = vmatpush1.bf16.msra.mxu0 %v2189_v44  ;;  %v2289_v44 = vld [vmem:[%s2397_s30 + $0x30c] ss:$16 sps:$4 sm:$0xff]  }
  0x7c   : > { %1567 = vmatpush1.bf16.msra.mxu1 %v2192_v45  ;;  %1527 = vmatprep.subr.bf16.mxu0 %v2197_v46  ;;  %v2292_v45 = vld [vmem:[%s2397_s30 + $0x50c] ss:$16 sps:$4 sm:$0xff]   ;;  %v2287_v46 = vld [vmem:[%s2397_s30 + $0x308] ss:$16 sps:$4 sm:$0xff]  }
  0x7d   : > { %1568 = vmatprep.subr.bf16.mxu1 %v2200_v47  ;;  %v2290_v47 = vld [vmem:[%s2397_s30 + $0x508] ss:$16 sps:$4 sm:$0xff]  }
  0x7f   : > { %1528 = vmatpush1.bf16.msra.mxu0 %v2195_v48  ;;  %v2295_v48 = vld [vmem:[%s2397_s30 + $0x32c] ss:$16 sps:$4 sm:$0xff]  }
  0x80   : > { %1569 = vmatpush1.bf16.msra.mxu1 %v2198_v49  ;;  %1529 = vmatprep.subr.bf16.mxu0 %v2203_v50  ;;  %v2298_v49 = vld [vmem:[%s2397_s30 + $0x52c] ss:$16 sps:$4 sm:$0xff]   ;;  %v2293_v50 = vld [vmem:[%s2397_s30 + $0x328] ss:$16 sps:$4 sm:$0xff]  }
  0x81   : > { %1570 = vmatprep.subr.bf16.mxu1 %v2206_v51  ;;  %v2296_v51 = vld [vmem:[%s2397_s30 + $0x528] ss:$16 sps:$4 sm:$0xff]  }
  0x83   : > { %1530 = vmatpush1.bf16.msra.mxu0 %v2201_v52  ;;  %v2301_v52 = vld [vmem:[%s2397_s30 + $0x34c] ss:$16 sps:$4 sm:$0xff]  }
  0x84   : > { %1571 = vmatpush1.bf16.msra.mxu1 %v2204_v54  ;;  %1531 = vmatprep.subr.bf16.mxu0 %v2209_v55  ;;  %v2304_v54 = vld [vmem:[%s2397_s30 + $0x54c] ss:$16 sps:$4 sm:$0xff]   ;;  %v2299_v55 = vld [vmem:[%s2397_s30 + $0x348] ss:$16 sps:$4 sm:$0xff]  }
  0x85   : > { %1572 = vmatprep.subr.bf16.mxu1 %v2212_v56  ;;  %v2302_v56 = vld [vmem:[%s2397_s30 + $0x548] ss:$16 sps:$4 sm:$0xff]  }
  0x87   : > { %1532 = vmatpush1.bf16.msra.mxu0 %v2207_v57  ;;  %v2307_v57 = vld [vmem:[%s2397_s30 + $0x36c] ss:$16 sps:$4 sm:$0xff]  }
  0x88   : > { %1573 = vmatpush1.bf16.msra.mxu1 %v2210_v58  ;;  %1533 = vmatprep.subr.bf16.mxu0 %v2215_v59  ;;  %v2310_v58 = vld [vmem:[%s2397_s30 + $0x56c] ss:$16 sps:$4 sm:$0xff]   ;;  %v2305_v59 = vld [vmem:[%s2397_s30 + $0x368] ss:$16 sps:$4 sm:$0xff]  }
  0x89   : > { %1574 = vmatprep.subr.bf16.mxu1 %v2218_v60  ;;  %v2308_v60 = vld [vmem:[%s2397_s30 + $0x568] ss:$16 sps:$4 sm:$0xff]  }
  0x8b   : > { %1534 = vmatpush1.bf16.msra.mxu0 %v2213_v61  ;;  %v2313_v61 = vld [vmem:[%s2397_s30 + $0x38c] ss:$16 sps:$4 sm:$0xff]  }
  0x8c   : > { %1575 = vmatpush1.bf16.msra.mxu1 %v2216_v62  ;;  %1535 = vmatprep.subr.bf16.mxu0 %v2221_v63  ;;  %v2316_v62 = vld [vmem:[%s2397_s30 + $0x58c] ss:$16 sps:$4 sm:$0xff]   ;;  %v2311_v63 = vld [vmem:[%s2397_s30 + $0x388] ss:$16 sps:$4 sm:$0xff]  }
  0x8d   : > { %1576 = vmatprep.subr.bf16.mxu1 %v2224_v0  ;;  %v2314_v0 = vld [vmem:[%s2397_s30 + $0x588] ss:$16 sps:$4 sm:$0xff]  }
  0x8f   : > { %1536 = vmatpush1.bf16.msra.mxu0 %v2219_v1  ;;  %v2319_v1 = vld [vmem:[%s2397_s30 + $0x3ac] ss:$16 sps:$4 sm:$0xff]  }
  0x90   : > { %1577 = vmatpush1.bf16.msra.mxu1 %v2222_v2  ;;  %1537 = vmatprep.subr.bf16.mxu0 %v2227_v3  ;;  %v2322_v2 = vld [vmem:[%s2397_s30 + $0x5ac] ss:$16 sps:$4 sm:$0xff]   ;;  %v2317_v3 = vld [vmem:[%s2397_s30 + $0x3a8] ss:$16 sps:$4 sm:$0xff]  }
  0x91   : > { %1578 = vmatprep.subr.bf16.mxu1 %v2230_v4  ;;  %v2320_v4 = vld [vmem:[%s2397_s30 + $0x5a8] ss:$16 sps:$4 sm:$0xff]  }
  0x93   : > { %1538 = vmatpush1.bf16.msra.mxu0 %v2225_v5  ;;  %v2325_v5 = vld [vmem:[%s2397_s30 + $0x3cc] ss:$16 sps:$4 sm:$0xff]  }
  0x94   : > { %1579 = vmatpush1.bf16.msra.mxu1 %v2228_v6  ;;  %1539 = vmatprep.subr.bf16.mxu0 %v2233_v7  ;;  %v2328_v6 = vld [vmem:[%s2397_s30 + $0x5cc] ss:$16 sps:$4 sm:$0xff]   ;;  %v2323_v7 = vld [vmem:[%s2397_s30 + $0x3c8] ss:$16 sps:$4 sm:$0xff]  }
  0x95   : > { %1580 = vmatprep.subr.bf16.mxu1 %v2236_v10  ;;  %v2326_v10 = vld [vmem:[%s2397_s30 + $0x5c8] ss:$16 sps:$4 sm:$0xff]  }
  0x97   : > { %1540 = vmatpush1.bf16.msra.mxu0 %v2231_v11  ;;  %v2331_v11 = vld [vmem:[%s2397_s30 + $0x3ec] ss:$16 sps:$4 sm:$0xff]  }
  0x98   : > { %1581 = vmatpush1.bf16.msra.mxu1 %v2234_v12  ;;  %1591 = vmatprep.subr.bf16.mxu0 %v2241_v13  ;;  %v2334_v12 = vld [vmem:[%s2397_s30 + $0x5ec] ss:$16 sps:$4 sm:$0xff]   ;;  %v2329_v13 = vld [vmem:[%s2397_s30 + $0x3e8] ss:$16 sps:$4 sm:$0xff]  }
  0x99   : > { %1632 = vmatprep.subr.bf16.mxu1 %v2244_v14  ;;  %v2332_v14 = vld [vmem:[%s2397_s30 + $0x5e8] ss:$16 sps:$4 sm:$0xff]  }
  0x9a   : > { %1542 = vmatmul.mubr.bf16.vlgmr.msra.gmra.mrb[4].mxu0 %v2555_v15 }
  0x9b   : > { %1583 = vmatmul.mubr.bf16.vlgmr.msra.gmra.mrb[4].mxu1 %v2474_v8  ;;  %1592 = vmatpush1.bf16.msra.mxu0 %v2239_v16  ;;  %v2251_v8 = vld [vmem:[%s2397_s30 + $0x248] ss:$16 sps:$4 sm:$0xff]  }
  0x9c   : > { %1633 = vmatpush1.bf16.msra.mxu1 %v2242_v17  ;;  %1593 = vmatprep.subr.bf16.mxu0 %v2247_v18 }
  0x9d   : > { %1634 = vmatprep.subr.bf16.mxu1 %v2250_v19  ;;  %1623 = vmatprep.mubr.bf16.mxu0 %v2452_v53  ;;  %v2260_v53 = vld [vmem:[%s2397_s30 + $0x468] ss:$16 sps:$4 sm:$0xff]  }
  0x9e   : > { %1664 = vmatprep.mubr.bf16.mxu1 %v2511_v36  ;;  %v2277_v36 = vld [vmem:[%s2397_s30 + $0x2cc] ss:$16 sps:$4 sm:$0xff]  }
  0x9f   : > { %1594 = vmatpush1.bf16.msra.mxu0 %v2245_v20 }
  0xa0   : > { %1635 = vmatpush1.bf16.msra.mxu1 %v2248_v21  ;;  %1595 = vmatprep.subr.bf16.mxu0 %v2253_v22 }
  0xa1   : > { %1636 = vmatprep.subr.bf16.mxu1 %v2256_v23 }
  0xa3   : > { %1596 = vmatpush1.bf16.msra.mxu0 %v2251_v8 }
  0xa4   : > { %1637 = vmatpush1.bf16.msra.mxu1 %v2254_v24  ;;  %1597 = vmatprep.subr.bf16.mxu0 %v2259_v25  ;;  %v247_v25 = vld [vmem:[#allocation2] sm:$0xff] }
  0xa5   : > { %1638 = vmatprep.subr.bf16.mxu1 %v2262_v26 }
  0xa7   : > { %1598 = vmatpush1.bf16.msra.mxu0 %v2257_v27 }
  0xa8   : > { %1639 = vmatpush1.bf16.msra.mxu1 %v2260_v53  ;;  %1599 = vmatprep.subr.bf16.mxu0 %v2265_v28  ;;  %v248_v28 = vld [vmem:[#allocation2 + $0x8] sm:$0xff] }
  0xa9   : > { %1640 = vmatprep.subr.bf16.mxu1 %v2268_v29 }
  0xab   : > { %1600 = vmatpush1.bf16.msra.mxu0 %v2263_v30 }
  0xac   : > { %1641 = vmatpush1.bf16.msra.mxu1 %v2266_v31  ;;  %1601 = vmatprep.subr.bf16.mxu0 %v2271_v32 }
  0xad   : > { %1642 = vmatprep.subr.bf16.mxu1 %v2274_v33 }
  0xaf   : > { %1602 = vmatpush1.bf16.msra.mxu0 %v2269_v34 }
  0xb0   : > { %1643 = vmatpush1.bf16.msra.mxu1 %v2272_v35  ;;  %1603 = vmatprep.subr.bf16.mxu0 %v2277_v36 }
  0xb1   : > { %1644 = vmatprep.subr.bf16.mxu1 %v2280_v37 }
  0xb3   : > { %1604 = vmatpush1.bf16.msra.mxu0 %v2275_v38 }
  0xb4   : > { %1645 = vmatpush1.bf16.msra.mxu1 %v2278_v39  ;;  %1605 = vmatprep.subr.bf16.mxu0 %v2283_v40 }
  0xb5   : > { %1646 = vmatprep.subr.bf16.mxu1 %v2286_v41  ;;  %v249_v41 = vld [vmem:[#allocation2 + $0x10] sm:$0xff] }
  0xb7   : > { %1606 = vmatpush1.bf16.msra.mxu0 %v2281_v42 }
  0xb8   : > { %1647 = vmatpush1.bf16.msra.mxu1 %v2284_v43  ;;  %1607 = vmatprep.subr.bf16.mxu0 %v2289_v44 }
  0xb9   : > { %1648 = vmatprep.subr.bf16.mxu1 %v2292_v45 }
  0xbb   : > { %1608 = vmatpush1.bf16.msra.mxu0 %v2287_v46  ;;  %v250_v46 = vld [vmem:[#allocation2 + $0x18] sm:$0xff] }
  0xbc   : > { %1649 = vmatpush1.bf16.msra.mxu1 %v2290_v47  ;;  %1609 = vmatprep.subr.bf16.mxu0 %v2295_v48 }
  0xbd   : > { %1650 = vmatprep.subr.bf16.mxu1 %v2298_v49 }
  0xbf   : > { %1610 = vmatpush1.bf16.msra.mxu0 %v2293_v50 }
  0xc0   : > { %1651 = vmatpush1.bf16.msra.mxu1 %v2296_v51  ;;  %1611 = vmatprep.subr.bf16.mxu0 %v2301_v52  ;;  %v1691_v52 = vlaneseq (!%p2027_p6) }
  0xc1   : > { %1652 = vmatprep.subr.bf16.mxu1 %v2304_v54  ;;  %v1723_v54 = vld [vmem:[%s2641_s3] sm:$0xf] (!%p2027_p6) }
  0xc3   : > { %1612 = vmatpush1.bf16.msra.mxu0 %v2299_v55  ;;  %v1692_v55 = vshrl.u32 (!%p2027_p6), %v1691_v52, 7 }
  0xc4   : > { %1653 = vmatpush1.bf16.msra.mxu1 %v2302_v56  ;;  %1613 = vmatprep.subr.bf16.mxu0 %v2307_v57  ;;  %v1689_v56 = vld [vmem:[%s2640_s2] sm:$0xf] (!%p2027_p6)  ;;  %v1724_v57 = vunpack.c.l.bf16 (!%p2027_p6), %v1723_v54 }
  0xc5   : > { %1654 = vmatprep.subr.bf16.mxu1 %v2310_v58 }
  0xc7   : > { %1614 = vmatpush1.bf16.msra.mxu0 %v2305_v59  ;;  %v1693_v59 = vsub.s32 (!%p2027_p6), 0, %v1692_v55 }
  0xc8   : > { %1655 = vmatpush1.bf16.msra.mxu1 %v2308_v60  ;;  %1615 = vmatprep.subr.bf16.mxu0 %v2313_v61  ;;  %v1697_v60 = vsub.s32 (!%p2027_p6), 1, %v1692_v55  ;;  %v1701_v61 = vsub.s32 (!%p2027_p6), 2, %v1692_v55 }
  0xc9   : > { %1656 = vmatprep.subr.bf16.mxu1 %v2316_v62  ;;  %v1705_v62 = vsub.s32 (!%p2027_p6), 3, %v1692_v55 }
  0xcb   : > { %1616 = vmatpush1.bf16.msra.mxu0 %v2311_v63 }
  0xcc   : > { %1657 = vmatpush1.bf16.msra.mxu1 %v2314_v0  ;;  %1617 = vmatprep.subr.bf16.mxu0 %v2319_v1 }
  0xcd   : > { %1658 = vmatprep.subr.bf16.mxu1 %v2322_v2  ;;  %v1736_v2 = vsub.s32 (!%p2027_p6), 4, %v1692_v55 }
  0xcf   : > { %1618 = vmatpush1.bf16.msra.mxu0 %v2317_v3  ;;  %v1740_v3 = vsub.s32 (!%p2027_p6), 6, %v1692_v55 }
  0xd0   : > { %1659 = vmatpush1.bf16.msra.mxu1 %v2320_v4  ;;  %1619 = vmatprep.subr.bf16.mxu0 %v2325_v5  ;;  %v1694_v4 = vrot.slane (!%p2027_p6), %v1689_v56, %v1693_v59  ;;  %v1698_v5 = vrot.slane (!%p2027_p6), %v1689_v56, %v1697_v60 }
  0xd1   : > { %1660 = vmatprep.subr.bf16.mxu1 %v2328_v6  ;;  %v1702_v6 = vrot.slane (!%p2027_p6), %v1689_v56, %v1701_v61 }
  0xd3   : > { %1620 = vmatpush1.bf16.msra.mxu0 %v2323_v7  ;;  %v1706_v7 = vrot.slane (!%p2027_p6), %v1689_v56, %v1705_v62 }
  0xd4   : > { %1661 = vmatpush1.bf16.msra.mxu1 %v2326_v10  ;;  %1621 = vmatprep.subr.bf16.mxu0 %v2331_v11  ;;  %v1729_v10 = vrot.slane (!%p2027_p6), %v1724_v57, %v1693_v59  ;;  %v1733_v11 = vrot.slane (!%p2027_p6), %v1724_v57, %v1701_v61 }
  0xd5   : > { %1662 = vmatprep.subr.bf16.mxu1 %v2334_v12  ;;  %v1737_v12 = vrot.slane (!%p2027_p6), %v1724_v57, %v1736_v2 }
  0xd7   : > { %1622 = vmatpush1.bf16.msra.mxu0 %v2329_v13  ;;  %v1741_v13 = vrot.slane (!%p2027_p6), %v1724_v57, %v1740_v3 }
  0xd8   : > { %1663 = vmatpush1.bf16.msra.mxu1 %v2332_v14 }
  0xda   : > { %1624 = vmatmul.mubr.bf16.vlgmr.msra.gmra.mrb[8].mxu0 %v2476_v9 }
  0xdb   : > { %1665 = vmatmul.mubr.bf16.vlgmr.msra.gmra.mrb[8].mxu1 %v2555_v15 }
 0x12d   : > { %v1461_v16 = vpop.f32.mrb[0].mxu0 }
 0x12e   : > { %v1502_v17 = vpop.f32.mrb[0].mxu1  ;;  %v1463_v19 = vpop.f32.mrb[1].mxu0 }
 0x12f   : > { %v1503_v18 = vadd.f32 %v1502_v17, %v1461_v16  ;;  %v1504_v20 = vpop.f32.mrb[1].mxu1  ;;  %v1465_v22 = vpop.f32.mrb[2].mxu0 }
 0x130   : > { %v1505_v21 = vadd.f32 %v1504_v20, %v1463_v19  ;;  %v1506_v23 = vpop.f32.mrb[2].mxu1  ;;  %v1466_v8 = vpop.f32.mrb[3].mxu0  ;;  %v1749_v19 = vrot.slane (!%p2027_p6), %v1729_v10, %v1693_v59  ;;  %v1753_v20 = vrot.slane (!%p2027_p6), %v1733_v11, %v1693_v59 }
 0x131   : > { %v1507_v24 = vpop.f32.mrb[3].mxu1  ;;  %v1757_v8 = vrot.slane (!%p2027_p6), %v1737_v12, %v1693_v59 }
 0x16d   : > { %v1543_v26 = vpop.f32.mrb[4].mxu0 }
 0x16e   : > { %v1584_v27 = vpop.f32.mrb[4].mxu1  ;;  %v1544_v53 = vadd.f32 %v1543_v26, %v1503_v18  ;;  %v1545_v29 = vpop.f32.mrb[5].mxu0 }
 0x16f   : > { %v1586_v30 = vpop.f32.mrb[5].mxu1  ;;  %v1546_v9 = vadd.f32 %v1545_v29, %v1505_v21  ;;  %v1547_v31 = vpop.f32.mrb[6].mxu0 }
 0x170   : > { %v1588_v15 = vpop.f32.mrb[6].mxu1  ;;  %v1673_v32 = vadd.f32 %v1544_v53, %v247_v25  ;;  %v1548_v33 = vpop.f32.mrb[7].mxu0  ;;  %v1761_v53 = vrot.slane (!%p2027_p6), %v1741_v13, %v1693_v59 }
 0x171   : > { %v1589_v34 = vpop.f32.mrb[7].mxu1  ;;  %v1674_v35 = vadd.f32 %v1546_v9, %v248_v28 }
 0x172   : > { %1677 = vst [vmem:[#allocation2] sm:$0xff] %v1673_v32  ;;  %v2028_v34 = vld [vmem:[#allocation3] ss:$0 sm:$0xff] (!%p2027_p6) }
 0x173   : > { %1678 = vst [vmem:[#allocation2 + $0x8] sm:$0xff] %v1674_v35 }
 0x179   : > { %v1685_v58 = vld [vmem:[#allocation2] sm:$0xff] (!%p2027_p6) }
 0x17a   : > { %v1686_v63 = vld [vmem:[#allocation2 + $0x8] sm:$0xff] (!%p2027_p6)  ;;  %v1711_v14 = vadd.f32 (!%p2027_p6), %v1694_v4, %v1685_v58 }
 0x17b   : > { %v1712_v16 = vadd.f32 (!%p2027_p6), %v1698_v5, %v1686_v63 }
 0x17c   : > { %v1715_v21 = vmul.f32 (!%p2027_p6), 0.2, %v1711_v14 }
 0x17d   : > { %v1716_v22 = vmul.f32 (!%p2027_p6), 0.2, %v1712_v16 }
 0x17e   : > { %v1719_v25 = vmax.f32 (!%p2027_p6), %v1711_v14, %v1715_v21 }
 0x17f   : > { %v1720_v26 = vmax.f32 (!%p2027_p6), %v1712_v16, %v1716_v22 }
 0x180   : > { %v1762_v29 = vmul.f32 (!%p2027_p6), %v1749_v19, %v1719_v25 }
 0x1ad   : > { %v1625_v36 = vpop.f32.mrb[8].mxu0 }
 0x1ae   : > { %v1666_v37 = vpop.f32.mrb[8].mxu1  ;;  %v1626_v38 = vadd.f32 %v1625_v36, %v1584_v27  ;;  %v1627_v39 = vpop.f32.mrb[9].mxu0 }
 0x1af   : > { %v1668_v40 = vpop.f32.mrb[9].mxu1  ;;  %v1628_v42 = vadd.f32 %v1627_v39, %v1586_v30  ;;  %v1629_v43 = vpop.f32.mrb[10].mxu0  ;;  %1684 = sbr.rel (%p2027_p6) target bundleno = 601 (0x259), region = 48  ;;  %v1763_v30 = vmul.f32 (!%p2027_p6), %v1753_v20, %v1720_v26 }
 0x1b0   : > { %v1670_v44 = vpop.f32.mrb[10].mxu1  ;;  %v1667_v45 = vadd.f32 %v1666_v37, %v1626_v38  ;;  %v1630_v47 = vpop.f32.mrb[11].mxu0 }
 0x1b1   : > { %v1671_v48 = vpop.f32.mrb[11].mxu1  ;;  %v1669_v49 = vadd.f32 %v1668_v40, %v1628_v42  ;;  %v1766_v15 = vadd.f32 (!%p2027_p6), %v1763_v30, %v1762_v29 }
 0x1b2   : > { %v1675_v50 = vadd.f32 %v1667_v45, %v249_v41 }
 0x1b3   : > { %v1676_v51 = vadd.f32 %v1669_v49, %v250_v46 }
 0x1b4   : > { %1679 = vst [vmem:[#allocation2 + $0x10] sm:$0xff] %v1675_v50 }
 0x1b5   : > { %1680 = vst [vmem:[#allocation2 + $0x18] sm:$0xff] %v1676_v51 }
 0x1bb   : > { %v1687_v0 = vld [vmem:[#allocation2 + $0x10] sm:$0xff] }
 0x1bc   : > { %v1688_v1 = vld [vmem:[#allocation2 + $0x18] sm:$0xff]  ;;  %v1713_v17 = vadd.f32 %v1702_v6, %v1687_v0 }
 0x1bd   : > { %v1714_v18 = vadd.f32 %v1706_v7, %v1688_v1 }
 0x1be   : > { %v1717_v23 = vmul.f32 0.2, %v1713_v17 }
 0x1bf   : > { %v1718_v24 = vmul.f32 0.2, %v1714_v18 }
 0x1c0   : > { %v1721_v27 = vmax.f32 %v1713_v17, %v1717_v23 }
 0x1c1   : > { %v1722_v28 = vmax.f32 %v1714_v18, %v1718_v24 }
 0x1c2   : > { %v1764_v9 = vmul.f32 %v1757_v8, %v1721_v27 }
 0x1c3   : > { %v1765_v31 = vmul.f32 %v1761_v53, %v1722_v28 }
 0x1c4   : > { %v1767_v32 = vadd.f32 %v1766_v15, %v1764_v9 }
 0x1c6   : > { %v1768_v33 = vadd.f32 %v1767_v32, %v1765_v31 }
 0x1c8   : > { %1769 = vadd.xlane.f32.xlu0 %v1768_v33 }
 0x255   : > { %v1770_v35 = vpop.xlane.xlu0 %1769 }
 0x256   : > { %v1778_v36 = vadd.f32 %v2028_v34, %v1770_v35 }
 0x258   : > { %1780 = vst.msk [vmem:[%s2643_s5] sm:$0xff] %vm1779_vm0, %v1778_v36 }
 0x259 PF: > { %s17_s20 = sadd.s32 1, %s2341_s20  }
 0x25a   : > { %p14_p7 = scmp.ge.s32.totalorder %s17_s20, 5  }
 0x25c   :  { %16 = sbr.rel (!%p14_p7) target bundleno = 3 (0x3), region = 77 }

// kernel: ms_image_dis_forward.16
= control target key start
LH: loop header
LB: loop body
LE: loop exit
PB: predicated region body
PF: predicated region fallthrough
CT: control target
= control target key end

     0   :  { %vm98_vm0 = vcmask 293888   ;;  %vm123_vm1 = vcmask 1041408   ;;  %vm320_vm2 = vcmask 519168   ;;  %s591_s1 = inlined_call_operand.vmem [shape: bf16[36,64], index: 1, kind: input, shape index: {}]   ;;  %s592_s0 = inlined_call_operand.vmem [shape: bf16[128,36], index: 0, kind: input, shape index: {}]   ;;  %s593_s2 = inlined_call_operand.vmem [shape: f32[1,64], index: 2, kind: input, shape index: {}]   ;;  %s594_s3 = inlined_call_operand.vmem [shape: bf16[128,64], index: 3, kind: output, shape index: {}]  }
   0x1   :  { %v434_v0 = vld [vmem:[%s591_s1] sm:$0xff]   ;;  %v435_v1 = vld [vmem:[%s591_s1 + $0x8] sm:$0xff]   ;;  %v436_v2 = vld [vmem:[%s591_s1 + $0x10] ss:$0 sps:$4 sm:$0x33]  }
   0x2   :  { %404 = vmatprep.subr.bf16.mxu0 %v434_v0  ;;  %426 = vmatprep.subr.bf16.mxu1 %v434_v0  ;;  %v437_v3 = vld [vmem:[%s592_s0] sm:$0xff]   ;;  %v125_v5 = vsel %vm123_vm1, %v436_v2, 0  ;;  %v439_v6 = vld [vmem:[%s592_s0 + $0x8] sm:$0xff]   ;;  %v441_v8 = vld [vmem:[%s592_s0 + $0x10] sm:$0xff]  }
   0x3   :  { %405 = vmatpush3.bf16.msra.mxu0 %v434_v0  ;;  %429 = vmatpush3.bf16.msra.mxu1 %v434_v0  ;;  %v438_v4 = vld [vmem:[%s592_s0 + $0x20] sm:$0xff]   ;;  %v440_v7 = vld [vmem:[%s592_s0 + $0x28] sm:$0xff]   ;;  %v442_v9 = vld [vmem:[%s592_s0 + $0x30] sm:$0xff]  }
   0x4   :  { %406 = vmatprep.subr.bf16.mxu0 %v435_v1  ;;  %427 = vmatprep.subr.bf16.mxu1 %v435_v1  ;;  %v443_v10 = vld [vmem:[%s592_s0 + $0x18] sm:$0xff]   ;;  %v509_v12 = vld [vmem:[%s593_s2] ss:$0 sm:$0xff] }
   0x5   :  { %410 = vmatprep.mubr.msk.bf16.mxu0 %vm98_vm0, %v437_v3  ;;  %418 = vmatprep.mubr.msk.bf16.mxu1 %vm98_vm0, %v438_v4  ;;  %v444_v11 = vld [vmem:[%s592_s0 + $0x38] sm:$0xff]  }
   0x7   :  { %407 = vmatpush3.bf16.msra.mxu0 %v435_v1  ;;  %430 = vmatpush3.bf16.msra.mxu1 %v435_v1 }
   0x8   :  { %432 = vmatprep.subr.msk.bf16.mxu0 %vm123_vm1, %v436_v2  ;;  %433 = vmatprep.subr.msk.bf16.mxu1 %vm123_vm1, %v436_v2 }
   0xb   :  { %409 = vmatpush3.bf16.msra.mxu0 %v125_v5  ;;  %431 = vmatpush3.bf16.msra.mxu1 %v125_v5 }
   0xe   :  { %411 = vmatmul.mubr.msk.bf16.vlgmr.msra.gmra.mrb[0].mxu0 %vm98_vm0, %v439_v6  ;;  %419 = vmatmul.mubr.msk.bf16.vlgmr.msra.gmra.mrb[0].mxu1 %vm98_vm0, %v440_v7 }
   0xf   :  { %414 = vmatprep.mubr.msk.bf16.mxu0 %vm98_vm0, %v441_v8  ;;  %422 = vmatprep.mubr.msk.bf16.mxu1 %vm98_vm0, %v442_v9 }
  0x16   :  { %415 = vmatmul.mubr.msk.bf16.gmra.mrb[4].mxu0 %vm98_vm0, %v443_v10  ;;  %423 = vmatmul.mubr.msk.bf16.gmra.mrb[4].mxu1 %vm98_vm0, %v444_v11 }
  0xe1   :  { %v412_v13 = vpop.f32.mrb[0].mxu0  ;;  %v420_v14 = vpop.f32.mrb[0].mxu1 }
  0xe2   :  { %v170_v15 = vadd.f32 %v412_v13, %v509_v12  ;;  %v202_v16 = vadd.f32 %v420_v14, %v509_v12  ;;  %v161_v17 = vpop.f32.mrb[1].mxu0  ;;  %v193_v18 = vpop.f32.mrb[1].mxu1 }
  0xe3   :  { %v162_v19 = vadd.f32 %v509_v12, %v161_v17  ;;  %v194_v20 = vadd.f32 %v509_v12, %v193_v18  ;;  %v413_v21 = vpop.f32.mrb[2].mxu0  ;;  %v421_v22 = vpop.f32.mrb[2].mxu1 }
  0xe4   :  { %v226_v23 = vmul.f32 0.2, %v170_v15  ;;  %v234_v24 = vmul.f32 0.2, %v202_v16  ;;  %v173_v25 = vadd.f32 %v413_v21, %v509_v12  ;;  %v205_v26 = vadd.f32 %v421_v22, %v509_v12  ;;  %v164_v27 = vpop.f32.mrb[3].mxu0  ;;  %v196_v28 = vpop.f32.mrb[3].mxu1 }
  0xe5   :  { %v224_v29 = vmul.f32 0.2, %v162_v19  ;;  %v232_v30 = vmul.f32 0.2, %v194_v20  ;;  %v165_v31 = vadd.f32 %v509_v12, %v164_v27  ;;  %v197_v32 = vadd.f32 %v509_v12, %v196_v28 }
  0xe6   :  { %v242_v33 = vmax.f32 %v170_v15, %v226_v23  ;;  %v250_v34 = vmax.f32 %v202_v16, %v234_v24  ;;  %v227_v35 = vmul.f32 0.2, %v173_v25  ;;  %v235_v36 = vmul.f32 0.2, %v205_v26 }
  0xe7   :  { %v240_v37 = vmax.f32 %v162_v19, %v224_v29  ;;  %v248_v38 = vmax.f32 %v194_v20, %v232_v30  ;;  %v225_v39 = vmul.f32 0.2, %v165_v31  ;;  %v233_v40 = vmul.f32 0.2, %v197_v32 }
  0xe8   :  { %v379_v41 = vpack.c.bf16 %v242_v33, %v242_v33  ;;  %v387_v42 = vpack.c.bf16 %v250_v34, %v250_v34  ;;  %v243_v43 = vmax.f32 %v173_v25, %v227_v35  ;;  %v251_v44 = vmax.f32 %v205_v26, %v235_v36 }
  0xe9   :  { %v377_v45 = vpack.c.bf16 %v240_v37, %v240_v37  ;;  %v385_v46 = vpack.c.bf16 %v248_v38, %v248_v38  ;;  %v241_v47 = vmax.f32 %v165_v31, %v225_v39  ;;  %v249_v48 = vmax.f32 %v197_v32, %v233_v40  ;;  %v416_v49 = vpop.f32.mrb[4].mxu0  ;;  %v424_v50 = vpop.f32.mrb[4].mxu1 }
  0xea   :  { %323 = vst.msk [vmem:[%s594_s3 + $0x8] sm:$0xf] %vm320_vm2, %v379_v41  ;;  %331 = vst.msk [vmem:[%s594_s3 + $0x28] sm:$0xf] %vm320_vm2, %v387_v42  ;;  %v380_v51 = vpack.c.bf16 %v243_v43, %v243_v43  ;;  %v388_v52 = vpack.c.bf16 %v251_v44, %v251_v44  ;;  %v186_v53 = vadd.f32 %v416_v49, %v509_v12  ;;  %v177_v55 = vpop.f32.mrb[5].mxu0  ;;  %v209_v56 = vpop.f32.mrb[5].mxu1 }
  0xeb   :  { %v218_v54 = vadd.f32 %v424_v50, %v509_v12  ;;  %321 = vst.msk [vmem:[%s594_s3] sm:$0xf] %vm320_vm2, %v377_v45  ;;  %329 = vst.msk [vmem:[%s594_s3 + $0x20] sm:$0xf] %vm320_vm2, %v385_v46  ;;  %v378_v57 = vpack.c.bf16 %v241_v47, %v241_v47  ;;  %v386_v58 = vpack.c.bf16 %v249_v48, %v249_v48  ;;  %v417_v61 = vpop.f32.mrb[6].mxu0  ;;  %v425_v62 = vpop.f32.mrb[6].mxu1 }
  0xec   :  { %v178_v59 = vadd.f32 %v509_v12, %v177_v55  ;;  %v210_v60 = vadd.f32 %v509_v12, %v209_v56  ;;  %324 = vst.msk [vmem:[%s594_s3 + $0xc] sm:$0xf] %vm320_vm2, %v380_v51  ;;  %332 = vst.msk [vmem:[%s594_s3 + $0x2c] sm:$0xf] %vm320_vm2, %v388_v52  ;;  %v230_v63 = vmul.f32 0.2, %v186_v53  ;;  %v189_v1 = vadd.f32 %v417_v61, %v509_v12 }
  0xed   :  { %v238_v0 = vmul.f32 0.2, %v218_v54  ;;  %v221_v2 = vadd.f32 %v425_v62, %v509_v12  ;;  %v180_v3 = vpop.f32.mrb[7].mxu0  ;;  %v212_v4 = vpop.f32.mrb[7].mxu1  ;;  %322 = vst.msk [vmem:[%s594_s3 + $0x4] sm:$0xf] %vm320_vm2, %v378_v57 }
  0xee   :  { %330 = vst.msk [vmem:[%s594_s3 + $0x24] sm:$0xf] %vm320_vm2, %v386_v58  ;;  %v228_v5 = vmul.f32 0.2, %v178_v59  ;;  %v236_v6 = vmul.f32 0.2, %v210_v60  ;;  %v181_v7 = vadd.f32 %v509_v12, %v180_v3  ;;  %v213_v8 = vadd.f32 %v509_v12, %v212_v4 }
  0xef   :  { %v246_v9 = vmax.f32 %v186_v53, %v230_v63  ;;  %v254_v10 = vmax.f32 %v218_v54, %v238_v0  ;;  %v231_v11 = vmul.f32 0.2, %v189_v1  ;;  %v239_v13 = vmul.f32 0.2, %v221_v2 }
  0xf0   :  { %v244_v14 = vmax.f32 %v178_v59, %v228_v5  ;;  %v252_v15 = vmax.f32 %v210_v60, %v236_v6  ;;  %v229_v16 = vmul.f32 0.2, %v181_v7  ;;  %v237_v17 = vmul.f32 0.2, %v213_v8 }
  0xf1   :  { %v383_v18 = vpack.c.bf16 %v246_v9, %v246_v9  ;;  %v391_v19 = vpack.c.bf16 %v254_v10, %v254_v10  ;;  %v247_v20 = vmax.f32 %v189_v1, %v231_v11  ;;  %v255_v21 = vmax.f32 %v221_v2, %v239_v13 }
  0xf2   :  { %v381_v22 = vpack.c.bf16 %v244_v14, %v244_v14  ;;  %v389_v23 = vpack.c.bf16 %v252_v15, %v252_v15  ;;  %v245_v24 = vmax.f32 %v181_v7, %v229_v16  ;;  %v253_v25 = vmax.f32 %v213_v8, %v237_v17 }
  0xf3   :  { %327 = vst.msk [vmem:[%s594_s3 + $0x18] sm:$0xf] %vm320_vm2, %v383_v18  ;;  %335 = vst.msk [vmem:[%s594_s3 + $0x38] sm:$0xf] %vm320_vm2, %v391_v19  ;;  %v384_v12 = vpack.c.bf16 %v247_v20, %v247_v20  ;;  %v392_v26 = vpack.c.bf16 %v255_v21, %v255_v21 }
  0xf4   :  { %325 = vst.msk [vmem:[%s594_s3 + $0x10] sm:$0xf] %vm320_vm2, %v381_v22  ;;  %333 = vst.msk [vmem:[%s594_s3 + $0x30] sm:$0xf] %vm320_vm2, %v389_v23  ;;  %v382_v27 = vpack.c.bf16 %v245_v24, %v245_v24  ;;  %v390_v28 = vpack.c.bf16 %v253_v25, %v253_v25 }
  0xf5   :  { %328 = vst.msk [vmem:[%s594_s3 + $0x1c] sm:$0xf] %vm320_vm2, %v384_v12  ;;  %336 = vst.msk [vmem:[%s594_s3 + $0x3c] sm:$0xf] %vm320_vm2, %v392_v26 }
  0xf6   :  { %326 = vst.msk [vmem:[%s594_s3 + $0x14] sm:$0xf] %vm320_vm2, %v382_v27  ;;  %334 = vst.msk [vmem:[%s594_s3 + $0x34] sm:$0xf] %vm320_vm2, %v390_v28 }

// kernel: ms_image_dis_forward.17
= control target key start
LH: loop header
LB: loop body
LE: loop exit
PB: predicated region body
PF: predicated region fallthrough
CT: control target
= control target key end

     0   :  { %vm372_vm0 = vcmask 523264   ;;  %s917_s1 = inlined_call_operand.vmem [shape: bf16[576,128], index: 1, kind: input, shape index: {}]   ;;  %s918_s0 = inlined_call_operand.vmem [shape: bf16[32,576], index: 0, kind: input, shape index: {}]   ;;  %s919_s2 = inlined_call_operand.vmem [shape: f32[1,128], index: 2, kind: input, shape index: {}]   ;;  %s920_s3 = inlined_call_operand.vmem [shape: bf16[32,128], index: 3, kind: output, shape index: {}]  }
   0x1   :  { %v700_v0 = vld [vmem:[%s917_s1 + $0x40] sm:$0xff]   ;;  %v704_v4 = vld [vmem:[%s917_s1 + $0x48] sm:$0xff]   ;;  %v708_v8 = vld [vmem:[%s917_s1 + $0x50] sm:$0xff]  }
   0x2   :  { %v701_v1 = vld [vmem:[%s917_s1] sm:$0xff]   ;;  %626 = vmatprep.subr.bf16.mxu0 %v700_v0  ;;  %v705_v5 = vld [vmem:[%s917_s1 + $0x8] sm:$0xff]   ;;  %v709_v9 = vld [vmem:[%s917_s1 + $0x10] sm:$0xff]  }
   0x3   :  { %v702_v2 = vld [vmem:[%s917_s1 + $0xc0] sm:$0xff]   ;;  %627 = vmatpush3.bf16.msra.mxu0 %v701_v1  ;;  %v706_v6 = vld [vmem:[%s917_s1 + $0xc8] sm:$0xff]   ;;  %v710_v10 = vld [vmem:[%s917_s1 + $0xd0] sm:$0xff]  }
   0x4   :  { %v703_v3 = vld [vmem:[%s917_s1 + $0x80] sm:$0xff]   ;;  %654 = vmatprep.subr.bf16.mxu1 %v702_v2  ;;  %628 = vmatprep.subr.bf16.mxu0 %v704_v4  ;;  %v707_v7 = vld [vmem:[%s917_s1 + $0x88] sm:$0xff]   ;;  %v711_v11 = vld [vmem:[%s917_s1 + $0x90] sm:$0xff]  }
   0x5   :  { %655 = vmatpush3.bf16.msra.mxu1 %v703_v3  ;;  %v712_v12 = vld [vmem:[%s917_s1 + $0x58] sm:$0xff]   ;;  %v716_v16 = vld [vmem:[%s917_s1 + $0x60] sm:$0xff]   ;;  %v720_v20 = vld [vmem:[%s917_s1 + $0x68] sm:$0xff]  }
   0x6   :  { %656 = vmatprep.subr.bf16.mxu1 %v706_v6  ;;  %v713_v13 = vld [vmem:[%s917_s1 + $0x18] sm:$0xff]   ;;  %v717_v17 = vld [vmem:[%s917_s1 + $0x20] sm:$0xff]   ;;  %v721_v21 = vld [vmem:[%s917_s1 + $0x28] sm:$0xff]  }
   0x7   :  { %629 = vmatpush3.bf16.msra.mxu0 %v705_v5  ;;  %v714_v14 = vld [vmem:[%s917_s1 + $0xd8] sm:$0xff]   ;;  %v718_v18 = vld [vmem:[%s917_s1 + $0xe0] sm:$0xff]   ;;  %v722_v22 = vld [vmem:[%s917_s1 + $0xe8] sm:$0xff]  }
   0x8   :  { %630 = vmatprep.subr.bf16.mxu0 %v708_v8  ;;  %v715_v15 = vld [vmem:[%s917_s1 + $0x98] sm:$0xff]   ;;  %v719_v19 = vld [vmem:[%s917_s1 + $0xa0] sm:$0xff]   ;;  %v723_v23 = vld [vmem:[%s917_s1 + $0xa8] sm:$0xff]  }
   0x9   :  { %657 = vmatpush3.bf16.msra.mxu1 %v707_v7  ;;  %v724_v24 = vld [vmem:[%s917_s1 + $0x70] sm:$0xff]   ;;  %v728_v28 = vld [vmem:[%s917_s1 + $0x78] sm:$0xff]   ;;  %v735_v34 = vld [vmem:[%s917_s1 + $0x100] sm:$0xff]  }
   0xa   :  { %658 = vmatprep.subr.bf16.mxu1 %v710_v10  ;;  %v725_v25 = vld [vmem:[%s917_s1 + $0x30] sm:$0xff]   ;;  %v729_v29 = vld [vmem:[%s917_s1 + $0x38] sm:$0xff]   ;;  %v738_v36 = vld [vmem:[%s918_s0 + $0xc] ss:$20 sps:$4 sm:$0xff]  }
   0xb   :  { %631 = vmatpush3.bf16.msra.mxu0 %v709_v9  ;;  %v726_v26 = vld [vmem:[%s917_s1 + $0xf0] sm:$0xff]   ;;  %v730_v30 = vld [vmem:[%s917_s1 + $0xf8] sm:$0xff]   ;;  %v739_v37 = vld [vmem:[%s917_s1 + $0x108] sm:$0xff]   ;;  %460 = vmatprep.mubr.bf16.mxu1 %v738_v36 }
   0xc   :  { %632 = vmatprep.subr.bf16.mxu0 %v712_v12  ;;  %v727_v27 = vld [vmem:[%s917_s1 + $0xb0] sm:$0xff]   ;;  %v733_v32 = vld [vmem:[%s918_s0 + $0x4] ss:$20 sps:$4 sm:$0xff]   ;;  %v736_v35 = vld [vmem:[%s918_s0 + $0x8] ss:$20 sps:$4 sm:$0xff]  }
   0xd   :  { %659 = vmatpush3.bf16.msra.mxu1 %v711_v11  ;;  %v731_v31 = vld [vmem:[%s918_s0] ss:$20 sps:$4 sm:$0xff]   ;;  %v734_v33 = vld [vmem:[%s917_s1 + $0xb8] sm:$0xff]   ;;  %411 = vmatprep.mubr.bf16.mxu0 %v733_v32  ;;  %v746_v42 = vld [vmem:[%s918_s0 + $0x30] ss:$20 sps:$4 sm:$0xff]  }
   0xe   :  { %660 = vmatprep.subr.bf16.mxu1 %v714_v14  ;;  %v740_v38 = vld [vmem:[%s918_s0 + $0x2c] ss:$20 sps:$4 sm:$0xff]   ;;  %v742_v39 = vld [vmem:[%s918_s0 + $0x28] ss:$20 sps:$4 sm:$0xff]   ;;  %v743_v40 = vld [vmem:[%s917_s1 + $0x110] sm:$0xff]  }
   0xf   :  { %633 = vmatpush3.bf16.msra.mxu0 %v713_v13  ;;  %v744_v41 = vld [vmem:[%s918_s0 + $0x34] ss:$20 sps:$4 sm:$0xff]   ;;  %v747_v43 = vld [vmem:[%s917_s1 + $0x118] sm:$0xff]   ;;  %v748_v44 = vld [vmem:[%s918_s0 + $0x10] ss:$20 sps:$4 sm:$0xff]  }
  0x10   :  { %634 = vmatprep.subr.bf16.mxu0 %v716_v16  ;;  %v749_v45 = vld [vmem:[%s918_s0 + $0x38] ss:$20 sps:$4 sm:$0xff]   ;;  %v558_v47 = vld [vmem:[%s919_s2] ss:$0 sm:$0xff] }
  0x11   :  { %661 = vmatpush3.bf16.msra.mxu1 %v715_v15 }
  0x12   :  { %662 = vmatprep.subr.bf16.mxu1 %v718_v18 }
  0x13   :  { %635 = vmatpush3.bf16.msra.mxu0 %v717_v17 }
  0x14   :  { %636 = vmatprep.subr.bf16.mxu0 %v720_v20 }
  0x15   :  { %663 = vmatpush3.bf16.msra.mxu1 %v719_v19 }
  0x16   :  { %664 = vmatprep.subr.bf16.mxu1 %v722_v22 }
  0x17   :  { %637 = vmatpush3.bf16.msra.mxu0 %v721_v21 }
  0x18   :  { %638 = vmatprep.subr.bf16.mxu0 %v724_v24 }
  0x19   :  { %665 = vmatpush3.bf16.msra.mxu1 %v723_v23 }
  0x1a   :  { %666 = vmatprep.subr.bf16.mxu1 %v726_v26 }
  0x1b   :  { %639 = vmatpush3.bf16.msra.mxu0 %v725_v25 }
  0x1c   :  { %640 = vmatprep.subr.bf16.mxu0 %v728_v28 }
  0x1d   :  { %667 = vmatpush3.bf16.msra.mxu1 %v727_v27 }
  0x1e   :  { %668 = vmatprep.subr.bf16.mxu1 %v730_v30 }
  0x1f   :  { %641 = vmatpush3.bf16.msra.mxu0 %v729_v29 }
  0x20   :  { %688 = vmatprep.subr.bf16.mxu0 %v735_v34 }
  0x21   :  { %669 = vmatpush3.bf16.msra.mxu1 %v734_v33 }
  0x22   :  { %412 = vmatmul.mubr.bf16.vlgmr.msra.gmra.mrb[0].mxu0 %v731_v31 }
  0x23   :  { %689 = vmatpush3.bf16.msra.mxu0 %v735_v34  ;;  %419 = vmatprep.mubr.bf16.mxu0 %v740_v38 }
  0x24   :  { %461 = vmatmul.mubr.bf16.vlgmr.msra.gmra.mrb[0].mxu1 %v736_v35  ;;  %690 = vmatprep.subr.bf16.mxu0 %v739_v37 }
  0x25   :  { %468 = vmatprep.mubr.bf16.mxu1 %v744_v41 }
  0x27   :  { %691 = vmatpush3.bf16.msra.mxu0 %v739_v37 }
  0x28   :  { %692 = vmatprep.subr.bf16.mxu0 %v743_v40 }
  0x2a   :  { %420 = vmatmul.mubr.bf16.gmra.mrb[4].mxu0 %v742_v39 }
  0x2b   :  { %696 = vmatprep.mubr.msk.bf16.mxu0 %vm372_vm0, %v748_v44  ;;  %693 = vmatpush3.bf16.msra.mxu0 %v743_v40 }
  0x2c   :  { %469 = vmatmul.mubr.bf16.gmra.mrb[4].mxu1 %v746_v42  ;;  %694 = vmatprep.subr.bf16.mxu0 %v747_v43 }
  0x2f   :  { %695 = vmatpush3.bf16.msra.mxu0 %v747_v43 }
  0x32   :  { %697 = vmatmul.mubr.msk.bf16.vlgmr.msra.gmra.mrb[8].mxu0 %vm372_vm0, %v749_v45 }
  0xf5   :  { %v642_v46 = vpop.f32.mrb[0].mxu0 }
  0xf6   :  { %v643_v48 = vpop.f32.mrb[1].mxu0 }
  0xf7   :  { %v644_v49 = vadd.f32 %v643_v48, %v642_v46  ;;  %v645_v50 = vpop.f32.mrb[2].mxu0  ;;  %v670_v51 = vpop.f32.mrb[0].mxu1 }
  0xf8   :  { %v646_v52 = vpop.f32.mrb[3].mxu0  ;;  %v671_v55 = vpop.f32.mrb[1].mxu1 }
  0xf9   :  { %v414_v53 = vadd.f32 %v644_v49, %v558_v47  ;;  %v647_v54 = vadd.f32 %v646_v52, %v645_v50  ;;  %v672_v56 = vadd.f32 %v671_v55, %v670_v51  ;;  %v673_v57 = vpop.f32.mrb[2].mxu1 }
  0xfa   :  { %v674_v59 = vpop.f32.mrb[3].mxu1 }
  0xfb   :  { %v417_v58 = vadd.f32 %v647_v54, %v558_v47  ;;  %v675_v60 = vadd.f32 %v674_v59, %v673_v57  ;;  %v463_v61 = vadd.f32 %v672_v56, %v414_v53 }
  0xfd   :  { %v648_v62 = vpop.f32.mrb[4].mxu0  ;;  %v466_v0 = vadd.f32 %v675_v60, %v417_v58 }
  0xfe   :  { %v649_v63 = vpop.f32.mrb[5].mxu0 }
  0xff   :  { %v650_v1 = vadd.f32 %v649_v63, %v648_v62  ;;  %v651_v2 = vpop.f32.mrb[6].mxu0  ;;  %v676_v3 = vpop.f32.mrb[4].mxu1 }
 0x100   :  { %v652_v4 = vpop.f32.mrb[7].mxu0  ;;  %v677_v7 = vpop.f32.mrb[5].mxu1 }
 0x101   :  { %v422_v5 = vadd.f32 %v650_v1, %v558_v47  ;;  %v653_v6 = vadd.f32 %v652_v4, %v651_v2  ;;  %v678_v8 = vadd.f32 %v677_v7, %v676_v3  ;;  %v679_v9 = vpop.f32.mrb[6].mxu1 }
 0x102   :  { %v680_v11 = vpop.f32.mrb[7].mxu1 }
 0x103   :  { %v425_v10 = vadd.f32 %v653_v6, %v558_v47  ;;  %v681_v12 = vadd.f32 %v680_v11, %v679_v9  ;;  %v471_v13 = vadd.f32 %v678_v8, %v422_v5 }
 0x105   :  { %v698_v14 = vpop.f32.mrb[8].mxu0  ;;  %v474_v15 = vadd.f32 %v681_v12, %v425_v10 }
 0x106   :  { %v520_v16 = vadd.f32 %v698_v14, %v471_v13  ;;  %v511_v17 = vpop.f32.mrb[9].mxu0 }
 0x107   :  { %v512_v18 = vadd.f32 %v511_v17, %v463_v61  ;;  %v699_v19 = vpop.f32.mrb[10].mxu0 }
 0x108   :  { %v528_v20 = vmul.f32 0.2, %v520_v16  ;;  %v523_v21 = vadd.f32 %v699_v19, %v474_v15  ;;  %v514_v22 = vpop.f32.mrb[11].mxu0 }
 0x109   :  { %v526_v23 = vmul.f32 0.2, %v512_v18  ;;  %v515_v24 = vadd.f32 %v514_v22, %v466_v0 }
 0x10a   :  { %v529_v25 = vmul.f32 0.2, %v523_v21  ;;  %v532_v27 = vmax.f32 %v520_v16, %v528_v20 }
 0x10b   :  { %v527_v26 = vmul.f32 0.2, %v515_v24  ;;  %v530_v29 = vmax.f32 %v512_v18, %v526_v23 }
 0x10c   :  { %v533_v28 = vmax.f32 %v523_v21, %v529_v25 }
 0x10d   :  { %v531_v30 = vmax.f32 %v515_v24, %v527_v26 }
 0x10e   :  { %v623_v31 = vpack.c.bf16 %v533_v28, %v532_v27 }
 0x10f   :  { %v618_v32 = vpack.c.bf16 %v531_v30, %v530_v29 }
 0x110   :  { %625 = vst [vmem:[%s920_s3 + $0x8] sm:$0xff] %v623_v31  }
 0x111   :  { %619 = vst [vmem:[%s920_s3] sm:$0xff] %v618_v32  }

// kernel: ms_image_dis_forward.18
= control target key start
LH: loop header
LB: loop body
LE: loop exit
PB: predicated region body
PF: predicated region fallthrough
CT: control target
= control target key end

     0   :  { %s2033_s1 = inlined_call_operand.vmem [shape: bf16[1152,256], index: 1, kind: input, shape index: {}]   ;;  %s2034_s0 = inlined_call_operand.vmem [shape: bf16[8,1152], index: 0, kind: input, shape index: {}]   ;;  %s2035_s2 = inlined_call_operand.vmem [shape: f32[1,256], index: 2, kind: input, shape index: {}]   ;;  %s2036_s3 = inlined_call_operand.vmem [shape: bf16[8,256], index: 3, kind: output, shape index: {}]  }
   0x1   :  { %v1322_v0 = vld [vmem:[%s2033_s1 + $0x4] ss:$8 sps:$4 sm:$0xff]   ;;  %v1326_v2 = vld [vmem:[%s2033_s1] ss:$8 sps:$4 sm:$0xff]   ;;  %v1328_v4 = vld [vmem:[%s2033_s1 + $0x14] ss:$8 sps:$4 sm:$0xff]  }
   0x2   :  { %v1324_v1 = vld [vmem:[%s2033_s1 + $0x204] ss:$8 sps:$4 sm:$0xff]   ;;  %928 = vmatprep.subr.bf16.mxu1 %v1322_v0  ;;  %v1327_v3 = vld [vmem:[%s2033_s1 + $0x200] ss:$8 sps:$4 sm:$0xff]   ;;  %v1330_v5 = vld [vmem:[%s2033_s1 + $0x214] ss:$8 sps:$4 sm:$0xff]  }
   0x3   :  { %1010 = vmatprep.subr.bf16.mxu0 %v1324_v1  ;;  %929 = vmatpush1.bf16.msra.mxu1 %v1326_v2  ;;  %v1332_v6 = vld [vmem:[%s2033_s1 + $0x10] ss:$8 sps:$4 sm:$0xff]   ;;  %v1334_v8 = vld [vmem:[%s2033_s1 + $0x24] ss:$8 sps:$4 sm:$0xff]   ;;  %v1338_v10 = vld [vmem:[%s2033_s1 + $0x20] ss:$8 sps:$4 sm:$0xff]  }
   0x4   :  { %1011 = vmatpush1.bf16.msra.mxu0 %v1327_v3  ;;  %930 = vmatprep.subr.bf16.mxu1 %v1328_v4  ;;  %v1333_v7 = vld [vmem:[%s2033_s1 + $0x210] ss:$8 sps:$4 sm:$0xff]   ;;  %v1336_v9 = vld [vmem:[%s2033_s1 + $0x224] ss:$8 sps:$4 sm:$0xff]   ;;  %v1339_v11 = vld [vmem:[%s2033_s1 + $0x220] ss:$8 sps:$4 sm:$0xff]  }
   0x5   :  { %1012 = vmatprep.subr.bf16.mxu0 %v1330_v5  ;;  %v1340_v12 = vld [vmem:[%s2033_s1 + $0x34] ss:$8 sps:$4 sm:$0xff]   ;;  %v1344_v14 = vld [vmem:[%s2033_s1 + $0x30] ss:$8 sps:$4 sm:$0xff]   ;;  %v1346_v16 = vld [vmem:[%s2033_s1 + $0x44] ss:$8 sps:$4 sm:$0xff]  }
   0x6   :  { %v1342_v13 = vld [vmem:[%s2033_s1 + $0x234] ss:$8 sps:$4 sm:$0xff]   ;;  %v1345_v15 = vld [vmem:[%s2033_s1 + $0x230] ss:$8 sps:$4 sm:$0xff]   ;;  %v1348_v17 = vld [vmem:[%s2033_s1 + $0x244] ss:$8 sps:$4 sm:$0xff]  }
   0x7   :  { %931 = vmatpush1.bf16.msra.mxu1 %v1332_v6  ;;  %v1350_v18 = vld [vmem:[%s2033_s1 + $0x40] ss:$8 sps:$4 sm:$0xff]   ;;  %v1352_v20 = vld [vmem:[%s2033_s1 + $0x54] ss:$8 sps:$4 sm:$0xff]   ;;  %v1356_v22 = vld [vmem:[%s2033_s1 + $0x50] ss:$8 sps:$4 sm:$0xff]  }
   0x8   :  { %1013 = vmatpush1.bf16.msra.mxu0 %v1333_v7  ;;  %932 = vmatprep.subr.bf16.mxu1 %v1334_v8  ;;  %v1351_v19 = vld [vmem:[%s2033_s1 + $0x240] ss:$8 sps:$4 sm:$0xff]   ;;  %v1354_v21 = vld [vmem:[%s2033_s1 + $0x254] ss:$8 sps:$4 sm:$0xff]   ;;  %v1357_v23 = vld [vmem:[%s2033_s1 + $0x250] ss:$8 sps:$4 sm:$0xff]  }
   0x9   :  { %1014 = vmatprep.subr.bf16.mxu0 %v1336_v9  ;;  %v1358_v24 = vld [vmem:[%s2033_s1 + $0x64] ss:$8 sps:$4 sm:$0xff]   ;;  %v1362_v26 = vld [vmem:[%s2033_s1 + $0x60] ss:$8 sps:$4 sm:$0xff]   ;;  %v1364_v28 = vld [vmem:[%s2033_s1 + $0x74] ss:$8 sps:$4 sm:$0xff]  }
   0xa   :  { %v1360_v25 = vld [vmem:[%s2033_s1 + $0x264] ss:$8 sps:$4 sm:$0xff]   ;;  %v1363_v27 = vld [vmem:[%s2033_s1 + $0x260] ss:$8 sps:$4 sm:$0xff]   ;;  %v1366_v29 = vld [vmem:[%s2033_s1 + $0x274] ss:$8 sps:$4 sm:$0xff]  }
   0xb   :  { %933 = vmatpush1.bf16.msra.mxu1 %v1338_v10  ;;  %v1368_v30 = vld [vmem:[%s2033_s1 + $0x70] ss:$8 sps:$4 sm:$0xff]   ;;  %v1370_v32 = vld [vmem:[%s2033_s1 + $0x84] ss:$8 sps:$4 sm:$0xff]   ;;  %v1374_v34 = vld [vmem:[%s2033_s1 + $0x80] ss:$8 sps:$4 sm:$0xff]  }
   0xc   :  { %1015 = vmatpush1.bf16.msra.mxu0 %v1339_v11  ;;  %934 = vmatprep.subr.bf16.mxu1 %v1340_v12  ;;  %v1369_v31 = vld [vmem:[%s2033_s1 + $0x270] ss:$8 sps:$4 sm:$0xff]   ;;  %v1372_v33 = vld [vmem:[%s2033_s1 + $0x284] ss:$8 sps:$4 sm:$0xff]   ;;  %v1375_v35 = vld [vmem:[%s2033_s1 + $0x280] ss:$8 sps:$4 sm:$0xff]  }
   0xd   :  { %1016 = vmatprep.subr.bf16.mxu0 %v1342_v13  ;;  %v1376_v36 = vld [vmem:[%s2033_s1 + $0x94] ss:$8 sps:$4 sm:$0xff]   ;;  %v1380_v38 = vld [vmem:[%s2033_s1 + $0x90] ss:$8 sps:$4 sm:$0xff]   ;;  %v1382_v40 = vld [vmem:[%s2033_s1 + $0xa4] ss:$8 sps:$4 sm:$0xff]  }
   0xe   :  { %v1378_v37 = vld [vmem:[%s2033_s1 + $0x294] ss:$8 sps:$4 sm:$0xff]   ;;  %v1381_v39 = vld [vmem:[%s2033_s1 + $0x290] ss:$8 sps:$4 sm:$0xff]   ;;  %v1384_v41 = vld [vmem:[%s2033_s1 + $0x2a4] ss:$8 sps:$4 sm:$0xff]  }
   0xf   :  { %935 = vmatpush1.bf16.msra.mxu1 %v1344_v14  ;;  %v1386_v42 = vld [vmem:[%s2033_s1 + $0xa0] ss:$8 sps:$4 sm:$0xff]   ;;  %v1388_v44 = vld [vmem:[%s2033_s1 + $0xb4] ss:$8 sps:$4 sm:$0xff]   ;;  %v1392_v47 = vld [vmem:[%s2033_s1 + $0xb0] ss:$8 sps:$4 sm:$0xff]  }
  0x10   :  { %1017 = vmatpush1.bf16.msra.mxu0 %v1345_v15  ;;  %936 = vmatprep.subr.bf16.mxu1 %v1346_v16  ;;  %v1387_v43 = vld [vmem:[%s2033_s1 + $0x2a0] ss:$8 sps:$4 sm:$0xff]   ;;  %v1390_v45 = vld [vmem:[%s2033_s1 + $0x2b4] ss:$8 sps:$4 sm:$0xff]   ;;  %v1393_v49 = vld [vmem:[%s2033_s1 + $0x2b0] ss:$8 sps:$4 sm:$0xff]  }
  0x11   :  { %1018 = vmatprep.subr.bf16.mxu0 %v1348_v17  ;;  %v15_v46 = vld [vmem:[%s2034_s0] sm:$0xff]  ;;  %v17_v50 = vld [vmem:[%s2034_s0 + $0x10] sm:$0xff] }
  0x12   :  { %v1151_v48 = vcombine.high %v15_v46, %v15_v46  ;;  %v1394_v51 = vld [vmem:[%s2033_s1 + $0xc4] ss:$8 sps:$4 sm:$0xff]   ;;  %v1155_v53 = vcombine.high %v17_v50, %v17_v50  ;;  %v1398_v54 = vld [vmem:[%s2033_s1 + $0xc0] ss:$8 sps:$4 sm:$0xff]   ;;  %v1400_v56 = vld [vmem:[%s2033_s1 + $0xd4] ss:$8 sps:$4 sm:$0xff]   ;;  %v1150_v6 = vcombine.low %v15_v46, %v15_v46  ;;  %v1154_v7 = vcombine.low %v17_v50, %v17_v50 }
  0x13   :  { %937 = vmatpush1.bf16.msra.mxu1 %v1350_v18  ;;  %v1396_v52 = vld [vmem:[%s2033_s1 + $0x2c4] ss:$8 sps:$4 sm:$0xff]   ;;  %v1399_v55 = vld [vmem:[%s2033_s1 + $0x2c0] ss:$8 sps:$4 sm:$0xff]   ;;  %v1402_v57 = vld [vmem:[%s2033_s1 + $0x2d4] ss:$8 sps:$4 sm:$0xff]  }
  0x14   :  { %1019 = vmatpush1.bf16.msra.mxu0 %v1351_v19  ;;  %938 = vmatprep.subr.bf16.mxu1 %v1352_v20  ;;  %v1404_v58 = vld [vmem:[%s2033_s1 + $0xd0] ss:$8 sps:$4 sm:$0xff]   ;;  %v1406_v60 = vld [vmem:[%s2033_s1 + $0xe4] ss:$8 sps:$4 sm:$0xff]   ;;  %v1410_v62 = vld [vmem:[%s2033_s1 + $0xe0] ss:$8 sps:$4 sm:$0xff]  }
  0x15   :  { %1020 = vmatprep.subr.bf16.mxu0 %v1354_v21  ;;  %960 = vmatprep.mubr.bf16.mxu1 %v1151_v48  ;;  %v1405_v59 = vld [vmem:[%s2033_s1 + $0x2d0] ss:$8 sps:$4 sm:$0xff]   ;;  %v1408_v61 = vld [vmem:[%s2033_s1 + $0x2e4] ss:$8 sps:$4 sm:$0xff]   ;;  %v1411_v63 = vld [vmem:[%s2033_s1 + $0x2e0] ss:$8 sps:$4 sm:$0xff]  }
  0x16   :  { %1042 = vmatprep.mubr.bf16.mxu0 %v1155_v53  ;;  %v1412_v0 = vld [vmem:[%s2033_s1 + $0xf4] ss:$8 sps:$4 sm:$0xff]   ;;  %v1416_v2 = vld [vmem:[%s2033_s1 + $0xf0] ss:$8 sps:$4 sm:$0xff]   ;;  %v1422_v4 = vld [vmem:[%s2033_s1 + $0x104] ss:$8 sps:$4 sm:$0xff]  }
  0x17   :  { %939 = vmatpush1.bf16.msra.mxu1 %v1356_v22  ;;  %v1414_v1 = vld [vmem:[%s2033_s1 + $0x2f4] ss:$8 sps:$4 sm:$0xff]   ;;  %v1417_v3 = vld [vmem:[%s2033_s1 + $0x2f0] ss:$8 sps:$4 sm:$0xff]   ;;  %v1427_v5 = vld [vmem:[%s2033_s1 + $0x304] ss:$8 sps:$4 sm:$0xff]  }
  0x18   :  { %1021 = vmatpush1.bf16.msra.mxu0 %v1357_v23  ;;  %940 = vmatprep.subr.bf16.mxu1 %v1358_v24  ;;  %v1420_v8 = vld [vmem:[%s2033_s1 + $0x100] ss:$8 sps:$4 sm:$0xff]   ;;  %v1430_v10 = vld [vmem:[%s2033_s1 + $0x114] ss:$8 sps:$4 sm:$0xff]   ;;  %v1428_v12 = vld [vmem:[%s2033_s1 + $0x110] ss:$8 sps:$4 sm:$0xff]  }
  0x19   :  { %1022 = vmatprep.subr.bf16.mxu0 %v1360_v25  ;;  %v1425_v9 = vld [vmem:[%s2033_s1 + $0x300] ss:$8 sps:$4 sm:$0xff]   ;;  %v1433_v11 = vld [vmem:[%s2033_s1 + $0x314] ss:$8 sps:$4 sm:$0xff]   ;;  %v1431_v13 = vld [vmem:[%s2033_s1 + $0x310] ss:$8 sps:$4 sm:$0xff]  }
  0x1a   :  { %v1436_v14 = vld [vmem:[%s2033_s1 + $0x124] ss:$8 sps:$4 sm:$0xff]   ;;  %v1434_v16 = vld [vmem:[%s2033_s1 + $0x120] ss:$8 sps:$4 sm:$0xff]   ;;  %v1442_v18 = vld [vmem:[%s2033_s1 + $0x134] ss:$8 sps:$4 sm:$0xff]  }
  0x1b   :  { %941 = vmatpush1.bf16.msra.mxu1 %v1362_v26  ;;  %v1439_v15 = vld [vmem:[%s2033_s1 + $0x324] ss:$8 sps:$4 sm:$0xff]   ;;  %v1437_v17 = vld [vmem:[%s2033_s1 + $0x320] ss:$8 sps:$4 sm:$0xff]   ;;  %v1445_v19 = vld [vmem:[%s2033_s1 + $0x334] ss:$8 sps:$4 sm:$0xff]  }
  0x1c   :  { %1023 = vmatpush1.bf16.msra.mxu0 %v1363_v27  ;;  %942 = vmatprep.subr.bf16.mxu1 %v1364_v28  ;;  %v1440_v20 = vld [vmem:[%s2033_s1 + $0x130] ss:$8 sps:$4 sm:$0xff]   ;;  %v1448_v22 = vld [vmem:[%s2033_s1 + $0x144] ss:$8 sps:$4 sm:$0xff]   ;;  %v1446_v24 = vld [vmem:[%s2033_s1 + $0x140] ss:$8 sps:$4 sm:$0xff]  }
  0x1d   :  { %1024 = vmatprep.subr.bf16.mxu0 %v1366_v29  ;;  %v1443_v21 = vld [vmem:[%s2033_s1 + $0x330] ss:$8 sps:$4 sm:$0xff]   ;;  %v1451_v23 = vld [vmem:[%s2033_s1 + $0x344] ss:$8 sps:$4 sm:$0xff]   ;;  %v1449_v25 = vld [vmem:[%s2033_s1 + $0x340] ss:$8 sps:$4 sm:$0xff]  }
  0x1e   :  { %v1454_v26 = vld [vmem:[%s2033_s1 + $0x154] ss:$8 sps:$4 sm:$0xff]   ;;  %v1452_v28 = vld [vmem:[%s2033_s1 + $0x150] ss:$8 sps:$4 sm:$0xff]   ;;  %v1484_v50 = vld [vmem:[%s2033_s1 + $0x1a4] ss:$8 sps:$4 sm:$0xff]  }
  0x1f   :  { %943 = vmatpush1.bf16.msra.mxu1 %v1368_v30  ;;  %v1457_v27 = vld [vmem:[%s2033_s1 + $0x354] ss:$8 sps:$4 sm:$0xff]   ;;  %v1455_v29 = vld [vmem:[%s2033_s1 + $0x350] ss:$8 sps:$4 sm:$0xff]   ;;  %v1460_v30 = vld [vmem:[%s2033_s1 + $0x164] ss:$8 sps:$4 sm:$0xff]  }
  0x20   :  { %1025 = vmatpush1.bf16.msra.mxu0 %v1369_v31  ;;  %944 = vmatprep.subr.bf16.mxu1 %v1370_v32  ;;  %v1463_v31 = vld [vmem:[%s2033_s1 + $0x364] ss:$8 sps:$4 sm:$0xff]   ;;  %v1478_v46 = vld [vmem:[%s2033_s1 + $0x194] ss:$8 sps:$4 sm:$0xff]   ;;  %v1476_v48 = vld [vmem:[%s2033_s1 + $0x190] ss:$8 sps:$4 sm:$0xff]  }
  0x21   :  { %1026 = vmatprep.subr.bf16.mxu0 %v1372_v33  ;;  %v1847_v32 = vld [vmem:[%s2034_s0 + $0x8] sm:$0xff]  ;;  %v1852_v33 = vld [vmem:[%s2034_s0 + $0x18] sm:$0xff] }
  0x22   :  { %v1485_v53 = vld [vmem:[%s2033_s1 + $0x3a0] ss:$8 sps:$4 sm:$0xff]  }
  0x23   :  { %945 = vmatpush1.bf16.msra.mxu1 %v1374_v34  ;;  %v1458_v34 = vld [vmem:[%s2033_s1 + $0x160] ss:$8 sps:$4 sm:$0xff]  }
  0x24   :  { %1027 = vmatpush1.bf16.msra.mxu0 %v1375_v35  ;;  %946 = vmatprep.subr.bf16.mxu1 %v1376_v36  ;;  %v1461_v35 = vld [vmem:[%s2033_s1 + $0x360] ss:$8 sps:$4 sm:$0xff]   ;;  %v1153_v36 = vcombine.high %v1847_v32, %v1847_v32 }
  0x25   :  { %1028 = vmatprep.subr.bf16.mxu0 %v1378_v37  ;;  %v1157_v37 = vcombine.high %v1852_v33, %v1852_v33 }
  0x27   :  { %947 = vmatpush1.bf16.msra.mxu1 %v1380_v38  ;;  %v1466_v38 = vld [vmem:[%s2033_s1 + $0x174] ss:$8 sps:$4 sm:$0xff]  }
  0x28   :  { %1029 = vmatpush1.bf16.msra.mxu0 %v1381_v39  ;;  %948 = vmatprep.subr.bf16.mxu1 %v1382_v40  ;;  %v1469_v39 = vld [vmem:[%s2033_s1 + $0x374] ss:$8 sps:$4 sm:$0xff]   ;;  %v1464_v40 = vld [vmem:[%s2033_s1 + $0x170] ss:$8 sps:$4 sm:$0xff]  }
  0x29   :  { %1030 = vmatprep.subr.bf16.mxu0 %v1384_v41  ;;  %v1467_v41 = vld [vmem:[%s2033_s1 + $0x370] ss:$8 sps:$4 sm:$0xff]  }
  0x2b   :  { %949 = vmatpush1.bf16.msra.mxu1 %v1386_v42  ;;  %v1472_v42 = vld [vmem:[%s2033_s1 + $0x184] ss:$8 sps:$4 sm:$0xff]  }
  0x2c   :  { %1031 = vmatpush1.bf16.msra.mxu0 %v1387_v43  ;;  %950 = vmatprep.subr.bf16.mxu1 %v1388_v44  ;;  %v1475_v43 = vld [vmem:[%s2033_s1 + $0x384] ss:$8 sps:$4 sm:$0xff]   ;;  %v1470_v44 = vld [vmem:[%s2033_s1 + $0x180] ss:$8 sps:$4 sm:$0xff]  }
  0x2d   :  { %1032 = vmatprep.subr.bf16.mxu0 %v1390_v45  ;;  %v1473_v45 = vld [vmem:[%s2033_s1 + $0x380] ss:$8 sps:$4 sm:$0xff]  }
  0x2f   :  { %951 = vmatpush1.bf16.msra.mxu1 %v1392_v47  ;;  %v1481_v47 = vld [vmem:[%s2033_s1 + $0x394] ss:$8 sps:$4 sm:$0xff]  }
  0x30   :  { %1033 = vmatpush1.bf16.msra.mxu0 %v1393_v49  ;;  %952 = vmatprep.subr.bf16.mxu1 %v1394_v51  ;;  %v1479_v49 = vld [vmem:[%s2033_s1 + $0x390] ss:$8 sps:$4 sm:$0xff]   ;;  %v1487_v51 = vld [vmem:[%s2033_s1 + $0x3a4] ss:$8 sps:$4 sm:$0xff]  }
  0x31   :  { %1034 = vmatprep.subr.bf16.mxu0 %v1396_v52  ;;  %v1482_v52 = vld [vmem:[%s2033_s1 + $0x1a0] ss:$8 sps:$4 sm:$0xff]  }
  0x33   :  { %953 = vmatpush1.bf16.msra.mxu1 %v1398_v54  ;;  %v1490_v54 = vld [vmem:[%s2033_s1 + $0x1b4] ss:$8 sps:$4 sm:$0xff]  }
  0x34   :  { %1035 = vmatpush1.bf16.msra.mxu0 %v1399_v55  ;;  %954 = vmatprep.subr.bf16.mxu1 %v1400_v56  ;;  %v1493_v55 = vld [vmem:[%s2033_s1 + $0x3b4] ss:$8 sps:$4 sm:$0xff]   ;;  %v1488_v56 = vld [vmem:[%s2033_s1 + $0x1b0] ss:$8 sps:$4 sm:$0xff]  }
  0x35   :  { %1036 = vmatprep.subr.bf16.mxu0 %v1402_v57  ;;  %v1491_v57 = vld [vmem:[%s2033_s1 + $0x3b0] ss:$8 sps:$4 sm:$0xff]  }
  0x37   :  { %955 = vmatpush1.bf16.msra.mxu1 %v1404_v58  ;;  %v1496_v58 = vld [vmem:[%s2033_s1 + $0x1c4] ss:$8 sps:$4 sm:$0xff]  }
  0x38   :  { %1037 = vmatpush1.bf16.msra.mxu0 %v1405_v59  ;;  %956 = vmatprep.subr.bf16.mxu1 %v1406_v60  ;;  %v1499_v59 = vld [vmem:[%s2033_s1 + $0x3c4] ss:$8 sps:$4 sm:$0xff]   ;;  %v1494_v60 = vld [vmem:[%s2033_s1 + $0x1c0] ss:$8 sps:$4 sm:$0xff]  }
  0x39   :  { %1038 = vmatprep.subr.bf16.mxu0 %v1408_v61  ;;  %v1497_v61 = vld [vmem:[%s2033_s1 + $0x3c0] ss:$8 sps:$4 sm:$0xff]  }
  0x3b   :  { %957 = vmatpush1.bf16.msra.mxu1 %v1410_v62  ;;  %v1502_v62 = vld [vmem:[%s2033_s1 + $0x1d4] ss:$8 sps:$4 sm:$0xff]  }
  0x3c   :  { %1039 = vmatpush1.bf16.msra.mxu0 %v1411_v63  ;;  %958 = vmatprep.subr.bf16.mxu1 %v1412_v0  ;;  %v1505_v63 = vld [vmem:[%s2033_s1 + $0x3d4] ss:$8 sps:$4 sm:$0xff]   ;;  %v1500_v0 = vld [vmem:[%s2033_s1 + $0x1d0] ss:$8 sps:$4 sm:$0xff]  }
  0x3d   :  { %1040 = vmatprep.subr.bf16.mxu0 %v1414_v1  ;;  %v1503_v1 = vld [vmem:[%s2033_s1 + $0x3d0] ss:$8 sps:$4 sm:$0xff]  }
  0x3f   :  { %959 = vmatpush1.bf16.msra.mxu1 %v1416_v2  ;;  %v1508_v2 = vld [vmem:[%s2033_s1 + $0x1e4] ss:$8 sps:$4 sm:$0xff]  }
  0x40   :  { %1041 = vmatpush1.bf16.msra.mxu0 %v1417_v3  ;;  %969 = vmatprep.subr.bf16.mxu1 %v1422_v4  ;;  %v1511_v3 = vld [vmem:[%s2033_s1 + $0x3e4] ss:$8 sps:$4 sm:$0xff]   ;;  %v1506_v4 = vld [vmem:[%s2033_s1 + $0x1e0] ss:$8 sps:$4 sm:$0xff]  }
  0x41   :  { %1051 = vmatprep.subr.bf16.mxu0 %v1427_v5  ;;  %v1509_v5 = vld [vmem:[%s2033_s1 + $0x3e0] ss:$8 sps:$4 sm:$0xff]  }
  0x42   :  { %961 = vmatmul.mubr.bf16.vlgmr.msra.gmra.mrb[0].mxu1 %v1150_v6  ;;  %v1514_v6 = vld [vmem:[%s2033_s1 + $0x1f4] ss:$8 sps:$4 sm:$0xff]  }
  0x43   :  { %1043 = vmatmul.mubr.bf16.vlgmr.msra.gmra.mrb[0].mxu0 %v1154_v7  ;;  %970 = vmatpush1.bf16.msra.mxu1 %v1420_v8  ;;  %v1517_v7 = vld [vmem:[%s2033_s1 + $0x3f4] ss:$8 sps:$4 sm:$0xff]   ;;  %v1512_v8 = vld [vmem:[%s2033_s1 + $0x1f0] ss:$8 sps:$4 sm:$0xff]  }
  0x44   :  { %1052 = vmatpush1.bf16.msra.mxu0 %v1425_v9  ;;  %971 = vmatprep.subr.bf16.mxu1 %v1430_v10  ;;  %v1515_v9 = vld [vmem:[%s2033_s1 + $0x3f0] ss:$8 sps:$4 sm:$0xff]   ;;  %v1524_v10 = vld [vmem:[%s2033_s1 + $0x404] ss:$8 sps:$4 sm:$0xff]  }
  0x45   :  { %1053 = vmatprep.subr.bf16.mxu0 %v1433_v11  ;;  %1001 = vmatprep.mubr.bf16.mxu1 %v1153_v36  ;;  %v1152_v11 = vcombine.low %v1847_v32, %v1847_v32 }
  0x46   :  { %1083 = vmatprep.mubr.bf16.mxu0 %v1157_v37  ;;  %v164_v37 = vld [vmem:[%s2035_s2] sm:$0x3] }
  0x47   :  { %972 = vmatpush1.bf16.msra.mxu1 %v1428_v12  ;;  %v1156_v12 = vcombine.low %v1852_v33, %v1852_v33 }
  0x48   :  { %1054 = vmatpush1.bf16.msra.mxu0 %v1431_v13  ;;  %973 = vmatprep.subr.bf16.mxu1 %v1436_v14  ;;  %v1522_v13 = vld [vmem:[%s2033_s1 + $0x400] ss:$8 sps:$4 sm:$0xff]   ;;  %v1527_v14 = vld [vmem:[%s2033_s1 + $0x414] ss:$8 sps:$4 sm:$0xff]  }
  0x49   :  { %1055 = vmatprep.subr.bf16.mxu0 %v1439_v15  ;;  %v1525_v15 = vld [vmem:[%s2033_s1 + $0x410] ss:$8 sps:$4 sm:$0xff]  }
  0x4b   :  { %974 = vmatpush1.bf16.msra.mxu1 %v1434_v16  ;;  %v1547_v16 = vmov 0  }
  0x4c   :  { %1056 = vmatpush1.bf16.msra.mxu0 %v1437_v17  ;;  %975 = vmatprep.subr.bf16.mxu1 %v1442_v18  ;;  %v1530_v17 = vld [vmem:[%s2033_s1 + $0x424] ss:$8 sps:$4 sm:$0xff]   ;;  %v1528_v18 = vld [vmem:[%s2033_s1 + $0x420] ss:$8 sps:$4 sm:$0xff]  }
  0x4d   :  { %1057 = vmatprep.subr.bf16.mxu0 %v1445_v19  ;;  %v1533_v19 = vld [vmem:[%s2033_s1 + $0x434] ss:$8 sps:$4 sm:$0xff]  }
  0x4f   :  { %976 = vmatpush1.bf16.msra.mxu1 %v1440_v20  ;;  %v1531_v20 = vld [vmem:[%s2033_s1 + $0x430] ss:$8 sps:$4 sm:$0xff]  }
  0x50   :  { %1058 = vmatpush1.bf16.msra.mxu0 %v1443_v21  ;;  %977 = vmatprep.subr.bf16.mxu1 %v1448_v22  ;;  %v1536_v21 = vld [vmem:[%s2033_s1 + $0x444] ss:$8 sps:$4 sm:$0xff]   ;;  %v1534_v22 = vld [vmem:[%s2033_s1 + $0x440] ss:$8 sps:$4 sm:$0xff]  }
  0x51   :  { %1059 = vmatprep.subr.bf16.mxu0 %v1451_v23  ;;  %v1539_v23 = vld [vmem:[%s2033_s1 + $0x454] ss:$8 sps:$4 sm:$0xff]  }
  0x53   :  { %978 = vmatpush1.bf16.msra.mxu1 %v1446_v24  ;;  %v1537_v24 = vld [vmem:[%s2033_s1 + $0x450] ss:$8 sps:$4 sm:$0xff]  }
  0x54   :  { %1060 = vmatpush1.bf16.msra.mxu0 %v1449_v25  ;;  %979 = vmatprep.subr.bf16.mxu1 %v1454_v26  ;;  %v1542_v25 = vld [vmem:[%s2033_s1 + $0x464] ss:$8 sps:$4 sm:$0xff]   ;;  %v1540_v26 = vld [vmem:[%s2033_s1 + $0x460] ss:$8 sps:$4 sm:$0xff]  }
  0x55   :  { %1061 = vmatprep.subr.bf16.mxu0 %v1457_v27  ;;  %v1545_v27 = vld [vmem:[%s2033_s1 + $0x474] ss:$8 sps:$4 sm:$0xff]  }
  0x57   :  { %980 = vmatpush1.bf16.msra.mxu1 %v1452_v28  ;;  %v1543_v28 = vld [vmem:[%s2033_s1 + $0x470] ss:$8 sps:$4 sm:$0xff]  }
  0x58   :  { %1062 = vmatpush1.bf16.msra.mxu0 %v1455_v29  ;;  %981 = vmatprep.subr.bf16.mxu1 %v1460_v30  ;;  %v1546_v29 = vld [vmem:[%s2034_s0 + $0x20] ss:$0 sps:$4 sm:$0xff]  }
  0x59   :  { %1063 = vmatprep.subr.bf16.mxu0 %v1463_v31 }
  0x5b   :  { %982 = vmatpush1.bf16.msra.mxu1 %v1458_v34  ;;  %v166_v34 = vlaneseq }
  0x5c   :  { %1064 = vmatpush1.bf16.msra.mxu0 %v1461_v35  ;;  %983 = vmatprep.subr.bf16.mxu1 %v1466_v38 }
  0x5d   :  { %1065 = vmatprep.subr.bf16.mxu0 %v1469_v39  ;;  %v167_v35 = vshrl.u32 %v166_v34, 7 }
  0x5f   :  { %984 = vmatpush1.bf16.msra.mxu1 %v1464_v40  ;;  %v168_v36 = vsub.s32 0, %v167_v35  ;;  %v172_v38 = vsub.s32 1, %v167_v35 }
  0x60   :  { %1066 = vmatpush1.bf16.msra.mxu0 %v1467_v41  ;;  %985 = vmatprep.subr.bf16.mxu1 %v1472_v42 }
  0x61   :  { %1067 = vmatprep.subr.bf16.mxu0 %v1475_v43  ;;  %v169_v39 = vrot.slane %v164_v37, %v168_v36  ;;  %v173_v40 = vrot.slane %v164_v37, %v172_v38 }
  0x63   :  { %986 = vmatpush1.bf16.msra.mxu1 %v1470_v44 }
  0x64   :  { %1068 = vmatpush1.bf16.msra.mxu0 %v1473_v45  ;;  %987 = vmatprep.subr.bf16.mxu1 %v1478_v46 }
  0x65   :  { %1069 = vmatprep.subr.bf16.mxu0 %v1481_v47 }
  0x67   :  { %988 = vmatpush1.bf16.msra.mxu1 %v1476_v48 }
  0x68   :  { %1070 = vmatpush1.bf16.msra.mxu0 %v1479_v49  ;;  %989 = vmatprep.subr.bf16.mxu1 %v1484_v50 }
  0x69   :  { %1071 = vmatprep.subr.bf16.mxu0 %v1487_v51 }
  0x6b   :  { %990 = vmatpush1.bf16.msra.mxu1 %v1482_v52 }
  0x6c   :  { %1072 = vmatpush1.bf16.msra.mxu0 %v1485_v53  ;;  %991 = vmatprep.subr.bf16.mxu1 %v1490_v54 }
  0x6d   :  { %1073 = vmatprep.subr.bf16.mxu0 %v1493_v55 }
  0x6f   :  { %992 = vmatpush1.bf16.msra.mxu1 %v1488_v56 }
  0x70   :  { %1074 = vmatpush1.bf16.msra.mxu0 %v1491_v57  ;;  %993 = vmatprep.subr.bf16.mxu1 %v1496_v58 }
  0x71   :  { %1075 = vmatprep.subr.bf16.mxu0 %v1499_v59 }
  0x73   :  { %994 = vmatpush1.bf16.msra.mxu1 %v1494_v60 }
  0x74   :  { %1076 = vmatpush1.bf16.msra.mxu0 %v1497_v61  ;;  %995 = vmatprep.subr.bf16.mxu1 %v1502_v62 }
  0x75   :  { %1077 = vmatprep.subr.bf16.mxu0 %v1505_v63 }
  0x77   :  { %996 = vmatpush1.bf16.msra.mxu1 %v1500_v0 }
  0x78   :  { %1078 = vmatpush1.bf16.msra.mxu0 %v1503_v1  ;;  %997 = vmatprep.subr.bf16.mxu1 %v1508_v2 }
  0x79   :  { %1079 = vmatprep.subr.bf16.mxu0 %v1511_v3 }
  0x7b   :  { %998 = vmatpush1.bf16.msra.mxu1 %v1506_v4 }
  0x7c   :  { %1080 = vmatpush1.bf16.msra.mxu0 %v1509_v5  ;;  %999 = vmatprep.subr.bf16.mxu1 %v1514_v6 }
  0x7d   :  { %1081 = vmatprep.subr.bf16.mxu0 %v1517_v7 }
  0x7f   :  { %1000 = vmatpush1.bf16.msra.mxu1 %v1512_v8 }
  0x80   :  { %1082 = vmatpush1.bf16.msra.mxu0 %v1515_v9 }
  0x81   :  { %1092 = vmatprep.subr.bf16.mxu0 %v1524_v10 }
  0x82   :  { %1002 = vmatmul.mubr.bf16.vlgmr.msra.gmra.mrb[0].mxu1 %v1152_v11 }
  0x83   :  { %1084 = vmatmul.mubr.bf16.vlgmr.msra.gmra.mrb[0].mxu0 %v1156_v12 }
  0x84   :  { %1093 = vmatpush1.bf16.msra.mxu0 %v1522_v13  ;;  %1124 = vmatprep.mubr.bf16.mxu0 %v1547_v16 }
  0x85   :  { %1094 = vmatprep.subr.bf16.mxu0 %v1527_v14 }
  0x88   :  { %1095 = vmatpush1.bf16.msra.mxu0 %v1525_v15 }
  0x89   :  { %1096 = vmatprep.subr.bf16.mxu0 %v1530_v17 }
  0x8c   :  { %1097 = vmatpush1.bf16.msra.mxu0 %v1528_v18 }
  0x8d   :  { %1098 = vmatprep.subr.bf16.mxu0 %v1533_v19 }
  0x90   :  { %1099 = vmatpush1.bf16.msra.mxu0 %v1531_v20 }
  0x91   :  { %1100 = vmatprep.subr.bf16.mxu0 %v1536_v21 }
  0x94   :  { %1101 = vmatpush1.bf16.msra.mxu0 %v1534_v22 }
  0x95   :  { %1102 = vmatprep.subr.bf16.mxu0 %v1539_v23 }
  0x98   :  { %1103 = vmatpush1.bf16.msra.mxu0 %v1537_v24 }
  0x99   :  { %1104 = vmatprep.subr.bf16.mxu0 %v1542_v25 }
  0x9c   :  { %1105 = vmatpush1.bf16.msra.mxu0 %v1540_v26 }
  0x9d   :  { %1106 = vmatprep.subr.bf16.mxu0 %v1545_v27 }
  0xa0   :  { %1107 = vmatpush1.bf16.msra.mxu0 %v1543_v28 }
  0xa3   :  { %1125 = vmatmul.mubr.bf16.vlgmr.msra.gmra.mrb[0].mxu0 %v1546_v29 }
 0x155   :  { %v1003_v30 = vpop.f32.mrb[0].mxu1 }
 0x156   :  { %v1005_v31 = vpop.f32.mrb[1].mxu1  ;;  %v1305_v41 = vadd.f32 %v1003_v30, %v169_v39 }
 0x157   :  { %v1007_v32 = vpop.f32.mrb[2].mxu1  ;;  %v1307_v42 = vadd.f32 %v1005_v31, %v173_v40 }
 0x158   :  { %v1008_v33 = vpop.f32.mrb[3].mxu1 }
 0x176   :  { %v1126_v43 = vpop.f32.mrb[0].mxu0 }
 0x177   :  { %v1306_v44 = vadd.f32 %v1305_v41, %v1126_v43  ;;  %v1128_v45 = vpop.f32.mrb[1].mxu0 }
 0x178   :  { %v1308_v46 = vadd.f32 %v1307_v42, %v1128_v45  ;;  %v1130_v47 = vpop.f32.mrb[2].mxu0 }
 0x179   :  { %v1133_v48 = vmul.f32 0.2, %v1306_v44  ;;  %v1131_v49 = vpop.f32.mrb[3].mxu0 }
 0x17a   :  { %v1134_v50 = vmul.f32 0.2, %v1308_v46 }
 0x17b   :  { %v1135_v51 = vmax.f32 %v1306_v44, %v1133_v48 }
 0x17c   :  { %v1136_v52 = vmax.f32 %v1308_v46, %v1134_v50 }
 0x17e   :  { %v1304_v53 = vpack.c.bf16 %v1136_v52, %v1135_v51 }
 0x180   :  { %1145 = vst [vmem:[%s2036_s3] sm:$0xff] %v1304_v53 }

// kernel: ms_image_dis_forward.20
= control target key start
LH: loop header
LB: loop body
LE: loop exit
PB: predicated region body
PF: predicated region fallthrough
CT: control target
= control target key end

     0   :  { %vm56_vm0 = vcmask 293888   ;;  %vm63_vm1 = vcmask 1041408   ;;  %vm140_vm2 = vcmask 519168   ;;  %s236_s1 = inlined_call_operand.vmem [shape: bf16[36,64], index: 1, kind: input, shape index: {}]   ;;  %s237_s0 = inlined_call_operand.vmem [shape: bf16[32,36], index: 0, kind: input, shape index: {}]   ;;  %s238_s2 = inlined_call_operand.vmem [shape: f32[1,64], index: 2, kind: input, shape index: {}]   ;;  %s239_s3 = inlined_call_operand.vmem [shape: bf16[32,64], index: 3, kind: output, shape index: {}]  }
   0x1   :  { %v181_v0 = vld [vmem:[%s236_s1] sm:$0xff]   ;;  %v182_v1 = vld [vmem:[%s236_s1 + $0x8] sm:$0xff]   ;;  %v183_v3 = vld [vmem:[%s236_s1 + $0x10] ss:$0 sps:$4 sm:$0x33]  }
   0x2   :  { %170 = vmatprep.subr.bf16.mxu0 %v181_v0  ;;  %v184_v2 = vld [vmem:[%s237_s0] sm:$0xff]   ;;  %v65_v4 = vsel %vm63_vm1, %v183_v3, 0  ;;  %v185_v5 = vld [vmem:[%s237_s0 + $0x8] sm:$0xff]  }
   0x3   :  { %171 = vmatpush3.bf16.msra.mxu0 %v181_v0  ;;  %176 = vmatprep.mubr.msk.bf16.mxu0 %vm56_vm0, %v184_v2  ;;  %v149_v6 = vld [vmem:[%s238_s2] ss:$0 sm:$0xff] }
   0x4   :  { %172 = vmatprep.subr.bf16.mxu0 %v182_v1 }
   0x7   :  { %173 = vmatpush3.bf16.msra.mxu0 %v182_v1 }
   0x8   :  { %180 = vmatprep.subr.msk.bf16.mxu0 %vm63_vm1, %v183_v3 }
   0xb   :  { %175 = vmatpush3.bf16.msra.mxu0 %v65_v4 }
   0xe   :  { %177 = vmatmul.mubr.msk.bf16.vlgmr.msra.gmra.mrb[0].mxu0 %vm56_vm0, %v185_v5 }
  0xe1   :  { %v178_v7 = vpop.f32.mrb[0].mxu0 }
  0xe2   :  { %v110_v8 = vadd.f32 %v178_v7, %v149_v6  ;;  %v101_v9 = vpop.f32.mrb[1].mxu0 }
  0xe3   :  { %v102_v10 = vadd.f32 %v149_v6, %v101_v9  ;;  %v179_v11 = vpop.f32.mrb[2].mxu0 }
  0xe4   :  { %v118_v12 = vmul.f32 0.2, %v110_v8  ;;  %v113_v13 = vadd.f32 %v179_v11, %v149_v6  ;;  %v104_v14 = vpop.f32.mrb[3].mxu0 }
  0xe5   :  { %v116_v15 = vmul.f32 0.2, %v102_v10  ;;  %v105_v16 = vadd.f32 %v149_v6, %v104_v14 }
  0xe6   :  { %v122_v17 = vmax.f32 %v110_v8, %v118_v12  ;;  %v119_v18 = vmul.f32 0.2, %v113_v13 }
  0xe7   :  { %v120_v19 = vmax.f32 %v102_v10, %v116_v15  ;;  %v117_v20 = vmul.f32 0.2, %v105_v16 }
  0xe8   :  { %v163_v21 = vpack.c.bf16 %v122_v17, %v122_v17  ;;  %v123_v22 = vmax.f32 %v113_v13, %v119_v18 }
  0xe9   :  { %v161_v23 = vpack.c.bf16 %v120_v19, %v120_v19  ;;  %v121_v24 = vmax.f32 %v105_v16, %v117_v20 }
  0xea   :  { %143 = vst.msk [vmem:[%s239_s3 + $0x8] sm:$0xf] %vm140_vm2, %v163_v21  ;;  %v164_v25 = vpack.c.bf16 %v123_v22, %v123_v22 }
  0xeb   :  { %141 = vst.msk [vmem:[%s239_s3] sm:$0xf] %vm140_vm2, %v161_v23  ;;  %v162_v26 = vpack.c.bf16 %v121_v24, %v121_v24 }
  0xec   :  { %144 = vst.msk [vmem:[%s239_s3 + $0xc] sm:$0xf] %vm140_vm2, %v164_v25 }
  0xed   :  { %142 = vst.msk [vmem:[%s239_s3 + $0x4] sm:$0xf] %vm140_vm2, %v162_v26 }

// kernel: ms_image_dis_forward.21
= control target key start
LH: loop header
LB: loop body
LE: loop exit
PB: predicated region body
PF: predicated region fallthrough
CT: control target
= control target key end

     0   :  { %v609_v35 = vmov 0.0   ;;  %vm610_vm0 = vmmov 0   ;;  %vm330_vm1 = vcmask 523264   ;;  %s754_s1 = inlined_call_operand.vmem [shape: bf16[576,128], index: 1, kind: input, shape index: {}]   ;;  %s755_s0 = inlined_call_operand.vmem [shape: bf16[8,576], index: 0, kind: input, shape index: {}]   ;;  %s756_s2 = inlined_call_operand.vmem [shape: f32[1,128], index: 2, kind: input, shape index: {}]   ;;  %s757_s3 = inlined_call_operand.vmem [shape: bf16[8,128], index: 3, kind: output, shape index: {}]  }
   0x1   :  { %v568_v0 = vld [vmem:[%s754_s1 + $0x40] sm:$0xff]   ;;  %v572_v4 = vld [vmem:[%s754_s1 + $0x48] sm:$0xff]   ;;  %v576_v8 = vld [vmem:[%s754_s1 + $0x50] sm:$0xff]  }
   0x2   :  { %v569_v1 = vld [vmem:[%s754_s1] sm:$0xff]   ;;  %505 = vmatprep.subr.bf16.mxu0 %v568_v0  ;;  %v573_v5 = vld [vmem:[%s754_s1 + $0x8] sm:$0xff]   ;;  %v577_v9 = vld [vmem:[%s754_s1 + $0x10] sm:$0xff]  }
   0x3   :  { %v570_v2 = vld [vmem:[%s754_s1 + $0xc0] sm:$0xff]   ;;  %506 = vmatpush3.bf16.msra.mxu0 %v569_v1  ;;  %v574_v6 = vld [vmem:[%s754_s1 + $0xc8] sm:$0xff]   ;;  %v578_v10 = vld [vmem:[%s754_s1 + $0xd0] sm:$0xff]  }
   0x4   :  { %v571_v3 = vld [vmem:[%s754_s1 + $0x80] sm:$0xff]   ;;  %527 = vmatprep.subr.bf16.mxu1 %v570_v2  ;;  %507 = vmatprep.subr.bf16.mxu0 %v572_v4  ;;  %v575_v7 = vld [vmem:[%s754_s1 + $0x88] sm:$0xff]   ;;  %v579_v11 = vld [vmem:[%s754_s1 + $0x90] sm:$0xff]  }
   0x5   :  { %528 = vmatpush3.bf16.msra.mxu1 %v571_v3  ;;  %v580_v12 = vld [vmem:[%s754_s1 + $0x58] sm:$0xff]   ;;  %v584_v16 = vld [vmem:[%s754_s1 + $0x60] sm:$0xff]   ;;  %v588_v20 = vld [vmem:[%s754_s1 + $0x68] sm:$0xff]  }
   0x6   :  { %529 = vmatprep.subr.bf16.mxu1 %v574_v6  ;;  %v581_v13 = vld [vmem:[%s754_s1 + $0x18] sm:$0xff]   ;;  %v585_v17 = vld [vmem:[%s754_s1 + $0x20] sm:$0xff]   ;;  %v589_v21 = vld [vmem:[%s754_s1 + $0x28] sm:$0xff]  }
   0x7   :  { %508 = vmatpush3.bf16.msra.mxu0 %v573_v5  ;;  %v582_v14 = vld [vmem:[%s754_s1 + $0xd8] sm:$0xff]   ;;  %v586_v18 = vld [vmem:[%s754_s1 + $0xe0] sm:$0xff]   ;;  %v590_v22 = vld [vmem:[%s754_s1 + $0xe8] sm:$0xff]  }
   0x8   :  { %509 = vmatprep.subr.bf16.mxu0 %v576_v8  ;;  %v583_v15 = vld [vmem:[%s754_s1 + $0x98] sm:$0xff]   ;;  %v587_v19 = vld [vmem:[%s754_s1 + $0xa0] sm:$0xff]   ;;  %v591_v23 = vld [vmem:[%s754_s1 + $0xa8] sm:$0xff]  }
   0x9   :  { %530 = vmatpush3.bf16.msra.mxu1 %v575_v7  ;;  %v592_v24 = vld [vmem:[%s754_s1 + $0x70] sm:$0xff]   ;;  %v596_v28 = vld [vmem:[%s754_s1 + $0x78] sm:$0xff]   ;;  %v15_v31 = vld [vmem:[%s755_s0] sm:$0xff] }
   0xa   :  { %531 = vmatprep.subr.bf16.mxu1 %v578_v10  ;;  %v593_v25 = vld [vmem:[%s754_s1 + $0x30] sm:$0xff]   ;;  %v597_v29 = vld [vmem:[%s754_s1 + $0x38] sm:$0xff]   ;;  %v463_v32 = vcombine.low %v15_v31, %v15_v31  ;;  %v464_v33 = vcombine.high %v15_v31, %v15_v31  ;;  %v16_v36 = vld [vmem:[%s755_s0 + $0x8] sm:$0xff] }
   0xb   :  { %510 = vmatpush3.bf16.msra.mxu0 %v577_v9  ;;  %v594_v26 = vld [vmem:[%s754_s1 + $0xf0] sm:$0xff]   ;;  %v598_v30 = vld [vmem:[%s754_s1 + $0xf8] sm:$0xff]   ;;  %v465_v37 = vcombine.low %v16_v36, %v16_v36  ;;  %v466_v38 = vcombine.high %v16_v36, %v16_v36  ;;  %v605_v39 = vld [vmem:[%s754_s1 + $0x100] sm:$0xff]  }
   0xc   :  { %511 = vmatprep.subr.bf16.mxu0 %v580_v12  ;;  %v595_v27 = vld [vmem:[%s754_s1 + $0xb0] sm:$0xff]   ;;  %v602_v34 = vld [vmem:[%s754_s1 + $0xb8] sm:$0xff]   ;;  %366 = vmatprep.mubr.bf16.mxu0 %v464_v33  ;;  %v606_v40 = vld [vmem:[%s754_s1 + $0x108] sm:$0xff]  }
   0xd   :  { %532 = vmatpush3.bf16.msra.mxu1 %v579_v11  ;;  %406 = vmatprep.mubr.bf16.mxu1 %v466_v38  ;;  %v607_v41 = vld [vmem:[%s754_s1 + $0x110] sm:$0xff]   ;;  %v608_v42 = vld [vmem:[%s754_s1 + $0x118] sm:$0xff]   ;;  %v462_v45 = vld [vmem:[%s756_s2] ss:$0 sm:$0xff] }
   0xe   :  { %533 = vmatprep.subr.bf16.mxu1 %v582_v14  ;;  %v601_v43 = vld [vmem:[%s755_s0 + $0x10] ss:$0 sps:$4 sm:$0xff]  }
   0xf   :  { %512 = vmatpush3.bf16.msra.mxu0 %v581_v13 }
  0x10   :  { %513 = vmatprep.subr.bf16.mxu0 %v584_v16 }
  0x11   :  { %534 = vmatpush3.bf16.msra.mxu1 %v583_v15 }
  0x12   :  { %535 = vmatprep.subr.bf16.mxu1 %v586_v18 }
  0x13   :  { %514 = vmatpush3.bf16.msra.mxu0 %v585_v17 }
  0x14   :  { %515 = vmatprep.subr.bf16.mxu0 %v588_v20 }
  0x15   :  { %536 = vmatpush3.bf16.msra.mxu1 %v587_v19 }
  0x16   :  { %537 = vmatprep.subr.bf16.mxu1 %v590_v22 }
  0x17   :  { %516 = vmatpush3.bf16.msra.mxu0 %v589_v21 }
  0x18   :  { %517 = vmatprep.subr.bf16.mxu0 %v592_v24 }
  0x19   :  { %538 = vmatpush3.bf16.msra.mxu1 %v591_v23 }
  0x1a   :  { %539 = vmatprep.subr.bf16.mxu1 %v594_v26 }
  0x1b   :  { %518 = vmatpush3.bf16.msra.mxu0 %v593_v25 }
  0x1c   :  { %519 = vmatprep.subr.bf16.mxu0 %v596_v28 }
  0x1d   :  { %540 = vmatpush3.bf16.msra.mxu1 %v595_v27 }
  0x1e   :  { %541 = vmatprep.subr.bf16.mxu1 %v598_v30 }
  0x1f   :  { %520 = vmatpush3.bf16.msra.mxu0 %v597_v29 }
  0x20   :  { %554 = vmatprep.subr.bf16.mxu0 %v609_v35 }
  0x21   :  { %542 = vmatpush3.bf16.msra.mxu1 %v602_v34 }
  0x22   :  { %367 = vmatmul.mubr.bf16.vlgmr.msra.gmra.mrb[0].mxu0 %v463_v32 }
  0x23   :  { %555 = vmatpush3.bf16.msra.mxu0 %v605_v39  ;;  %562 = vmatprep.mubr.msk.bf16.mxu0 %vm610_vm0, %v609_v35 }
  0x24   :  { %407 = vmatmul.mubr.bf16.vlgmr.msra.gmra.mrb[0].mxu1 %v465_v37  ;;  %556 = vmatprep.subr.bf16.mxu0 %v609_v35 }
  0x27   :  { %557 = vmatpush3.bf16.msra.mxu0 %v606_v40 }
  0x28   :  { %558 = vmatprep.subr.bf16.mxu0 %v609_v35 }
  0x2b   :  { %559 = vmatpush3.bf16.msra.mxu0 %v607_v41 }
  0x2c   :  { %560 = vmatprep.subr.bf16.mxu0 %v609_v35 }
  0x2f   :  { %561 = vmatpush3.bf16.msra.mxu0 %v608_v42 }
  0x32   :  { %563 = vmatmul.mubr.msk.bf16.vlgmr.msra.gmra.mrb[4].mxu0 %vm330_vm1, %v601_v43 }
  0xf5   :  { %v521_v44 = vpop.f32.mrb[0].mxu0 }
  0xf6   :  { %v522_v46 = vpop.f32.mrb[1].mxu0 }
  0xf7   :  { %v523_v47 = vadd.f32 %v522_v46, %v521_v44  ;;  %v524_v48 = vpop.f32.mrb[2].mxu0  ;;  %v543_v49 = vpop.f32.mrb[0].mxu1 }
  0xf8   :  { %v525_v50 = vpop.f32.mrb[3].mxu0  ;;  %v544_v51 = vpop.f32.mrb[1].mxu1 }
  0xf9   :  { %v369_v52 = vadd.f32 %v523_v47, %v462_v45  ;;  %v545_v53 = vadd.f32 %v544_v51, %v543_v49  ;;  %v546_v54 = vpop.f32.mrb[2].mxu1 }
  0xfa   :  { %v547_v55 = vpop.f32.mrb[3].mxu1 }
  0xfb   :  { %v409_v56 = vadd.f32 %v545_v53, %v369_v52 }
 0x105   :  { %v448_v57 = vpop.f32.mrb[4].mxu0 }
 0x106   :  { %v449_v58 = vadd.f32 %v448_v57, %v409_v56  ;;  %v564_v59 = vpop.f32.mrb[5].mxu0 }
 0x107   :  { %v451_v60 = vpop.f32.mrb[6].mxu0 }
 0x108   :  { %v454_v61 = vmul.f32 0.2, %v449_v58  ;;  %v565_v62 = vpop.f32.mrb[7].mxu0 }
 0x10a   :  { %v455_v63 = vmax.f32 %v449_v58, %v454_v61 }
 0x10c   :  { %v456_v0 = vpack.c.bf16 %v455_v63, %v455_v63 }
 0x10e   :  { %457 = vst [vmem:[%s757_s3] sm:$0xf] %v456_v0 }

</bundles_post_ra>
